<compile_context>
chip_gen: v7x
topology: tpu7x:2x2x1
jax: 0.10.0
libtpu: 0.0.40
codegen_flags: <defaults>
</compile_context>

<pallas_src>
import functools

import jax
import jax.numpy as jnp
from jax import lax
from jax.experimental import pallas as pl
from jax.experimental.pallas import tpu as pltpu


def _round_up(x, m):
    return (x + m - 1) // m * m


# ----------------------------------------------------------------------------
# Fused Pallas kernel: all LSTM layers + linear head
# ----------------------------------------------------------------------------
def make_fused_lstm_kernel(T, num_layers, P, unroll):
    """Builds the kernel for fixed (static) T, num_layers, padded width P."""
    G = 4 * P  # gate width (lane-aligned: each gate block is exactly P lanes)

    def kernel(x_ref, wih_ref, whh_ref, b_ref, fcw_ref, fcb_ref, y_ref,
               gx_ref, hseq_ref):
        # x_ref   : (T, Bp, P)     padded embedded inputs (seq-major)
        # wih_ref : (L, P, 4P)     input->gate weights (transposed, gate-padded)
        # whh_ref : (L, P, 4P)     hidden->gate weights (transposed, gate-padded)
        # b_ref   : (L, 1, 4P)     combined bias b_ih + b_hh (gate-padded)
        # fcw_ref : (P, Cp)        hidden2label weight (transposed, padded)
        # fcb_ref : (1, Cp)        hidden2label bias (padded)
        # y_ref   : (Bp, Cp)       logits output (lane-dense)
        # gx_ref  : (T, Bp, 4P)    VMEM scratch: precomputed x @ W_ih + b
        # hseq_ref: (T, Bp, P)     VMEM scratch: layer output sequence
        Bp = x_ref.shape[1]

        def run_layer(layer, inp2d):
            # (1) Hoisted input projection: one big MXU matmul for ALL timesteps.
            gx = jnp.dot(inp2d, wih_ref[layer],
                         preferred_element_type=jnp.float32) + b_ref[layer]
            gx_ref[...] = gx.reshape(T, Bp, G)

            # (2) Hoisted recurrent weight load (invariant across the time loop).
            whh_l = whh_ref[layer]
            is_last = layer == num_layers - 1

            def step(t, carry):
                h, c = carry
                g = gx_ref[t] + jnp.dot(h, whh_l,
                                        preferred_element_type=jnp.float32)
                # PyTorch gate order i, f, g, o; each slice is 128-lane aligned.
                i_g = jax.nn.sigmoid(g[:, 0 * P:1 * P])
                f_g = jax.nn.sigmoid(g[:, 1 * P:2 * P])
                g_g = jnp.tanh(g[:, 2 * P:3 * P])
                o_g = jax.nn.sigmoid(g[:, 3 * P:4 * P])
                c_new = f_g * c + i_g * g_g
                h_new = o_g * jnp.tanh(c_new)
                if not is_last:
                    hseq_ref[t] = h_new       # lane-dense (Bp, P) store
                return h_new, c_new

            h0 = jnp.zeros((Bp, P), jnp.float32)
            c0 = jnp.zeros((Bp, P), jnp.float32)
            h_last, _ = lax.fori_loop(0, T, step, (h0, c0), unroll=unroll)
            return h_last

        # Layer 0 consumes the embedded tokens; later layers consume hseq.
        h_last = run_layer(0, x_ref[...].reshape(T * Bp, P))
        for layer in range(1, num_layers):
            h_last = run_layer(layer, hseq_ref[...].reshape(T * Bp, P))

        # (3) Fused hidden2label head: only h_last leaves the kernel.
        y_ref[...] = (jnp.dot(h_last, fcw_ref[...],
                              preferred_element_type=jnp.float32)
                      + fcb_ref[...])

    return kernel


# ----------------------------------------------------------------------------
# Weight / activation padding helpers (gate-block aware, zero-padded so the
# padded lanes provably stay zero through the recurrence).
# ----------------------------------------------------------------------------
def _pad_gate_weight(w, H, P):
    """w: (4H, K) PyTorch layout -> (P, 4P) transposed, per-gate padded."""
    k = w.shape[1]
    w4 = w.reshape(4, H, k)
    w4p = jnp.zeros((4, P, P), jnp.float32).at[:, :H, :k].set(w4)
    return jnp.transpose(w4p, (2, 0, 1)).reshape(P, 4 * P)


def _pad_gate_bias(b, H, P):
    b4 = b.reshape(4, H)
    b4p = jnp.zeros((4, P), jnp.float32).at[:, :H].set(b4)
    return b4p.reshape(1, 4 * P)


# ----------------------------------------------------------------------------
# Forward wrapper
# ----------------------------------------------------------------------------
@functools.partial(jax.jit, static_argnames=("num_layers",))
def lstm_forward(tokens, params, num_layers):
    """tokens: (B, T) int32 -> logits (B, CLASS_SIZE) float32."""
    # Embedding lookup (plain-JAX gather glue), then transpose(0,1) like PyTorch.
    emb = jnp.take(params["embedding"], tokens, axis=0)        # (B, T, D)
    x_seq = jnp.transpose(emb, (1, 0, 2)).astype(jnp.float32)  # (T, B, D)

    T, B, D = x_seq.shape
    H = params["lstm"][0]["w_hh"].shape[1]
    C = params["fc_w"].shape[0]

    # Uniform padded width for both the input and hidden dims (lane alignment).
    P = max(_round_up(D, 128), _round_up(H, 128))
    Bp = _round_up(B, 8)
    Cp = _round_up(C, 128)

    x_pad = jnp.zeros((T, Bp, P), jnp.float32).at[:, :B, :D].set(x_seq)

    wih_list, whh_list, b_list = [], [], []
    for layer in range(num_layers):
        p = params["lstm"][layer]
        wih_list.append(_pad_gate_weight(p["w_ih"], H, P))
        whh_list.append(_pad_gate_weight(p["w_hh"], H, P))
        b_list.append(_pad_gate_bias(p["b_ih"] + p["b_hh"], H, P))
    wih_stack = jnp.stack(wih_list)        # (L, P, 4P)
    whh_stack = jnp.stack(whh_list)        # (L, P, 4P)
    b_stack = jnp.stack(b_list)            # (L, 1, 4P)

    fcw = jnp.zeros((P, Cp), jnp.float32).at[:H, :C].set(params["fc_w"].T)
    fcb = jnp.zeros((1, Cp), jnp.float32).at[0, :C].set(params["fc_b"])

    kernel = make_fused_lstm_kernel(
        T=T, num_layers=num_layers, P=P,
        unroll=True if T <= 16 else 8,
    )

    vmem = pl.BlockSpec(memory_space=pltpu.MemorySpace.VMEM)
    y_pad = pl.pallas_call(
        kernel,
        out_shape=jax.ShapeDtypeStruct((Bp, Cp), jnp.float32),
        in_specs=[vmem] * 6,
        out_specs=vmem,
        scratch_shapes=[
            pltpu.VMEM((T, Bp, 4 * P), jnp.float32),   # gx scratch
            pltpu.VMEM((T, Bp, P), jnp.float32),       # hseq scratch
        ],
    )(x_pad, wih_stack, whh_stack, b_stack, fcw, fcb)

    return y_pad[:B, :C]


# ----------------------------------------------------------------------------
# Pure-JAX reference (for numerical verification)
# ----------------------------------------------------------------------------
def lstm_forward_ref(tokens, params, num_layers):
    emb = jnp.take(params["embedding"], tokens, axis=0)
    x_seq = jnp.transpose(emb, (1, 0, 2))
    for layer in range(num_layers):
        p = params["lstm"][layer]
        H = p["w_hh"].shape[1]
        wih_t, whh_t = p["w_ih"].T, p["w_hh"].T
        bias = p["b_ih"] + p["b_hh"]

        def step(carry, x_t):
            h, c = carry
            gates = x_t @ wih_t + h @ whh_t + bias
            i_g = jax.nn.sigmoid(gates[:, 0 * H:1 * H])
            f_g = jax.nn.sigmoid(gates[:, 1 * H:2 * H])
            g_g = jnp.tanh(gates[:, 2 * H:3 * H])
            o_g = jax.nn.sigmoid(gates[:, 3 * H:4 * H])
            c_new = f_g * c + i_g * g_g
            h_new = o_g * jnp.tanh(c_new)
            return (h_new, c_new), h_new

        B = x_seq.shape[1]
        init = (jnp.zeros((B, H), jnp.float32), jnp.zeros((B, H), jnp.float32))
        _, x_seq = lax.scan(step, init, x_seq)
    return x_seq[-1] @ params["fc_w"].T + params["fc_b"]


# ----------------------------------------------------------------------------
# Deterministic parameter init (matching nn.Embedding / nn.LSTM / nn.Linear shapes)
# ----------------------------------------------------------------------------
def init_params(key, vocab_size, word_dim, hidden_dim, class_size, num_layers):
    keys = jax.random.split(key, 2 + 4 * num_layers + 2)
    k_iter = iter(keys)
    params = {}
    params["embedding"] = jax.random.normal(
        next(k_iter), (vocab_size + 2, word_dim), jnp.float32
    ) * 0.1

    bound = 1.0 / jnp.sqrt(hidden_dim)
    lstm_layers = []
    for layer in range(num_layers):
        d_in = word_dim if layer == 0 else hidden_dim
        lstm_layers.append({
            "w_ih": jax.random.uniform(next(k_iter), (4 * hidden_dim, d_in),
                                       jnp.float32, -bound, bound),
            "w_hh": jax.random.uniform(next(k_iter), (4 * hidden_dim, hidden_dim),
                                       jnp.float32, -bound, bound),
            "b_ih": jax.random.uniform(next(k_iter), (4 * hidden_dim,),
                                       jnp.float32, -bound, bound),
            "b_hh": jax.random.uniform(next(k_iter), (4 * hidden_dim,),
                                       jnp.float32, -bound, bound),
        })
    params["lstm"] = lstm_layers

    fc_bound = 1.0 / jnp.sqrt(hidden_dim)
    params["fc_w"] = jax.random.uniform(next(k_iter), (class_size, hidden_dim),
                                        jnp.float32, -fc_bound, fc_bound)
    params["fc_b"] = jax.random.uniform(next(k_iter), (class_size,),
                                        jnp.float32, -fc_bound, fc_bound)
    return params


# ----------------------------------------------------------------------------
if __name__ == "__main__":
    # Small config consistent with the module's kwargs.
    BATCH_SIZE = 2
    MAX_SENT_LEN = 8
    WORD_DIM = 32
    HIDDEN_DIM = 32
    VOCAB_SIZE = 100
    CLASS_SIZE = 4
    NUM_LAYERS = 2

    key = jax.random.PRNGKey(0)
    k_params, k_tokens = jax.random.split(key)
    params = init_params(k_params, VOCAB_SIZE, WORD_DIM, HIDDEN_DIM,
                         CLASS_SIZE, NUM_LAYERS)
    tokens = jax.random.randint(k_tokens, (BATCH_SIZE, MAX_SENT_LEN),
                                0, VOCAB_SIZE + 2, dtype=jnp.int32)

    y = lstm_forward(tokens, params, NUM_LAYERS)
    y = jax.block_until_ready(y)

    y_ref = jax.block_until_ready(lstm_forward_ref(tokens, params, NUM_LAYERS))
    assert y.shape == (BATCH_SIZE, CLASS_SIZE)
    assert jnp.allclose(y, y_ref, atol=1e-4, rtol=1e-4), (y, y_ref)

    print("KERNEL_OK")
</pallas_src>

<mosaic_0001>
module attributes {stable_mosaic.version = 11 : i64} {
  func.func @kernel(%arg0: memref<8x8x128xf32, #tpu.memory_space<vmem>>, %arg1: memref<2x128x512xf32, #tpu.memory_space<vmem>>, %arg2: memref<2x128x512xf32, #tpu.memory_space<vmem>>, %arg3: memref<2x1x512xf32, #tpu.memory_space<vmem>>, %arg4: memref<128x128xf32, #tpu.memory_space<vmem>>, %arg5: memref<1x128xf32, #tpu.memory_space<vmem>>, %arg6: memref<8x128xf32, #tpu.memory_space<vmem>>, %arg7: memref<8x8x512xf32, #tpu.memory_space<vmem>>, %arg8: memref<8x8x128xf32, #tpu.memory_space<vmem>>) attributes {dimension_semantics = [], scalar_prefetch = 0 : i64, scratch_operands = 2 : i64, tpu.core_type = #tpu.core_type<tc>} {
    %c0 = arith.constant 0 : index
    %c0_0 = arith.constant 0 : index
    %c0_1 = arith.constant 0 : index
    %0 = vector.load %arg0[%c0, %c0_0, %c0_1] : memref<8x8x128xf32, #tpu.memory_space<vmem>>, vector<8x8x128xf32>
    %1 = vector.shape_cast %0 : vector<8x8x128xf32> to vector<64x128xf32>
    %c0_2 = arith.constant 0 : index
    %c0_3 = arith.constant 0 : index
    %c0_4 = arith.constant 0 : index
    %2 = vector.load %arg1[%c0_2, %c0_3, %c0_4] : memref<2x128x512xf32, #tpu.memory_space<vmem>>, vector<1x128x512xf32>
    %3 = vector.shape_cast %2 : vector<1x128x512xf32> to vector<128x512xf32>
    %cst = arith.constant dense<0.000000e+00> : vector<64x512xf32>
    %4 = tpu.matmul %1, %3, %cst {dimension_numbers = #tpu.dot_dimension_numbers<[1], [0], [0], [1], [0, 0, 1, 1], [], []>} : vector<64x128xf32>, vector<128x512xf32>, vector<64x512xf32> -> vector<64x512xf32>
    %c0_5 = arith.constant 0 : index
    %c0_6 = arith.constant 0 : index
    %c0_7 = arith.constant 0 : index
    %5 = vector.load %arg3[%c0_5, %c0_6, %c0_7] : memref<2x1x512xf32, #tpu.memory_space<vmem>>, vector<1x1x512xf32>
    %6 = vector.shape_cast %5 : vector<1x1x512xf32> to vector<1x512xf32>
    %7 = vector.broadcast %6 : vector<1x512xf32> to vector<64x512xf32>
    %8 = arith.addf %4, %7 : vector<64x512xf32>
    %9 = vector.shape_cast %8 : vector<64x512xf32> to vector<8x8x512xf32>
    %c0_8 = arith.constant 0 : index
    %c0_9 = arith.constant 0 : index
    %c0_10 = arith.constant 0 : index
    %10 = vector.load %arg7[%c0_8, %c0_9, %c0_10] : memref<8x8x512xf32, #tpu.memory_space<vmem>>, vector<8x8x512xf32>
    tpu.vector_store %arg7[%c0_8, %c0_9, %c0_10], %9 {strides = array<i32>} : memref<8x8x512xf32, #tpu.memory_space<vmem>>, vector<8x8x512xf32>,
    %c0_11 = arith.constant 0 : index
    %c0_12 = arith.constant 0 : index
    %c0_13 = arith.constant 0 : index
    %11 = vector.load %arg2[%c0_11, %c0_12, %c0_13] : memref<2x128x512xf32, #tpu.memory_space<vmem>>, vector<1x128x512xf32>
    %12 = vector.shape_cast %11 : vector<1x128x512xf32> to vector<128x512xf32>
    %cst_14 = arith.constant 0.000000e+00 : f32
    %13 = vector.broadcast %cst_14 : f32 to vector<8x128xf32>
    %cst_15 = arith.constant 0.000000e+00 : f32
    %14 = vector.broadcast %cst_15 : f32 to vector<8x128xf32>
    %c0_i32 = arith.constant 0 : i32
    %15 = arith.index_cast %c0_i32 : i32 to index
    %c0_16 = arith.constant 0 : index
    %c0_17 = arith.constant 0 : index
    %16 = vector.load %arg7[%15, %c0_16, %c0_17] : memref<8x8x512xf32, #tpu.memory_space<vmem>>, vector<1x8x512xf32>
    %17 = vector.shape_cast %16 : vector<1x8x512xf32> to vector<8x512xf32>
    %cst_18 = arith.constant dense<0.000000e+00> : vector<8x512xf32>
    %18 = tpu.matmul %13, %12, %cst_18 {dimension_numbers = #tpu.dot_dimension_numbers<[1], [0], [0], [1], [0, 0, 1, 1], [], []>} : vector<8x128xf32>, vector<128x512xf32>, vector<8x512xf32> -> vector<8x512xf32>
    %19 = arith.addf %17, %18 : vector<8x512xf32>
    %20 = vector.extract_strided_slice %19 {offsets = [0, 0], sizes = [8, 128], strides = [1, 1]} : vector<8x512xf32> to vector<8x128xf32>
    %21 = arith.negf %20 : vector<8x128xf32>
    %22 = math.exp %21 : vector<8x128xf32>
    %cst_19 = arith.constant 1.000000e+00 : f32
    %23 = vector.broadcast %cst_19 : f32 to vector<8x128xf32>
    %24 = arith.addf %23, %22 : vector<8x128xf32>
    %25 = arith.divf %23, %24 : vector<8x128xf32>
    %26 = vector.extract_strided_slice %19 {offsets = [0, 128], sizes = [8, 128], strides = [1, 1]} : vector<8x512xf32> to vector<8x128xf32>
    %27 = arith.negf %26 : vector<8x128xf32>
    %28 = math.exp %27 : vector<8x128xf32>
    %cst_20 = arith.constant 1.000000e+00 : f32
    %29 = vector.broadcast %cst_20 : f32 to vector<8x128xf32>
    %30 = arith.addf %29, %28 : vector<8x128xf32>
    %31 = arith.divf %29, %30 : vector<8x128xf32>
    %32 = vector.extract_strided_slice %19 {offsets = [0, 256], sizes = [8, 128], strides = [1, 1]} : vector<8x512xf32> to vector<8x128xf32>
    %33 = math.tanh %32 : vector<8x128xf32>
    %34 = vector.extract_strided_slice %19 {offsets = [0, 384], sizes = [8, 128], strides = [1, 1]} : vector<8x512xf32> to vector<8x128xf32>
    %35 = arith.negf %34 : vector<8x128xf32>
    %36 = math.exp %35 : vector<8x128xf32>
    %cst_21 = arith.constant 1.000000e+00 : f32
    %37 = vector.broadcast %cst_21 : f32 to vector<8x128xf32>
    %38 = arith.addf %37, %36 : vector<8x128xf32>
    %39 = arith.divf %37, %38 : vector<8x128xf32>
    %40 = arith.mulf %31, %14 : vector<8x128xf32>
    %41 = arith.mulf %25, %33 : vector<8x128xf32>
    %42 = arith.addf %40, %41 : vector<8x128xf32>
    %43 = math.tanh %42 : vector<8x128xf32>
    %44 = arith.mulf %39, %43 : vector<8x128xf32>
    %45 = arith.index_cast %c0_i32 : i32 to index
    %c0_22 = arith.constant 0 : index
    %c0_23 = arith.constant 0 : index
    %46 = vector.load %arg8[%45, %c0_22, %c0_23] : memref<8x8x128xf32, #tpu.memory_space<vmem>>, vector<1x8x128xf32>
    %47 = vector.shape_cast %46 : vector<1x8x128xf32> to vector<8x128xf32>
    %48 = vector.shape_cast %44 : vector<8x128xf32> to vector<1x8x128xf32>
    tpu.vector_store %arg8[%45, %c0_22, %c0_23], %48 {strides = array<i32>} : memref<8x8x128xf32, #tpu.memory_space<vmem>>, vector<1x8x128xf32>,
    %c1_i32 = arith.constant 1 : i32
    %49 = arith.index_cast %c1_i32 : i32 to index
    %c0_24 = arith.constant 0 : index
    %c0_25 = arith.constant 0 : index
    %50 = vector.load %arg7[%49, %c0_24, %c0_25] : memref<8x8x512xf32, #tpu.memory_space<vmem>>, vector<1x8x512xf32>
    %51 = vector.shape_cast %50 : vector<1x8x512xf32> to vector<8x512xf32>
    %cst_26 = arith.constant dense<0.000000e+00> : vector<8x512xf32>
    %52 = tpu.matmul %44, %12, %cst_26 {dimension_numbers = #tpu.dot_dimension_numbers<[1], [0], [0], [1], [0, 0, 1, 1], [], []>} : vector<8x128xf32>, vector<128x512xf32>, vector<8x512xf32> -> vector<8x512xf32>
    %53 = arith.addf %51, %52 : vector<8x512xf32>
    %54 = vector.extract_strided_slice %53 {offsets = [0, 0], sizes = [8, 128], strides = [1, 1]} : vector<8x512xf32> to vector<8x128xf32>
    %55 = arith.negf %54 : vector<8x128xf32>
    %56 = math.exp %55 : vector<8x128xf32>
    %cst_27 = arith.constant 1.000000e+00 : f32
    %57 = vector.broadcast %cst_27 : f32 to vector<8x128xf32>
    %58 = arith.addf %57, %56 : vector<8x128xf32>
    %59 = arith.divf %57, %58 : vector<8x128xf32>
    %60 = vector.extract_strided_slice %53 {offsets = [0, 128], sizes = [8, 128], strides = [1, 1]} : vector<8x512xf32> to vector<8x128xf32>
    %61 = arith.negf %60 : vector<8x128xf32>
    %62 = math.exp %61 : vector<8x128xf32>
    %cst_28 = arith.constant 1.000000e+00 : f32
    %63 = vector.broadcast %cst_28 : f32 to vector<8x128xf32>
    %64 = arith.addf %63, %62 : vector<8x128xf32>
    %65 = arith.divf %63, %64 : vector<8x128xf32>
    %66 = vector.extract_strided_slice %53 {offsets = [0, 256], sizes = [8, 128], strides = [1, 1]} : vector<8x512xf32> to vector<8x128xf32>
    %67 = math.tanh %66 : vector<8x128xf32>
    %68 = vector.extract_strided_slice %53 {offsets = [0, 384], sizes = [8, 128], strides = [1, 1]} : vector<8x512xf32> to vector<8x128xf32>
    %69 = arith.negf %68 : vector<8x128xf32>
    %70 = math.exp %69 : vector<8x128xf32>
    %cst_29 = arith.constant 1.000000e+00 : f32
    %71 = vector.broadcast %cst_29 : f32 to vector<8x128xf32>
    %72 = arith.addf %71, %70 : vector<8x128xf32>
    %73 = arith.divf %71, %72 : vector<8x128xf32>
    %74 = arith.mulf %65, %42 : vector<8x128xf32>
    %75 = arith.mulf %59, %67 : vector<8x128xf32>
    %76 = arith.addf %74, %75 : vector<8x128xf32>
    %77 = math.tanh %76 : vector<8x128xf32>
    %78 = arith.mulf %73, %77 : vector<8x128xf32>
    %79 = arith.index_cast %c1_i32 : i32 to index
    %c0_30 = arith.constant 0 : index
    %c0_31 = arith.constant 0 : index
    %80 = vector.load %arg8[%79, %c0_30, %c0_31] : memref<8x8x128xf32, #tpu.memory_space<vmem>>, vector<1x8x128xf32>
    %81 = vector.shape_cast %80 : vector<1x8x128xf32> to vector<8x128xf32>
    %82 = vector.shape_cast %78 : vector<8x128xf32> to vector<1x8x128xf32>
    tpu.vector_store %arg8[%79, %c0_30, %c0_31], %82 {strides = array<i32>} : memref<8x8x128xf32, #tpu.memory_space<vmem>>, vector<1x8x128xf32>,
    %c2_i32 = arith.constant 2 : i32
    %83 = arith.index_cast %c2_i32 : i32 to index
    %c0_32 = arith.constant 0 : index
    %c0_33 = arith.constant 0 : index
    %84 = vector.load %arg7[%83, %c0_32, %c0_33] : memref<8x8x512xf32, #tpu.memory_space<vmem>>, vector<1x8x512xf32>
    %85 = vector.shape_cast %84 : vector<1x8x512xf32> to vector<8x512xf32>
    %cst_34 = arith.constant dense<0.000000e+00> : vector<8x512xf32>
    %86 = tpu.matmul %78, %12, %cst_34 {dimension_numbers = #tpu.dot_dimension_numbers<[1], [0], [0], [1], [0, 0, 1, 1], [], []>} : vector<8x128xf32>, vector<128x512xf32>, vector<8x512xf32> -> vector<8x512xf32>
    %87 = arith.addf %85, %86 : vector<8x512xf32>
    %88 = vector.extract_strided_slice %87 {offsets = [0, 0], sizes = [8, 128], strides = [1, 1]} : vector<8x512xf32> to vector<8x128xf32>
    %89 = arith.negf %88 : vector<8x128xf32>
    %90 = math.exp %89 : vector<8x128xf32>
    %cst_35 = arith.constant 1.000000e+00 : f32
    %91 = vector.broadcast %cst_35 : f32 to vector<8x128xf32>
    %92 = arith.addf %91, %90 : vector<8x128xf32>
    %93 = arith.divf %91, %92 : vector<8x128xf32>
    %94 = vector.extract_strided_slice %87 {offsets = [0, 128], sizes = [8, 128], strides = [1, 1]} : vector<8x512xf32> to vector<8x128xf32>
    %95 = arith.negf %94 : vector<8x128xf32>
    %96 = math.exp %95 : vector<8x128xf32>
    %cst_36 = arith.constant 1.000000e+00 : f32
    %97 = vector.broadcast %cst_36 : f32 to vector<8x128xf32>
    %98 = arith.addf %97, %96 : vector<8x128xf32>
    %99 = arith.divf %97, %98 : vector<8x128xf32>
    %100 = vector.extract_strided_slice %87 {offsets = [0, 256], sizes = [8, 128], strides = [1, 1]} : vector<8x512xf32> to vector<8x128xf32>
    %101 = math.tanh %100 : vector<8x128xf32>
    %102 = vector.extract_strided_slice %87 {offsets = [0, 384], sizes = [8, 128], strides = [1, 1]} : vector<8x512xf32> to vector<8x128xf32>
    %103 = arith.negf %102 : vector<8x128xf32>
    %104 = math.exp %103 : vector<8x128xf32>
    %cst_37 = arith.constant 1.000000e+00 : f32
    %105 = vector.broadcast %cst_37 : f32 to vector<8x128xf32>
    %106 = arith.addf %105, %104 : vector<8x128xf32>
    %107 = arith.divf %105, %106 : vector<8x128xf32>
    %108 = arith.mulf %99, %76 : vector<8x128xf32>
    %109 = arith.mulf %93, %101 : vector<8x128xf32>
    %110 = arith.addf %108, %109 : vector<8x128xf32>
    %111 = math.tanh %110 : vector<8x128xf32>
    %112 = arith.mulf %107, %111 : vector<8x128xf32>
    %113 = arith.index_cast %c2_i32 : i32 to index
    %c0_38 = arith.constant 0 : index
    %c0_39 = arith.constant 0 : index
    %114 = vector.load %arg8[%113, %c0_38, %c0_39] : memref<8x8x128xf32, #tpu.memory_space<vmem>>, vector<1x8x128xf32>
    %115 = vector.shape_cast %114 : vector<1x8x128xf32> to vector<8x128xf32>
    %116 = vector.shape_cast %112 : vector<8x128xf32> to vector<1x8x128xf32>
    tpu.vector_store %arg8[%113, %c0_38, %c0_39], %116 {strides = array<i32>} : memref<8x8x128xf32, #tpu.memory_space<vmem>>, vector<1x8x128xf32>,
    %c3_i32 = arith.constant 3 : i32
    %117 = arith.index_cast %c3_i32 : i32 to index
    %c0_40 = arith.constant 0 : index
    %c0_41 = arith.constant 0 : index
    %118 = vector.load %arg7[%117, %c0_40, %c0_41] : memref<8x8x512xf32, #tpu.memory_space<vmem>>, vector<1x8x512xf32>
    %119 = vector.shape_cast %118 : vector<1x8x512xf32> to vector<8x512xf32>
    %cst_42 = arith.constant dense<0.000000e+00> : vector<8x512xf32>
    %120 = tpu.matmul %112, %12, %cst_42 {dimension_numbers = #tpu.dot_dimension_numbers<[1], [0], [0], [1], [0, 0, 1, 1], [], []>} : vector<8x128xf32>, vector<128x512xf32>, vector<8x512xf32> -> vector<8x512xf32>
    %121 = arith.addf %119, %120 : vector<8x512xf32>
    %122 = vector.extract_strided_slice %121 {offsets = [0, 0], sizes = [8, 128], strides = [1, 1]} : vector<8x512xf32> to vector<8x128xf32>
    %123 = arith.negf %122 : vector<8x128xf32>
    %124 = math.exp %123 : vector<8x128xf32>
    %cst_43 = arith.constant 1.000000e+00 : f32
    %125 = vector.broadcast %cst_43 : f32 to vector<8x128xf32>
    %126 = arith.addf %125, %124 : vector<8x128xf32>
    %127 = arith.divf %125, %126 : vector<8x128xf32>
    %128 = vector.extract_strided_slice %121 {offsets = [0, 128], sizes = [8, 128], strides = [1, 1]} : vector<8x512xf32> to vector<8x128xf32>
    %129 = arith.negf %128 : vector<8x128xf32>
    %130 = math.exp %129 : vector<8x128xf32>
    %cst_44 = arith.constant 1.000000e+00 : f32
    %131 = vector.broadcast %cst_44 : f32 to vector<8x128xf32>
    %132 = arith.addf %131, %130 : vector<8x128xf32>
    %133 = arith.divf %131, %132 : vector<8x128xf32>
    %134 = vector.extract_strided_slice %121 {offsets = [0, 256], sizes = [8, 128], strides = [1, 1]} : vector<8x512xf32> to vector<8x128xf32>
    %135 = math.tanh %134 : vector<8x128xf32>
    %136 = vector.extract_strided_slice %121 {offsets = [0, 384], sizes = [8, 128], strides = [1, 1]} : vector<8x512xf32> to vector<8x128xf32>
    %137 = arith.negf %136 : vector<8x128xf32>
    %138 = math.exp %137 : vector<8x128xf32>
    %cst_45 = arith.constant 1.000000e+00 : f32
    %139 = vector.broadcast %cst_45 : f32 to vector<8x128xf32>
    %140 = arith.addf %139, %138 : vector<8x128xf32>
    %141 = arith.divf %139, %140 : vector<8x128xf32>
    %142 = arith.mulf %133, %110 : vector<8x128xf32>
    %143 = arith.mulf %127, %135 : vector<8x128xf32>
    %144 = arith.addf %142, %143 : vector<8x128xf32>
    %145 = math.tanh %144 : vector<8x128xf32>
    %146 = arith.mulf %141, %145 : vector<8x128xf32>
    %147 = arith.index_cast %c3_i32 : i32 to index
    %c0_46 = arith.constant 0 : index
    %c0_47 = arith.constant 0 : index
    %148 = vector.load %arg8[%147, %c0_46, %c0_47] : memref<8x8x128xf32, #tpu.memory_space<vmem>>, vector<1x8x128xf32>
    %149 = vector.shape_cast %148 : vector<1x8x128xf32> to vector<8x128xf32>
    %150 = vector.shape_cast %146 : vector<8x128xf32> to vector<1x8x128xf32>
    tpu.vector_store %arg8[%147, %c0_46, %c0_47], %150 {strides = array<i32>} : memref<8x8x128xf32, #tpu.memory_space<vmem>>, vector<1x8x128xf32>,
    %c4_i32 = arith.constant 4 : i32
    %151 = arith.index_cast %c4_i32 : i32 to index
    %c0_48 = arith.constant 0 : index
    %c0_49 = arith.constant 0 : index
    %152 = vector.load %arg7[%151, %c0_48, %c0_49] : memref<8x8x512xf32, #tpu.memory_space<vmem>>, vector<1x8x512xf32>
    %153 = vector.shape_cast %152 : vector<1x8x512xf32> to vector<8x512xf32>
    %cst_50 = arith.constant dense<0.000000e+00> : vector<8x512xf32>
    %154 = tpu.matmul %146, %12, %cst_50 {dimension_numbers = #tpu.dot_dimension_numbers<[1], [0], [0], [1], [0, 0, 1, 1], [], []>} : vector<8x128xf32>, vector<128x512xf32>, vector<8x512xf32> -> vector<8x512xf32>
    %155 = arith.addf %153, %154 : vector<8x512xf32>
    %156 = vector.extract_strided_slice %155 {offsets = [0, 0], sizes = [8, 128], strides = [1, 1]} : vector<8x512xf32> to vector<8x128xf32>
    %157 = arith.negf %156 : vector<8x128xf32>
    %158 = math.exp %157 : vector<8x128xf32>
    %cst_51 = arith.constant 1.000000e+00 : f32
    %159 = vector.broadcast %cst_51 : f32 to vector<8x128xf32>
    %160 = arith.addf %159, %158 : vector<8x128xf32>
    %161 = arith.divf %159, %160 : vector<8x128xf32>
    %162 = vector.extract_strided_slice %155 {offsets = [0, 128], sizes = [8, 128], strides = [1, 1]} : vector<8x512xf32> to vector<8x128xf32>
    %163 = arith.negf %162 : vector<8x128xf32>
    %164 = math.exp %163 : vector<8x128xf32>
    %cst_52 = arith.constant 1.000000e+00 : f32
    %165 = vector.broadcast %cst_52 : f32 to vector<8x128xf32>
    %166 = arith.addf %165, %164 : vector<8x128xf32>
    %167 = arith.divf %165, %166 : vector<8x128xf32>
    %168 = vector.extract_strided_slice %155 {offsets = [0, 256], sizes = [8, 128], strides = [1, 1]} : vector<8x512xf32> to vector<8x128xf32>
    %169 = math.tanh %168 : vector<8x128xf32>
    %170 = vector.extract_strided_slice %155 {offsets = [0, 384], sizes = [8, 128], strides = [1, 1]} : vector<8x512xf32> to vector<8x128xf32>
    %171 = arith.negf %170 : vector<8x128xf32>
    %172 = math.exp %171 : vector<8x128xf32>
    %cst_53 = arith.constant 1.000000e+00 : f32
    %173 = vector.broadcast %cst_53 : f32 to vector<8x128xf32>
    %174 = arith.addf %173, %172 : vector<8x128xf32>
    %175 = arith.divf %173, %174 : vector<8x128xf32>
    %176 = arith.mulf %167, %144 : vector<8x128xf32>
    %177 = arith.mulf %161, %169 : vector<8x128xf32>
    %178 = arith.addf %176, %177 : vector<8x128xf32>
    %179 = math.tanh %178 : vector<8x128xf32>
    %180 = arith.mulf %175, %179 : vector<8x128xf32>
    %181 = arith.index_cast %c4_i32 : i32 to index
    %c0_54 = arith.constant 0 : index
    %c0_55 = arith.constant 0 : index
    %182 = vector.load %arg8[%181, %c0_54, %c0_55] : memref<8x8x128xf32, #tpu.memory_space<vmem>>, vector<1x8x128xf32>
    %183 = vector.shape_cast %182 : vector<1x8x128xf32> to vector<8x128xf32>
    %184 = vector.shape_cast %180 : vector<8x128xf32> to vector<1x8x128xf32>
    tpu.vector_store %arg8[%181, %c0_54, %c0_55], %184 {strides = array<i32>} : memref<8x8x128xf32, #tpu.memory_space<vmem>>, vector<1x8x128xf32>,
    %c5_i32 = arith.constant 5 : i32
    %185 = arith.index_cast %c5_i32 : i32 to index
    %c0_56 = arith.constant 0 : index
    %c0_57 = arith.constant 0 : index
    %186 = vector.load %arg7[%185, %c0_56, %c0_57] : memref<8x8x512xf32, #tpu.memory_space<vmem>>, vector<1x8x512xf32>
    %187 = vector.shape_cast %186 : vector<1x8x512xf32> to vector<8x512xf32>
    %cst_58 = arith.constant dense<0.000000e+00> : vector<8x512xf32>
    %188 = tpu.matmul %180, %12, %cst_58 {dimension_numbers = #tpu.dot_dimension_numbers<[1], [0], [0], [1], [0, 0, 1, 1], [], []>} : vector<8x128xf32>, vector<128x512xf32>, vector<8x512xf32> -> vector<8x512xf32>
    %189 = arith.addf %187, %188 : vector<8x512xf32>
    %190 = vector.extract_strided_slice %189 {offsets = [0, 0], sizes = [8, 128], strides = [1, 1]} : vector<8x512xf32> to vector<8x128xf32>
    %191 = arith.negf %190 : vector<8x128xf32>
    %192 = math.exp %191 : vector<8x128xf32>
    %cst_59 = arith.constant 1.000000e+00 : f32
    %193 = vector.broadcast %cst_59 : f32 to vector<8x128xf32>
    %194 = arith.addf %193, %192 : vector<8x128xf32>
    %195 = arith.divf %193, %194 : vector<8x128xf32>
    %196 = vector.extract_strided_slice %189 {offsets = [0, 128], sizes = [8, 128], strides = [1, 1]} : vector<8x512xf32> to vector<8x128xf32>
    %197 = arith.negf %196 : vector<8x128xf32>
    %198 = math.exp %197 : vector<8x128xf32>
    %cst_60 = arith.constant 1.000000e+00 : f32
    %199 = vector.broadcast %cst_60 : f32 to vector<8x128xf32>
    %200 = arith.addf %199, %198 : vector<8x128xf32>
    %201 = arith.divf %199, %200 : vector<8x128xf32>
    %202 = vector.extract_strided_slice %189 {offsets = [0, 256], sizes = [8, 128], strides = [1, 1]} : vector<8x512xf32> to vector<8x128xf32>
    %203 = math.tanh %202 : vector<8x128xf32>
    %204 = vector.extract_strided_slice %189 {offsets = [0, 384], sizes = [8, 128], strides = [1, 1]} : vector<8x512xf32> to vector<8x128xf32>
    %205 = arith.negf %204 : vector<8x128xf32>
    %206 = math.exp %205 : vector<8x128xf32>
    %cst_61 = arith.constant 1.000000e+00 : f32
    %207 = vector.broadcast %cst_61 : f32 to vector<8x128xf32>
    %208 = arith.addf %207, %206 : vector<8x128xf32>
    %209 = arith.divf %207, %208 : vector<8x128xf32>
    %210 = arith.mulf %201, %178 : vector<8x128xf32>
    %211 = arith.mulf %195, %203 : vector<8x128xf32>
    %212 = arith.addf %210, %211 : vector<8x128xf32>
    %213 = math.tanh %212 : vector<8x128xf32>
    %214 = arith.mulf %209, %213 : vector<8x128xf32>
    %215 = arith.index_cast %c5_i32 : i32 to index
    %c0_62 = arith.constant 0 : index
    %c0_63 = arith.constant 0 : index
    %216 = vector.load %arg8[%215, %c0_62, %c0_63] : memref<8x8x128xf32, #tpu.memory_space<vmem>>, vector<1x8x128xf32>
    %217 = vector.shape_cast %216 : vector<1x8x128xf32> to vector<8x128xf32>
    %218 = vector.shape_cast %214 : vector<8x128xf32> to vector<1x8x128xf32>
    tpu.vector_store %arg8[%215, %c0_62, %c0_63], %218 {strides = array<i32>} : memref<8x8x128xf32, #tpu.memory_space<vmem>>, vector<1x8x128xf32>,
    %c6_i32 = arith.constant 6 : i32
    %219 = arith.index_cast %c6_i32 : i32 to index
    %c0_64 = arith.constant 0 : index
    %c0_65 = arith.constant 0 : index
    %220 = vector.load %arg7[%219, %c0_64, %c0_65] : memref<8x8x512xf32, #tpu.memory_space<vmem>>, vector<1x8x512xf32>
    %221 = vector.shape_cast %220 : vector<1x8x512xf32> to vector<8x512xf32>
    %cst_66 = arith.constant dense<0.000000e+00> : vector<8x512xf32>
    %222 = tpu.matmul %214, %12, %cst_66 {dimension_numbers = #tpu.dot_dimension_numbers<[1], [0], [0], [1], [0, 0, 1, 1], [], []>} : vector<8x128xf32>, vector<128x512xf32>, vector<8x512xf32> -> vector<8x512xf32>
    %223 = arith.addf %221, %222 : vector<8x512xf32>
    %224 = vector.extract_strided_slice %223 {offsets = [0, 0], sizes = [8, 128], strides = [1, 1]} : vector<8x512xf32> to vector<8x128xf32>
    %225 = arith.negf %224 : vector<8x128xf32>
    %226 = math.exp %225 : vector<8x128xf32>
    %cst_67 = arith.constant 1.000000e+00 : f32
    %227 = vector.broadcast %cst_67 : f32 to vector<8x128xf32>
    %228 = arith.addf %227, %226 : vector<8x128xf32>
    %229 = arith.divf %227, %228 : vector<8x128xf32>
    %230 = vector.extract_strided_slice %223 {offsets = [0, 128], sizes = [8, 128], strides = [1, 1]} : vector<8x512xf32> to vector<8x128xf32>
    %231 = arith.negf %230 : vector<8x128xf32>
    %232 = math.exp %231 : vector<8x128xf32>
    %cst_68 = arith.constant 1.000000e+00 : f32
    %233 = vector.broadcast %cst_68 : f32 to vector<8x128xf32>
    %234 = arith.addf %233, %232 : vector<8x128xf32>
    %235 = arith.divf %233, %234 : vector<8x128xf32>
    %236 = vector.extract_strided_slice %223 {offsets = [0, 256], sizes = [8, 128], strides = [1, 1]} : vector<8x512xf32> to vector<8x128xf32>
    %237 = math.tanh %236 : vector<8x128xf32>
    %238 = vector.extract_strided_slice %223 {offsets = [0, 384], sizes = [8, 128], strides = [1, 1]} : vector<8x512xf32> to vector<8x128xf32>
    %239 = arith.negf %238 : vector<8x128xf32>
    %240 = math.exp %239 : vector<8x128xf32>
    %cst_69 = arith.constant 1.000000e+00 : f32
    %241 = vector.broadcast %cst_69 : f32 to vector<8x128xf32>
    %242 = arith.addf %241, %240 : vector<8x128xf32>
    %243 = arith.divf %241, %242 : vector<8x128xf32>
    %244 = arith.mulf %235, %212 : vector<8x128xf32>
    %245 = arith.mulf %229, %237 : vector<8x128xf32>
    %246 = arith.addf %244, %245 : vector<8x128xf32>
    %247 = math.tanh %246 : vector<8x128xf32>
    %248 = arith.mulf %243, %247 : vector<8x128xf32>
    %249 = arith.index_cast %c6_i32 : i32 to index
    %c0_70 = arith.constant 0 : index
    %c0_71 = arith.constant 0 : index
    %250 = vector.load %arg8[%249, %c0_70, %c0_71] : memref<8x8x128xf32, #tpu.memory_space<vmem>>, vector<1x8x128xf32>
    %251 = vector.shape_cast %250 : vector<1x8x128xf32> to vector<8x128xf32>
    %252 = vector.shape_cast %248 : vector<8x128xf32> to vector<1x8x128xf32>
    tpu.vector_store %arg8[%249, %c0_70, %c0_71], %252 {strides = array<i32>} : memref<8x8x128xf32, #tpu.memory_space<vmem>>, vector<1x8x128xf32>,
    %c7_i32 = arith.constant 7 : i32
    %253 = arith.index_cast %c7_i32 : i32 to index
    %c0_72 = arith.constant 0 : index
    %c0_73 = arith.constant 0 : index
    %254 = vector.load %arg7[%253, %c0_72, %c0_73] : memref<8x8x512xf32, #tpu.memory_space<vmem>>, vector<1x8x512xf32>
    %255 = vector.shape_cast %254 : vector<1x8x512xf32> to vector<8x512xf32>
    %cst_74 = arith.constant dense<0.000000e+00> : vector<8x512xf32>
    %256 = tpu.matmul %248, %12, %cst_74 {dimension_numbers = #tpu.dot_dimension_numbers<[1], [0], [0], [1], [0, 0, 1, 1], [], []>} : vector<8x128xf32>, vector<128x512xf32>, vector<8x512xf32> -> vector<8x512xf32>
    %257 = arith.addf %255, %256 : vector<8x512xf32>
    %258 = vector.extract_strided_slice %257 {offsets = [0, 0], sizes = [8, 128], strides = [1, 1]} : vector<8x512xf32> to vector<8x128xf32>
    %259 = arith.negf %258 : vector<8x128xf32>
    %260 = math.exp %259 : vector<8x128xf32>
    %cst_75 = arith.constant 1.000000e+00 : f32
    %261 = vector.broadcast %cst_75 : f32 to vector<8x128xf32>
    %262 = arith.addf %261, %260 : vector<8x128xf32>
    %263 = arith.divf %261, %262 : vector<8x128xf32>
    %264 = vector.extract_strided_slice %257 {offsets = [0, 128], sizes = [8, 128], strides = [1, 1]} : vector<8x512xf32> to vector<8x128xf32>
    %265 = arith.negf %264 : vector<8x128xf32>
    %266 = math.exp %265 : vector<8x128xf32>
    %cst_76 = arith.constant 1.000000e+00 : f32
    %267 = vector.broadcast %cst_76 : f32 to vector<8x128xf32>
    %268 = arith.addf %267, %266 : vector<8x128xf32>
    %269 = arith.divf %267, %268 : vector<8x128xf32>
    %270 = vector.extract_strided_slice %257 {offsets = [0, 256], sizes = [8, 128], strides = [1, 1]} : vector<8x512xf32> to vector<8x128xf32>
    %271 = math.tanh %270 : vector<8x128xf32>
    %272 = vector.extract_strided_slice %257 {offsets = [0, 384], sizes = [8, 128], strides = [1, 1]} : vector<8x512xf32> to vector<8x128xf32>
    %273 = arith.negf %272 : vector<8x128xf32>
    %274 = math.exp %273 : vector<8x128xf32>
    %cst_77 = arith.constant 1.000000e+00 : f32
    %275 = vector.broadcast %cst_77 : f32 to vector<8x128xf32>
    %276 = arith.addf %275, %274 : vector<8x128xf32>
    %277 = arith.divf %275, %276 : vector<8x128xf32>
    %278 = arith.mulf %269, %246 : vector<8x128xf32>
    %279 = arith.mulf %263, %271 : vector<8x128xf32>
    %280 = arith.addf %278, %279 : vector<8x128xf32>
    %281 = math.tanh %280 : vector<8x128xf32>
    %282 = arith.mulf %277, %281 : vector<8x128xf32>
    %283 = arith.index_cast %c7_i32 : i32 to index
    %c0_78 = arith.constant 0 : index
    %c0_79 = arith.constant 0 : index
    %284 = vector.load %arg8[%283, %c0_78, %c0_79] : memref<8x8x128xf32, #tpu.memory_space<vmem>>, vector<1x8x128xf32>
    %285 = vector.shape_cast %284 : vector<1x8x128xf32> to vector<8x128xf32>
    %286 = vector.shape_cast %282 : vector<8x128xf32> to vector<1x8x128xf32>
    tpu.vector_store %arg8[%283, %c0_78, %c0_79], %286 {strides = array<i32>} : memref<8x8x128xf32, #tpu.memory_space<vmem>>, vector<1x8x128xf32>,
    %c8_i32 = arith.constant 8 : i32
    %c0_80 = arith.constant 0 : index
    %c0_81 = arith.constant 0 : index
    %c0_82 = arith.constant 0 : index
    %287 = vector.load %arg8[%c0_80, %c0_81, %c0_82] : memref<8x8x128xf32, #tpu.memory_space<vmem>>, vector<8x8x128xf32>
    %288 = vector.shape_cast %287 : vector<8x8x128xf32> to vector<64x128xf32>
    %c1 = arith.constant 1 : index
    %c0_83 = arith.constant 0 : index
    %c0_84 = arith.constant 0 : index
    %289 = vector.load %arg1[%c1, %c0_83, %c0_84] : memref<2x128x512xf32, #tpu.memory_space<vmem>>, vector<1x128x512xf32>
    %290 = vector.shape_cast %289 : vector<1x128x512xf32> to vector<128x512xf32>
    %cst_85 = arith.constant dense<0.000000e+00> : vector<64x512xf32>
    %291 = tpu.matmul %288, %290, %cst_85 {dimension_numbers = #tpu.dot_dimension_numbers<[1], [0], [0], [1], [0, 0, 1, 1], [], []>} : vector<64x128xf32>, vector<128x512xf32>, vector<64x512xf32> -> vector<64x512xf32>
    %c1_86 = arith.constant 1 : index
    %c0_87 = arith.constant 0 : index
    %c0_88 = arith.constant 0 : index
    %292 = vector.load %arg3[%c1_86, %c0_87, %c0_88] : memref<2x1x512xf32, #tpu.memory_space<vmem>>, vector<1x1x512xf32>
    %293 = vector.shape_cast %292 : vector<1x1x512xf32> to vector<1x512xf32>
    %294 = vector.broadcast %293 : vector<1x512xf32> to vector<64x512xf32>
    %295 = arith.addf %291, %294 : vector<64x512xf32>
    %296 = vector.shape_cast %295 : vector<64x512xf32> to vector<8x8x512xf32>
    %c0_89 = arith.constant 0 : index
    %c0_90 = arith.constant 0 : index
    %c0_91 = arith.constant 0 : index
    %297 = vector.load %arg7[%c0_89, %c0_90, %c0_91] : memref<8x8x512xf32, #tpu.memory_space<vmem>>, vector<8x8x512xf32>
    tpu.vector_store %arg7[%c0_89, %c0_90, %c0_91], %296 {strides = array<i32>} : memref<8x8x512xf32, #tpu.memory_space<vmem>>, vector<8x8x512xf32>,
    %c1_92 = arith.constant 1 : index
    %c0_93 = arith.constant 0 : index
    %c0_94 = arith.constant 0 : index
    %298 = vector.load %arg2[%c1_92, %c0_93, %c0_94] : memref<2x128x512xf32, #tpu.memory_space<vmem>>, vector<1x128x512xf32>
    %299 = vector.shape_cast %298 : vector<1x128x512xf32> to vector<128x512xf32>
    %cst_95 = arith.constant 0.000000e+00 : f32
    %300 = vector.broadcast %cst_95 : f32 to vector<8x128xf32>
    %cst_96 = arith.constant 0.000000e+00 : f32
    %301 = vector.broadcast %cst_96 : f32 to vector<8x128xf32>
    %c0_i32_97 = arith.constant 0 : i32
    %302 = arith.index_cast %c0_i32_97 : i32 to index
    %c0_98 = arith.constant 0 : index
    %c0_99 = arith.constant 0 : index
    %303 = vector.load %arg7[%302, %c0_98, %c0_99] : memref<8x8x512xf32, #tpu.memory_space<vmem>>, vector<1x8x512xf32>
    %304 = vector.shape_cast %303 : vector<1x8x512xf32> to vector<8x512xf32>
    %cst_100 = arith.constant dense<0.000000e+00> : vector<8x512xf32>
    %305 = tpu.matmul %300, %299, %cst_100 {dimension_numbers = #tpu.dot_dimension_numbers<[1], [0], [0], [1], [0, 0, 1, 1], [], []>} : vector<8x128xf32>, vector<128x512xf32>, vector<8x512xf32> -> vector<8x512xf32>
    %306 = arith.addf %304, %305 : vector<8x512xf32>
    %307 = vector.extract_strided_slice %306 {offsets = [0, 0], sizes = [8, 128], strides = [1, 1]} : vector<8x512xf32> to vector<8x128xf32>
    %308 = arith.negf %307 : vector<8x128xf32>
    %309 = math.exp %308 : vector<8x128xf32>
    %cst_101 = arith.constant 1.000000e+00 : f32
    %310 = vector.broadcast %cst_101 : f32 to vector<8x128xf32>
    %311 = arith.addf %310, %309 : vector<8x128xf32>
    %312 = arith.divf %310, %311 : vector<8x128xf32>
    %313 = vector.extract_strided_slice %306 {offsets = [0, 128], sizes = [8, 128], strides = [1, 1]} : vector<8x512xf32> to vector<8x128xf32>
    %314 = arith.negf %313 : vector<8x128xf32>
    %315 = math.exp %314 : vector<8x128xf32>
    %cst_102 = arith.constant 1.000000e+00 : f32
    %316 = vector.broadcast %cst_102 : f32 to vector<8x128xf32>
    %317 = arith.addf %316, %315 : vector<8x128xf32>
    %318 = arith.divf %316, %317 : vector<8x128xf32>
    %319 = vector.extract_strided_slice %306 {offsets = [0, 256], sizes = [8, 128], strides = [1, 1]} : vector<8x512xf32> to vector<8x128xf32>
    %320 = math.tanh %319 : vector<8x128xf32>
    %321 = vector.extract_strided_slice %306 {offsets = [0, 384], sizes = [8, 128], strides = [1, 1]} : vector<8x512xf32> to vector<8x128xf32>
    %322 = arith.negf %321 : vector<8x128xf32>
    %323 = math.exp %322 : vector<8x128xf32>
    %cst_103 = arith.constant 1.000000e+00 : f32
    %324 = vector.broadcast %cst_103 : f32 to vector<8x128xf32>
    %325 = arith.addf %324, %323 : vector<8x128xf32>
    %326 = arith.divf %324, %325 : vector<8x128xf32>
    %327 = arith.mulf %318, %301 : vector<8x128xf32>
    %328 = arith.mulf %312, %320 : vector<8x128xf32>
    %329 = arith.addf %327, %328 : vector<8x128xf32>
    %330 = math.tanh %329 : vector<8x128xf32>
    %331 = arith.mulf %326, %330 : vector<8x128xf32>
    %c1_i32_104 = arith.constant 1 : i32
    %332 = arith.index_cast %c1_i32_104 : i32 to index
    %c0_105 = arith.constant 0 : index
    %c0_106 = arith.constant 0 : index
    %333 = vector.load %arg7[%332, %c0_105, %c0_106] : memref<8x8x512xf32, #tpu.memory_space<vmem>>, vector<1x8x512xf32>
    %334 = vector.shape_cast %333 : vector<1x8x512xf32> to vector<8x512xf32>
    %cst_107 = arith.constant dense<0.000000e+00> : vector<8x512xf32>
    %335 = tpu.matmul %331, %299, %cst_107 {dimension_numbers = #tpu.dot_dimension_numbers<[1], [0], [0], [1], [0, 0, 1, 1], [], []>} : vector<8x128xf32>, vector<128x512xf32>, vector<8x512xf32> -> vector<8x512xf32>
    %336 = arith.addf %334, %335 : vector<8x512xf32>
    %337 = vector.extract_strided_slice %336 {offsets = [0, 0], sizes = [8, 128], strides = [1, 1]} : vector<8x512xf32> to vector<8x128xf32>
    %338 = arith.negf %337 : vector<8x128xf32>
    %339 = math.exp %338 : vector<8x128xf32>
    %cst_108 = arith.constant 1.000000e+00 : f32
    %340 = vector.broadcast %cst_108 : f32 to vector<8x128xf32>
    %341 = arith.addf %340, %339 : vector<8x128xf32>
    %342 = arith.divf %340, %341 : vector<8x128xf32>
    %343 = vector.extract_strided_slice %336 {offsets = [0, 128], sizes = [8, 128], strides = [1, 1]} : vector<8x512xf32> to vector<8x128xf32>
    %344 = arith.negf %343 : vector<8x128xf32>
    %345 = math.exp %344 : vector<8x128xf32>
    %cst_109 = arith.constant 1.000000e+00 : f32
    %346 = vector.broadcast %cst_109 : f32 to vector<8x128xf32>
    %347 = arith.addf %346, %345 : vector<8x128xf32>
    %348 = arith.divf %346, %347 : vector<8x128xf32>
    %349 = vector.extract_strided_slice %336 {offsets = [0, 256], sizes = [8, 128], strides = [1, 1]} : vector<8x512xf32> to vector<8x128xf32>
    %350 = math.tanh %349 : vector<8x128xf32>
    %351 = vector.extract_strided_slice %336 {offsets = [0, 384], sizes = [8, 128], strides = [1, 1]} : vector<8x512xf32> to vector<8x128xf32>
    %352 = arith.negf %351 : vector<8x128xf32>
    %353 = math.exp %352 : vector<8x128xf32>
    %cst_110 = arith.constant 1.000000e+00 : f32
    %354 = vector.broadcast %cst_110 : f32 to vector<8x128xf32>
    %355 = arith.addf %354, %353 : vector<8x128xf32>
    %356 = arith.divf %354, %355 : vector<8x128xf32>
    %357 = arith.mulf %348, %329 : vector<8x128xf32>
    %358 = arith.mulf %342, %350 : vector<8x128xf32>
    %359 = arith.addf %357, %358 : vector<8x128xf32>
    %360 = math.tanh %359 : vector<8x128xf32>
    %361 = arith.mulf %356, %360 : vector<8x128xf32>
    %c2_i32_111 = arith.constant 2 : i32
    %362 = arith.index_cast %c2_i32_111 : i32 to index
    %c0_112 = arith.constant 0 : index
    %c0_113 = arith.constant 0 : index
    %363 = vector.load %arg7[%362, %c0_112, %c0_113] : memref<8x8x512xf32, #tpu.memory_space<vmem>>, vector<1x8x512xf32>
    %364 = vector.shape_cast %363 : vector<1x8x512xf32> to vector<8x512xf32>
    %cst_114 = arith.constant dense<0.000000e+00> : vector<8x512xf32>
    %365 = tpu.matmul %361, %299, %cst_114 {dimension_numbers = #tpu.dot_dimension_numbers<[1], [0], [0], [1], [0, 0, 1, 1], [], []>} : vector<8x128xf32>, vector<128x512xf32>, vector<8x512xf32> -> vector<8x512xf32>
    %366 = arith.addf %364, %365 : vector<8x512xf32>
    %367 = vector.extract_strided_slice %366 {offsets = [0, 0], sizes = [8, 128], strides = [1, 1]} : vector<8x512xf32> to vector<8x128xf32>
    %368 = arith.negf %367 : vector<8x128xf32>
    %369 = math.exp %368 : vector<8x128xf32>
    %cst_115 = arith.constant 1.000000e+00 : f32
    %370 = vector.broadcast %cst_115 : f32 to vector<8x128xf32>
    %371 = arith.addf %370, %369 : vector<8x128xf32>
    %372 = arith.divf %370, %371 : vector<8x128xf32>
    %373 = vector.extract_strided_slice %366 {offsets = [0, 128], sizes = [8, 128], strides = [1, 1]} : vector<8x512xf32> to vector<8x128xf32>
    %374 = arith.negf %373 : vector<8x128xf32>
    %375 = math.exp %374 : vector<8x128xf32>
    %cst_116 = arith.constant 1.000000e+00 : f32
    %376 = vector.broadcast %cst_116 : f32 to vector<8x128xf32>
    %377 = arith.addf %376, %375 : vector<8x128xf32>
    %378 = arith.divf %376, %377 : vector<8x128xf32>
    %379 = vector.extract_strided_slice %366 {offsets = [0, 256], sizes = [8, 128], strides = [1, 1]} : vector<8x512xf32> to vector<8x128xf32>
    %380 = math.tanh %379 : vector<8x128xf32>
    %381 = vector.extract_strided_slice %366 {offsets = [0, 384], sizes = [8, 128], strides = [1, 1]} : vector<8x512xf32> to vector<8x128xf32>
    %382 = arith.negf %381 : vector<8x128xf32>
    %383 = math.exp %382 : vector<8x128xf32>
    %cst_117 = arith.constant 1.000000e+00 : f32
    %384 = vector.broadcast %cst_117 : f32 to vector<8x128xf32>
    %385 = arith.addf %384, %383 : vector<8x128xf32>
    %386 = arith.divf %384, %385 : vector<8x128xf32>
    %387 = arith.mulf %378, %359 : vector<8x128xf32>
    %388 = arith.mulf %372, %380 : vector<8x128xf32>
    %389 = arith.addf %387, %388 : vector<8x128xf32>
    %390 = math.tanh %389 : vector<8x128xf32>
    %391 = arith.mulf %386, %390 : vector<8x128xf32>
    %c3_i32_118 = arith.constant 3 : i32
    %392 = arith.index_cast %c3_i32_118 : i32 to index
    %c0_119 = arith.constant 0 : index
    %c0_120 = arith.constant 0 : index
    %393 = vector.load %arg7[%392, %c0_119, %c0_120] : memref<8x8x512xf32, #tpu.memory_space<vmem>>, vector<1x8x512xf32>
    %394 = vector.shape_cast %393 : vector<1x8x512xf32> to vector<8x512xf32>
    %cst_121 = arith.constant dense<0.000000e+00> : vector<8x512xf32>
    %395 = tpu.matmul %391, %299, %cst_121 {dimension_numbers = #tpu.dot_dimension_numbers<[1], [0], [0], [1], [0, 0, 1, 1], [], []>} : vector<8x128xf32>, vector<128x512xf32>, vector<8x512xf32> -> vector<8x512xf32>
    %396 = arith.addf %394, %395 : vector<8x512xf32>
    %397 = vector.extract_strided_slice %396 {offsets = [0, 0], sizes = [8, 128], strides = [1, 1]} : vector<8x512xf32> to vector<8x128xf32>
    %398 = arith.negf %397 : vector<8x128xf32>
    %399 = math.exp %398 : vector<8x128xf32>
    %cst_122 = arith.constant 1.000000e+00 : f32
    %400 = vector.broadcast %cst_122 : f32 to vector<8x128xf32>
    %401 = arith.addf %400, %399 : vector<8x128xf32>
    %402 = arith.divf %400, %401 : vector<8x128xf32>
    %403 = vector.extract_strided_slice %396 {offsets = [0, 128], sizes = [8, 128], strides = [1, 1]} : vector<8x512xf32> to vector<8x128xf32>
    %404 = arith.negf %403 : vector<8x128xf32>
    %405 = math.exp %404 : vector<8x128xf32>
    %cst_123 = arith.constant 1.000000e+00 : f32
    %406 = vector.broadcast %cst_123 : f32 to vector<8x128xf32>
    %407 = arith.addf %406, %405 : vector<8x128xf32>
    %408 = arith.divf %406, %407 : vector<8x128xf32>
    %409 = vector.extract_strided_slice %396 {offsets = [0, 256], sizes = [8, 128], strides = [1, 1]} : vector<8x512xf32> to vector<8x128xf32>
    %410 = math.tanh %409 : vector<8x128xf32>
    %411 = vector.extract_strided_slice %396 {offsets = [0, 384], sizes = [8, 128], strides = [1, 1]} : vector<8x512xf32> to vector<8x128xf32>
    %412 = arith.negf %411 : vector<8x128xf32>
    %413 = math.exp %412 : vector<8x128xf32>
    %cst_124 = arith.constant 1.000000e+00 : f32
    %414 = vector.broadcast %cst_124 : f32 to vector<8x128xf32>
    %415 = arith.addf %414, %413 : vector<8x128xf32>
    %416 = arith.divf %414, %415 : vector<8x128xf32>
    %417 = arith.mulf %408, %389 : vector<8x128xf32>
    %418 = arith.mulf %402, %410 : vector<8x128xf32>
    %419 = arith.addf %417, %418 : vector<8x128xf32>
    %420 = math.tanh %419 : vector<8x128xf32>
    %421 = arith.mulf %416, %420 : vector<8x128xf32>
    %c4_i32_125 = arith.constant 4 : i32
    %422 = arith.index_cast %c4_i32_125 : i32 to index
    %c0_126 = arith.constant 0 : index
    %c0_127 = arith.constant 0 : index
    %423 = vector.load %arg7[%422, %c0_126, %c0_127] : memref<8x8x512xf32, #tpu.memory_space<vmem>>, vector<1x8x512xf32>
    %424 = vector.shape_cast %423 : vector<1x8x512xf32> to vector<8x512xf32>
    %cst_128 = arith.constant dense<0.000000e+00> : vector<8x512xf32>
    %425 = tpu.matmul %421, %299, %cst_128 {dimension_numbers = #tpu.dot_dimension_numbers<[1], [0], [0], [1], [0, 0, 1, 1], [], []>} : vector<8x128xf32>, vector<128x512xf32>, vector<8x512xf32> -> vector<8x512xf32>
    %426 = arith.addf %424, %425 : vector<8x512xf32>
    %427 = vector.extract_strided_slice %426 {offsets = [0, 0], sizes = [8, 128], strides = [1, 1]} : vector<8x512xf32> to vector<8x128xf32>
    %428 = arith.negf %427 : vector<8x128xf32>
    %429 = math.exp %428 : vector<8x128xf32>
    %cst_129 = arith.constant 1.000000e+00 : f32
    %430 = vector.broadcast %cst_129 : f32 to vector<8x128xf32>
    %431 = arith.addf %430, %429 : vector<8x128xf32>
    %432 = arith.divf %430, %431 : vector<8x128xf32>
    %433 = vector.extract_strided_slice %426 {offsets = [0, 128], sizes = [8, 128], strides = [1, 1]} : vector<8x512xf32> to vector<8x128xf32>
    %434 = arith.negf %433 : vector<8x128xf32>
    %435 = math.exp %434 : vector<8x128xf32>
    %cst_130 = arith.constant 1.000000e+00 : f32
    %436 = vector.broadcast %cst_130 : f32 to vector<8x128xf32>
    %437 = arith.addf %436, %435 : vector<8x128xf32>
    %438 = arith.divf %436, %437 : vector<8x128xf32>
    %439 = vector.extract_strided_slice %426 {offsets = [0, 256], sizes = [8, 128], strides = [1, 1]} : vector<8x512xf32> to vector<8x128xf32>
    %440 = math.tanh %439 : vector<8x128xf32>
    %441 = vector.extract_strided_slice %426 {offsets = [0, 384], sizes = [8, 128], strides = [1, 1]} : vector<8x512xf32> to vector<8x128xf32>
    %442 = arith.negf %441 : vector<8x128xf32>
    %443 = math.exp %442 : vector<8x128xf32>
    %cst_131 = arith.constant 1.000000e+00 : f32
    %444 = vector.broadcast %cst_131 : f32 to vector<8x128xf32>
    %445 = arith.addf %444, %443 : vector<8x128xf32>
    %446 = arith.divf %444, %445 : vector<8x128xf32>
    %447 = arith.mulf %438, %419 : vector<8x128xf32>
    %448 = arith.mulf %432, %440 : vector<8x128xf32>
    %449 = arith.addf %447, %448 : vector<8x128xf32>
    %450 = math.tanh %449 : vector<8x128xf32>
    %451 = arith.mulf %446, %450 : vector<8x128xf32>
    %c5_i32_132 = arith.constant 5 : i32
    %452 = arith.index_cast %c5_i32_132 : i32 to index
    %c0_133 = arith.constant 0 : index
    %c0_134 = arith.constant 0 : index
    %453 = vector.load %arg7[%452, %c0_133, %c0_134] : memref<8x8x512xf32, #tpu.memory_space<vmem>>, vector<1x8x512xf32>
    %454 = vector.shape_cast %453 : vector<1x8x512xf32> to vector<8x512xf32>
    %cst_135 = arith.constant dense<0.000000e+00> : vector<8x512xf32>
    %455 = tpu.matmul %451, %299, %cst_135 {dimension_numbers = #tpu.dot_dimension_numbers<[1], [0], [0], [1], [0, 0, 1, 1], [], []>} : vector<8x128xf32>, vector<128x512xf32>, vector<8x512xf32> -> vector<8x512xf32>
    %456 = arith.addf %454, %455 : vector<8x512xf32>
    %457 = vector.extract_strided_slice %456 {offsets = [0, 0], sizes = [8, 128], strides = [1, 1]} : vector<8x512xf32> to vector<8x128xf32>
    %458 = arith.negf %457 : vector<8x128xf32>
    %459 = math.exp %458 : vector<8x128xf32>
    %cst_136 = arith.constant 1.000000e+00 : f32
    %460 = vector.broadcast %cst_136 : f32 to vector<8x128xf32>
    %461 = arith.addf %460, %459 : vector<8x128xf32>
    %462 = arith.divf %460, %461 : vector<8x128xf32>
    %463 = vector.extract_strided_slice %456 {offsets = [0, 128], sizes = [8, 128], strides = [1, 1]} : vector<8x512xf32> to vector<8x128xf32>
    %464 = arith.negf %463 : vector<8x128xf32>
    %465 = math.exp %464 : vector<8x128xf32>
    %cst_137 = arith.constant 1.000000e+00 : f32
    %466 = vector.broadcast %cst_137 : f32 to vector<8x128xf32>
    %467 = arith.addf %466, %465 : vector<8x128xf32>
    %468 = arith.divf %466, %467 : vector<8x128xf32>
    %469 = vector.extract_strided_slice %456 {offsets = [0, 256], sizes = [8, 128], strides = [1, 1]} : vector<8x512xf32> to vector<8x128xf32>
    %470 = math.tanh %469 : vector<8x128xf32>
    %471 = vector.extract_strided_slice %456 {offsets = [0, 384], sizes = [8, 128], strides = [1, 1]} : vector<8x512xf32> to vector<8x128xf32>
    %472 = arith.negf %471 : vector<8x128xf32>
    %473 = math.exp %472 : vector<8x128xf32>
    %cst_138 = arith.constant 1.000000e+00 : f32
    %474 = vector.broadcast %cst_138 : f32 to vector<8x128xf32>
    %475 = arith.addf %474, %473 : vector<8x128xf32>
    %476 = arith.divf %474, %475 : vector<8x128xf32>
    %477 = arith.mulf %468, %449 : vector<8x128xf32>
    %478 = arith.mulf %462, %470 : vector<8x128xf32>
    %479 = arith.addf %477, %478 : vector<8x128xf32>
    %480 = math.tanh %479 : vector<8x128xf32>
    %481 = arith.mulf %476, %480 : vector<8x128xf32>
    %c6_i32_139 = arith.constant 6 : i32
    %482 = arith.index_cast %c6_i32_139 : i32 to index
    %c0_140 = arith.constant 0 : index
    %c0_141 = arith.constant 0 : index
    %483 = vector.load %arg7[%482, %c0_140, %c0_141] : memref<8x8x512xf32, #tpu.memory_space<vmem>>, vector<1x8x512xf32>
    %484 = vector.shape_cast %483 : vector<1x8x512xf32> to vector<8x512xf32>
    %cst_142 = arith.constant dense<0.000000e+00> : vector<8x512xf32>
    %485 = tpu.matmul %481, %299, %cst_142 {dimension_numbers = #tpu.dot_dimension_numbers<[1], [0], [0], [1], [0, 0, 1, 1], [], []>} : vector<8x128xf32>, vector<128x512xf32>, vector<8x512xf32> -> vector<8x512xf32>
    %486 = arith.addf %484, %485 : vector<8x512xf32>
    %487 = vector.extract_strided_slice %486 {offsets = [0, 0], sizes = [8, 128], strides = [1, 1]} : vector<8x512xf32> to vector<8x128xf32>
    %488 = arith.negf %487 : vector<8x128xf32>
    %489 = math.exp %488 : vector<8x128xf32>
    %cst_143 = arith.constant 1.000000e+00 : f32
    %490 = vector.broadcast %cst_143 : f32 to vector<8x128xf32>
    %491 = arith.addf %490, %489 : vector<8x128xf32>
    %492 = arith.divf %490, %491 : vector<8x128xf32>
    %493 = vector.extract_strided_slice %486 {offsets = [0, 128], sizes = [8, 128], strides = [1, 1]} : vector<8x512xf32> to vector<8x128xf32>
    %494 = arith.negf %493 : vector<8x128xf32>
    %495 = math.exp %494 : vector<8x128xf32>
    %cst_144 = arith.constant 1.000000e+00 : f32
    %496 = vector.broadcast %cst_144 : f32 to vector<8x128xf32>
    %497 = arith.addf %496, %495 : vector<8x128xf32>
    %498 = arith.divf %496, %497 : vector<8x128xf32>
    %499 = vector.extract_strided_slice %486 {offsets = [0, 256], sizes = [8, 128], strides = [1, 1]} : vector<8x512xf32> to vector<8x128xf32>
    %500 = math.tanh %499 : vector<8x128xf32>
    %501 = vector.extract_strided_slice %486 {offsets = [0, 384], sizes = [8, 128], strides = [1, 1]} : vector<8x512xf32> to vector<8x128xf32>
    %502 = arith.negf %501 : vector<8x128xf32>
    %503 = math.exp %502 : vector<8x128xf32>
    %cst_145 = arith.constant 1.000000e+00 : f32
    %504 = vector.broadcast %cst_145 : f32 to vector<8x128xf32>
    %505 = arith.addf %504, %503 : vector<8x128xf32>
    %506 = arith.divf %504, %505 : vector<8x128xf32>
    %507 = arith.mulf %498, %479 : vector<8x128xf32>
    %508 = arith.mulf %492, %500 : vector<8x128xf32>
    %509 = arith.addf %507, %508 : vector<8x128xf32>
    %510 = math.tanh %509 : vector<8x128xf32>
    %511 = arith.mulf %506, %510 : vector<8x128xf32>
    %c7_i32_146 = arith.constant 7 : i32
    %512 = arith.index_cast %c7_i32_146 : i32 to index
    %c0_147 = arith.constant 0 : index
    %c0_148 = arith.constant 0 : index
    %513 = vector.load %arg7[%512, %c0_147, %c0_148] : memref<8x8x512xf32, #tpu.memory_space<vmem>>, vector<1x8x512xf32>
    %514 = vector.shape_cast %513 : vector<1x8x512xf32> to vector<8x512xf32>
    %cst_149 = arith.constant dense<0.000000e+00> : vector<8x512xf32>
    %515 = tpu.matmul %511, %299, %cst_149 {dimension_numbers = #tpu.dot_dimension_numbers<[1], [0], [0], [1], [0, 0, 1, 1], [], []>} : vector<8x128xf32>, vector<128x512xf32>, vector<8x512xf32> -> vector<8x512xf32>
    %516 = arith.addf %514, %515 : vector<8x512xf32>
    %517 = vector.extract_strided_slice %516 {offsets = [0, 0], sizes = [8, 128], strides = [1, 1]} : vector<8x512xf32> to vector<8x128xf32>
    %518 = arith.negf %517 : vector<8x128xf32>
    %519 = math.exp %518 : vector<8x128xf32>
    %cst_150 = arith.constant 1.000000e+00 : f32
    %520 = vector.broadcast %cst_150 : f32 to vector<8x128xf32>
    %521 = arith.addf %520, %519 : vector<8x128xf32>
    %522 = arith.divf %520, %521 : vector<8x128xf32>
    %523 = vector.extract_strided_slice %516 {offsets = [0, 128], sizes = [8, 128], strides = [1, 1]} : vector<8x512xf32> to vector<8x128xf32>
    %524 = arith.negf %523 : vector<8x128xf32>
    %525 = math.exp %524 : vector<8x128xf32>
    %cst_151 = arith.constant 1.000000e+00 : f32
    %526 = vector.broadcast %cst_151 : f32 to vector<8x128xf32>
    %527 = arith.addf %526, %525 : vector<8x128xf32>
    %528 = arith.divf %526, %527 : vector<8x128xf32>
    %529 = vector.extract_strided_slice %516 {offsets = [0, 256], sizes = [8, 128], strides = [1, 1]} : vector<8x512xf32> to vector<8x128xf32>
    %530 = math.tanh %529 : vector<8x128xf32>
    %531 = vector.extract_strided_slice %516 {offsets = [0, 384], sizes = [8, 128], strides = [1, 1]} : vector<8x512xf32> to vector<8x128xf32>
    %532 = arith.negf %531 : vector<8x128xf32>
    %533 = math.exp %532 : vector<8x128xf32>
    %cst_152 = arith.constant 1.000000e+00 : f32
    %534 = vector.broadcast %cst_152 : f32 to vector<8x128xf32>
    %535 = arith.addf %534, %533 : vector<8x128xf32>
    %536 = arith.divf %534, %535 : vector<8x128xf32>
    %537 = arith.mulf %528, %509 : vector<8x128xf32>
    %538 = arith.mulf %522, %530 : vector<8x128xf32>
    %539 = arith.addf %537, %538 : vector<8x128xf32>
    %540 = math.tanh %539 : vector<8x128xf32>
    %541 = arith.mulf %536, %540 : vector<8x128xf32>
    %c8_i32_153 = arith.constant 8 : i32
    %c0_154 = arith.constant 0 : index
    %c0_155 = arith.constant 0 : index
    %542 = vector.load %arg4[%c0_154, %c0_155] : memref<128x128xf32, #tpu.memory_space<vmem>>, vector<128x128xf32>
    %cst_156 = arith.constant dense<0.000000e+00> : vector<8x128xf32>
    %543 = tpu.matmul %541, %542, %cst_156 {dimension_numbers = #tpu.dot_dimension_numbers<[1], [0], [0], [1], [0, 0, 1, 1], [], []>} : vector<8x128xf32>, vector<128x128xf32>, vector<8x128xf32> -> vector<8x128xf32>
    %c0_157 = arith.constant 0 : index
    %c0_158 = arith.constant 0 : index
    %544 = vector.load %arg5[%c0_157, %c0_158] : memref<1x128xf32, #tpu.memory_space<vmem>>, vector<1x128xf32>
    %545 = vector.broadcast %544 : vector<1x128xf32> to vector<8x128xf32>
    %546 = arith.addf %543, %545 : vector<8x128xf32>
    %c0_159 = arith.constant 0 : index
    %c0_160 = arith.constant 0 : index
    %547 = vector.load %arg6[%c0_159, %c0_160] : memref<8x128xf32, #tpu.memory_space<vmem>>, vector<8x128xf32>
    tpu.vector_store %arg6[%c0_159, %c0_160], %546 {strides = array<i32>} : memref<8x128xf32, #tpu.memory_space<vmem>>, vector<8x128xf32>,
    return
  }
}

</mosaic_0001>

<bundles_post_ra>
// kernel: lstm_forward.1
= control target key start
LH: loop header
LB: loop body
LE: loop exit
PB: predicated region body
PF: predicated region fallthrough
CT: control target
= control target key end

     0   :  { %v5555_v3 = vmov 0.0   ;;  %vm5557_vm0 = vmmov 0   ;;  %s7354_s1 = inlined_call_operand.vmem [shape: f32[2,128,512], index: 1, kind: input, shape index: {}]   ;;  %s7355_s2 = inlined_call_operand.vmem [shape: f32[2,128,512], index: 2, kind: input, shape index: {}]   ;;  %s7356_s0 = inlined_call_operand.vmem [shape: f32[8,8,128], index: 0, kind: input, shape index: {}]   ;;  %s7357_s3 = inlined_call_operand.vmem [shape: f32[2,1,512], index: 3, kind: input, shape index: {}]   ;;  %s7358_s4 = inlined_call_operand.vmem [shape: f32[128,128], index: 4, kind: input, shape index: {}]   ;;  %s7359_s5 = inlined_call_operand.vmem [shape: f32[1,128], index: 5, kind: input, shape index: {}]   ;;  %s7360_s6 = inlined_call_operand.vmem [shape: f32[8,128], index: 6, kind: output, shape index: {}]  }
   0x1   :  { %v32_v0 = vld [vmem:[%s7354_s1 + $0x8] sm:$0xff]  ;;  %v34_v2 = vld [vmem:[%s7354_s1 + $0x18] sm:$0xff]  ;;  %181 = vmatprep.mubr.f32.mxu0 %v5555_v3  ;;  %294 = vmatprep.mubr.f32.mxu1 %v5555_v3  ;;  %v31_v6 = vld [vmem:[%s7354_s1] sm:$0xff] }
   0x2   :  { %v36_v1 = vld [vmem:[%s7354_s1 + $0x28] sm:$0xff]  ;;  %v38_v5 = vld [vmem:[%s7354_s1 + $0x38] sm:$0xff]  ;;  %v35_v7 = vld [vmem:[%s7354_s1 + $0x20] sm:$0xff] }
   0x3   :  { %v3992_v4 = vpack.c.bf16 %v36_v1, %v32_v0  ;;  %v4024_v8 = vpack.c.bf16 %v38_v5, %v34_v2  ;;  %v3994_v9 = vpack.c.bf16 %v35_v7, %v31_v6  ;;  %v33_v10 = vld [vmem:[%s7354_s1 + $0x10] sm:$0xff]  ;;  %v40_v12 = vld [vmem:[%s7354_s1 + $0x48] sm:$0xff]  ;;  %v42_v15 = vld [vmem:[%s7354_s1 + $0x58] sm:$0xff] }
   0x4   :  { %v37_v11 = vld [vmem:[%s7354_s1 + $0x30] sm:$0xff]  ;;  %v44_v14 = vld [vmem:[%s7354_s1 + $0x68] sm:$0xff]  ;;  %v46_v16 = vld [vmem:[%s7354_s1 + $0x78] sm:$0xff] }
   0x5   :  { %3993 = vmatprep.subr.bf16.mxu0 %v3992_v4  ;;  %v4026_v13 = vpack.c.bf16 %v37_v11, %v33_v10  ;;  %4025 = vmatprep.subr.bf16.mxu1 %v4024_v8  ;;  %v3996_v17 = vpack.c.bf16 %v44_v14, %v40_v12  ;;  %v4028_v18 = vpack.c.bf16 %v46_v16, %v42_v15  ;;  %v39_v19 = vld [vmem:[%s7354_s1 + $0x40] sm:$0xff]  ;;  %v41_v21 = vld [vmem:[%s7354_s1 + $0x50] sm:$0xff]  ;;  %v48_v24 = vld [vmem:[%s7354_s1 + $0x88] sm:$0xff] }
   0x6   :  { %3995 = vmatpush1.bf16.msra.mxu0 %v3994_v9  ;;  %v43_v20 = vld [vmem:[%s7354_s1 + $0x60] sm:$0xff]  ;;  %v45_v23 = vld [vmem:[%s7354_s1 + $0x70] sm:$0xff]  ;;  %v52_v25 = vld [vmem:[%s7354_s1 + $0xa8] sm:$0xff] }
   0x7   :  { %4027 = vmatpush1.bf16.msra.mxu1 %v4026_v13  ;;  %v3998_v22 = vpack.c.bf16 %v43_v20, %v39_v19  ;;  %3997 = vmatprep.subr.bf16.mxu0 %v3996_v17  ;;  %v4030_v26 = vpack.c.bf16 %v45_v23, %v41_v21  ;;  %v4000_v27 = vpack.c.bf16 %v52_v25, %v48_v24  ;;  %v50_v28 = vld [vmem:[%s7354_s1 + $0x98] sm:$0xff]  ;;  %v47_v30 = vld [vmem:[%s7354_s1 + $0x80] sm:$0xff]  ;;  %v49_v33 = vld [vmem:[%s7354_s1 + $0x90] sm:$0xff] }
   0x8   :  { %4029 = vmatprep.subr.bf16.mxu1 %v4028_v18  ;;  %v54_v29 = vld [vmem:[%s7354_s1 + $0xb8] sm:$0xff]  ;;  %v51_v32 = vld [vmem:[%s7354_s1 + $0xa0] sm:$0xff]  ;;  %v53_v34 = vld [vmem:[%s7354_s1 + $0xb0] sm:$0xff] }
   0x9   :  { %v4032_v31 = vpack.c.bf16 %v54_v29, %v50_v28  ;;  %v4002_v35 = vpack.c.bf16 %v51_v32, %v47_v30  ;;  %v56_v36 = vld [vmem:[%s7354_s1 + $0xc8] sm:$0xff]  ;;  %v58_v38 = vld [vmem:[%s7354_s1 + $0xd8] sm:$0xff]  ;;  %v4034_v39 = vpack.c.bf16 %v53_v34, %v49_v33  ;;  %v55_v42 = vld [vmem:[%s7354_s1 + $0xc0] sm:$0xff] }
   0xa   :  { %3999 = vmatpush1.bf16.msra.mxu0 %v3998_v22  ;;  %v60_v37 = vld [vmem:[%s7354_s1 + $0xe8] sm:$0xff]  ;;  %v62_v41 = vld [vmem:[%s7354_s1 + $0xf8] sm:$0xff]  ;;  %v59_v43 = vld [vmem:[%s7354_s1 + $0xe0] sm:$0xff] }
   0xb   :  { %4031 = vmatpush1.bf16.msra.mxu1 %v4030_v26  ;;  %4001 = vmatprep.subr.bf16.mxu0 %v4000_v27  ;;  %v4004_v40 = vpack.c.bf16 %v60_v37, %v56_v36  ;;  %v4036_v44 = vpack.c.bf16 %v62_v41, %v58_v38  ;;  %v57_v45 = vld [vmem:[%s7354_s1 + $0xd0] sm:$0xff]  ;;  %v64_v47 = vld [vmem:[%s7354_s1 + $0x108] sm:$0xff]  ;;  %v66_v49 = vld [vmem:[%s7354_s1 + $0x118] sm:$0xff]  ;;  %v4006_v51 = vpack.c.bf16 %v59_v43, %v55_v42 }
   0xc   :  { %4033 = vmatprep.subr.bf16.mxu1 %v4032_v31  ;;  %v61_v46 = vld [vmem:[%s7354_s1 + $0xf0] sm:$0xff]  ;;  %v68_v48 = vld [vmem:[%s7354_s1 + $0x128] sm:$0xff]  ;;  %v70_v50 = vld [vmem:[%s7354_s1 + $0x138] sm:$0xff] }
   0xd   :  { %v4038_v52 = vpack.c.bf16 %v61_v46, %v57_v45  ;;  %v4008_v53 = vpack.c.bf16 %v68_v48, %v64_v47  ;;  %v63_v54 = vld [vmem:[%s7354_s1 + $0x100] sm:$0xff]  ;;  %v65_v56 = vld [vmem:[%s7354_s1 + $0x110] sm:$0xff]  ;;  %v4040_v57 = vpack.c.bf16 %v70_v50, %v66_v49  ;;  %v72_v59 = vld [vmem:[%s7354_s1 + $0x148] sm:$0xff] }
   0xe   :  { %4003 = vmatpush1.bf16.msra.mxu0 %v4002_v35  ;;  %v67_v55 = vld [vmem:[%s7354_s1 + $0x120] sm:$0xff]  ;;  %v69_v58 = vld [vmem:[%s7354_s1 + $0x130] sm:$0xff]  ;;  %v76_v60 = vld [vmem:[%s7354_s1 + $0x168] sm:$0xff] }
   0xf   :  { %4035 = vmatpush1.bf16.msra.mxu1 %v4034_v39  ;;  %4005 = vmatprep.subr.bf16.mxu0 %v4004_v40  ;;  %v74_v61 = vld [vmem:[%s7354_s1 + $0x158] sm:$0xff]  ;;  %v4010_v63 = vpack.c.bf16 %v67_v55, %v63_v54  ;;  %v4042_v0 = vpack.c.bf16 %v69_v58, %v65_v56  ;;  %v4012_v1 = vpack.c.bf16 %v76_v60, %v72_v59  ;;  %v71_v2 = vld [vmem:[%s7354_s1 + $0x140] sm:$0xff]  ;;  %v73_v5 = vld [vmem:[%s7354_s1 + $0x150] sm:$0xff] }
  0x10   :  { %4037 = vmatprep.subr.bf16.mxu1 %v4036_v44  ;;  %v78_v62 = vld [vmem:[%s7354_s1 + $0x178] sm:$0xff]  ;;  %v75_v4 = vld [vmem:[%s7354_s1 + $0x160] sm:$0xff]  ;;  %v77_v7 = vld [vmem:[%s7354_s1 + $0x170] sm:$0xff] }
  0x11   :  { %v4044_v6 = vpack.c.bf16 %v78_v62, %v74_v61  ;;  %v80_v8 = vld [vmem:[%s7354_s1 + $0x188] sm:$0xff]  ;;  %v82_v10 = vld [vmem:[%s7354_s1 + $0x198] sm:$0xff]  ;;  %v4014_v12 = vpack.c.bf16 %v75_v4, %v71_v2  ;;  %v4046_v13 = vpack.c.bf16 %v77_v7, %v73_v5  ;;  %v79_v15 = vld [vmem:[%s7354_s1 + $0x180] sm:$0xff] }
  0x12   :  { %4007 = vmatpush1.bf16.msra.mxu0 %v4006_v51  ;;  %v84_v9 = vld [vmem:[%s7354_s1 + $0x1a8] sm:$0xff]  ;;  %v86_v11 = vld [vmem:[%s7354_s1 + $0x1b8] sm:$0xff]  ;;  %v83_v16 = vld [vmem:[%s7354_s1 + $0x1a0] sm:$0xff] }
  0x13   :  { %4039 = vmatpush1.bf16.msra.mxu1 %v4038_v52  ;;  %4009 = vmatprep.subr.bf16.mxu0 %v4008_v53  ;;  %v4016_v14 = vpack.c.bf16 %v84_v9, %v80_v8  ;;  %v81_v17 = vld [vmem:[%s7354_s1 + $0x190] sm:$0xff]  ;;  %v4048_v18 = vpack.c.bf16 %v86_v11, %v82_v10  ;;  %v88_v20 = vld [vmem:[%s7354_s1 + $0x1c8] sm:$0xff]  ;;  %v90_v22 = vld [vmem:[%s7354_s1 + $0x1d8] sm:$0xff]  ;;  %v4018_v24 = vpack.c.bf16 %v83_v16, %v79_v15 }
  0x14   :  { %4041 = vmatprep.subr.bf16.mxu1 %v4040_v57  ;;  %v85_v19 = vld [vmem:[%s7354_s1 + $0x1b0] sm:$0xff]  ;;  %v92_v21 = vld [vmem:[%s7354_s1 + $0x1e8] sm:$0xff]  ;;  %v94_v23 = vld [vmem:[%s7354_s1 + $0x1f8] sm:$0xff] }
  0x15   :  { %v4050_v25 = vpack.c.bf16 %v85_v19, %v81_v17  ;;  %v4020_v26 = vpack.c.bf16 %v92_v21, %v88_v20  ;;  %v87_v27 = vld [vmem:[%s7354_s1 + $0x1c0] sm:$0xff]  ;;  %v89_v29 = vld [vmem:[%s7354_s1 + $0x1d0] sm:$0xff]  ;;  %v4052_v30 = vpack.c.bf16 %v94_v23, %v90_v22  ;;  %v376_v32 = vld [vmem:[%s7355_s2 + $0x8] sm:$0xff] }
  0x16   :  { %4011 = vmatpush1.bf16.msra.mxu0 %v4010_v63  ;;  %v91_v28 = vld [vmem:[%s7354_s1 + $0x1e0] sm:$0xff]  ;;  %v93_v31 = vld [vmem:[%s7354_s1 + $0x1f0] sm:$0xff]  ;;  %v380_v33 = vld [vmem:[%s7355_s2 + $0x28] sm:$0xff] }
  0x17   :  { %4043 = vmatpush1.bf16.msra.mxu1 %v4042_v0  ;;  %4013 = vmatprep.subr.bf16.mxu0 %v4012_v1  ;;  %v378_v34 = vld [vmem:[%s7355_s2 + $0x18] sm:$0xff]  ;;  %v4022_v36 = vpack.c.bf16 %v91_v28, %v87_v27  ;;  %v4054_v37 = vpack.c.bf16 %v93_v31, %v89_v29  ;;  %v5799_v38 = vpack.c.bf16 %v380_v33, %v376_v32  ;;  %v375_v39 = vld [vmem:[%s7355_s2] sm:$0xff]  ;;  %v377_v42 = vld [vmem:[%s7355_s2 + $0x10] sm:$0xff] }
  0x18   :  { %4045 = vmatprep.subr.bf16.mxu1 %v4044_v6  ;;  %v382_v35 = vld [vmem:[%s7355_s2 + $0x38] sm:$0xff]  ;;  %v379_v40 = vld [vmem:[%s7355_s2 + $0x20] sm:$0xff]  ;;  %v381_v43 = vld [vmem:[%s7355_s2 + $0x30] sm:$0xff] }
  0x19   :  { %v5807_v41 = vpack.c.bf16 %v382_v35, %v378_v34  ;;  %v384_v44 = vld [vmem:[%s7355_s2 + $0x48] sm:$0xff]  ;;  %v23_v46 = vld [vmem:[%s7356_s0] sm:$0xff]  ;;  %v5824_v47 = vpack.c.bf16 %v379_v40, %v375_v39  ;;  %v386_v48 = vld [vmem:[%s7355_s2 + $0x58] sm:$0xff]  ;;  %v5833_v50 = vpack.c.bf16 %v381_v43, %v377_v42 }
  0x1a   :  { %4015 = vmatpush1.bf16.msra.mxu0 %v4014_v12  ;;  %v388_v45 = vld [vmem:[%s7355_s2 + $0x68] sm:$0xff]  ;;  %v390_v49 = vld [vmem:[%s7355_s2 + $0x78] sm:$0xff]  ;;  %v383_v51 = vld [vmem:[%s7355_s2 + $0x40] sm:$0xff] }
  0x1b   :  { %4047 = vmatpush1.bf16.msra.mxu1 %v4046_v13  ;;  %4017 = vmatprep.subr.bf16.mxu0 %v4016_v14  ;;  %v387_v52 = vld [vmem:[%s7355_s2 + $0x60] sm:$0xff]  ;;  %v5842_v53 = vpack.c.bf16 %v388_v45, %v384_v44  ;;  %v385_v54 = vld [vmem:[%s7355_s2 + $0x50] sm:$0xff]  ;;  %v5850_v56 = vpack.c.bf16 %v390_v49, %v386_v48  ;;  %v392_v57 = vld [vmem:[%s7355_s2 + $0x88] sm:$0xff] }
  0x1c   :  { %4049 = vmatprep.subr.bf16.mxu1 %v4048_v18  ;;  %v389_v55 = vld [vmem:[%s7355_s2 + $0x70] sm:$0xff]  ;;  %v396_v58 = vld [vmem:[%s7355_s2 + $0xa8] sm:$0xff]  ;;  %v5862_v60 = vpack.c.bf16 %v387_v52, %v383_v51  ;;  %v394_v61 = vld [vmem:[%s7355_s2 + $0x98] sm:$0xff] }
  0x1d   :  { %v24_v59 = vld [vmem:[%s7356_s0 + $0x8] sm:$0xff]  ;;  %v398_v62 = vld [vmem:[%s7355_s2 + $0xb8] sm:$0xff]  ;;  %v5872_v63 = vpack.c.bf16 %v389_v55, %v385_v54  ;;  %v391_v0 = vld [vmem:[%s7355_s2 + $0x80] sm:$0xff]  ;;  %v5882_v2 = vpack.c.bf16 %v396_v58, %v392_v57 }
  0x1e   :  { %4019 = vmatpush1.bf16.msra.mxu0 %v4018_v24  ;;  %v395_v1 = vld [vmem:[%s7355_s2 + $0xa0] sm:$0xff]  ;;  %v393_v4 = vld [vmem:[%s7355_s2 + $0x90] sm:$0xff]  ;;  %v5891_v6 = vpack.c.bf16 %v398_v62, %v394_v61  ;;  %v400_v7 = vld [vmem:[%s7355_s2 + $0xc8] sm:$0xff] }
  0x1f   :  { %4051 = vmatpush1.bf16.msra.mxu1 %v4050_v25  ;;  %4021 = vmatprep.subr.bf16.mxu0 %v4020_v26  ;;  %v397_v5 = vld [vmem:[%s7355_s2 + $0xb0] sm:$0xff]  ;;  %v404_v8 = vld [vmem:[%s7355_s2 + $0xe8] sm:$0xff]  ;;  %v5903_v10 = vpack.c.bf16 %v395_v1, %v391_v0  ;;  %v402_v11 = vld [vmem:[%s7355_s2 + $0xd8] sm:$0xff] }
  0x20   :  { %4053 = vmatprep.subr.bf16.mxu1 %v4052_v30  ;;  %v25_v9 = vld [vmem:[%s7356_s0 + $0x10] sm:$0xff]  ;;  %v406_v12 = vld [vmem:[%s7355_s2 + $0xf8] sm:$0xff]  ;;  %v5913_v13 = vpack.c.bf16 %v397_v5, %v393_v4  ;;  %v399_v14 = vld [vmem:[%s7355_s2 + $0xc0] sm:$0xff]  ;;  %v5923_v16 = vpack.c.bf16 %v404_v8, %v400_v7 }
  0x21   :  { %v403_v15 = vld [vmem:[%s7355_s2 + $0xe0] sm:$0xff]  ;;  %v401_v17 = vld [vmem:[%s7355_s2 + $0xd0] sm:$0xff]  ;;  %v5932_v19 = vpack.c.bf16 %v406_v12, %v402_v11  ;;  %v408_v20 = vld [vmem:[%s7355_s2 + $0x108] sm:$0xff] }
  0x22   :  { %4023 = vmatpush1.bf16.msra.mxu0 %v4022_v36  ;;  %v405_v18 = vld [vmem:[%s7355_s2 + $0xf0] sm:$0xff]  ;;  %v412_v21 = vld [vmem:[%s7355_s2 + $0x128] sm:$0xff]  ;;  %v26_v22 = vld [vmem:[%s7356_s0 + $0x18] sm:$0xff]  ;;  %v5944_v23 = vpack.c.bf16 %v403_v15, %v399_v14 }
  0x23   :  { %4055 = vmatpush1.bf16.msra.mxu1 %v4054_v37  ;;  %4057 = vmatprep.subr.bf16.mxu0 %v5799_v38  ;;  %v410_v24 = vld [vmem:[%s7355_s2 + $0x118] sm:$0xff]  ;;  %v5954_v26 = vpack.c.bf16 %v405_v18, %v401_v17  ;;  %v407_v27 = vld [vmem:[%s7355_s2 + $0x100] sm:$0xff]  ;;  %v5964_v29 = vpack.c.bf16 %v412_v21, %v408_v20  ;;  %v409_v30 = vld [vmem:[%s7355_s2 + $0x110] sm:$0xff] }
  0x24   :  { %4089 = vmatprep.subr.bf16.mxu1 %v5807_v41  ;;  %v414_v25 = vld [vmem:[%s7355_s2 + $0x138] sm:$0xff]  ;;  %v411_v28 = vld [vmem:[%s7355_s2 + $0x120] sm:$0xff]  ;;  %v413_v31 = vld [vmem:[%s7355_s2 + $0x130] sm:$0xff] }
  0x25   :  { %182 = vmatmul.mubr.f32.vlgmr.msra.gmra.mrb[0].mxu0 %v23_v46  ;;  %v5973_v32 = vpack.c.bf16 %v414_v25, %v410_v24  ;;  %v416_v33 = vld [vmem:[%s7355_s2 + $0x148] sm:$0xff]  ;;  %v27_v35 = vld [vmem:[%s7356_s0 + $0x20] sm:$0xff]  ;;  %v5985_v36 = vpack.c.bf16 %v411_v28, %v407_v27  ;;  %v418_v37 = vld [vmem:[%s7355_s2 + $0x158] sm:$0xff]  ;;  %v5995_v40 = vpack.c.bf16 %v413_v31, %v409_v30  ;;  %v97_v28 = vlaneseq }
  0x26   :  { %295 = vmatmul.mubr.f32.vlgmr.msra.gmra.mrb[0].mxu1 %v23_v46  ;;  %4059 = vmatpush1.bf16.msra.mxu0 %v5824_v47  ;;  %v420_v34 = vld [vmem:[%s7355_s2 + $0x168] sm:$0xff]  ;;  %v422_v39 = vld [vmem:[%s7355_s2 + $0x178] sm:$0xff]  ;;  %v415_v42 = vld [vmem:[%s7355_s2 + $0x140] sm:$0xff] }
  0x27   :  { %4091 = vmatpush1.bf16.msra.mxu1 %v5833_v50  ;;  %187 = vmatprep.mubr.f32.mxu0 %v5555_v3  ;;  %v419_v43 = vld [vmem:[%s7355_s2 + $0x160] sm:$0xff]  ;;  %v6005_v44 = vpack.c.bf16 %v420_v34, %v416_v33  ;;  %v417_v45 = vld [vmem:[%s7355_s2 + $0x150] sm:$0xff]  ;;  %v6014_v48 = vpack.c.bf16 %v422_v39, %v418_v37  ;;  %v424_v49 = vld [vmem:[%s7355_s2 + $0x188] sm:$0xff]  ;;  %v6153_v30 = vshrl.u32 %v97_v28, 7 }
  0x28   :  { %300 = vmatprep.mubr.f32.mxu1 %v5555_v3  ;;  %4061 = vmatprep.subr.bf16.mxu0 %v5842_v53  ;;  %v421_v46 = vld [vmem:[%s7355_s2 + $0x170] sm:$0xff]  ;;  %v428_v51 = vld [vmem:[%s7355_s2 + $0x1a8] sm:$0xff]  ;;  %v6026_v54 = vpack.c.bf16 %v419_v43, %v415_v42  ;;  %v426_v55 = vld [vmem:[%s7355_s2 + $0x198] sm:$0xff] }
  0x29   :  { %188 = vmatmul.mubr.f32.gmra.mrb[2].mxu0 %v24_v59  ;;  %4093 = vmatprep.subr.bf16.mxu1 %v5850_v56  ;;  %v28_v52 = vld [vmem:[%s7356_s0 + $0x28] sm:$0xff]  ;;  %v430_v57 = vld [vmem:[%s7355_s2 + $0x1b8] sm:$0xff]  ;;  %v6036_v58 = vpack.c.bf16 %v421_v46, %v417_v45  ;;  %v427_v61 = vld [vmem:[%s7355_s2 + $0x1a0] sm:$0xff]  ;;  %v6046_v62 = vpack.c.bf16 %v428_v51, %v424_v49  ;;  %v99_v31 = vsub.s32 0, %v6153_v30  ;;  %v103_v34 = vsub.s32 1, %v6153_v30 }
  0x2a   :  { %301 = vmatmul.mubr.f32.gmra.mrb[2].mxu1 %v24_v59  ;;  %4063 = vmatpush1.bf16.msra.mxu0 %v5862_v60  ;;  %v423_v59 = vld [vmem:[%s7355_s2 + $0x180] sm:$0xff]  ;;  %v425_v0 = vld [vmem:[%s7355_s2 + $0x190] sm:$0xff]  ;;  %v6055_v4 = vpack.c.bf16 %v430_v57, %v426_v55  ;;  %v432_v5 = vld [vmem:[%s7355_s2 + $0x1c8] sm:$0xff]  ;;  %v111_v42 = vsub.s32 3, %v6153_v30 }
  0x2b   :  { %4095 = vmatpush1.bf16.msra.mxu1 %v5872_v63  ;;  %193 = vmatprep.mubr.f32.mxu0 %v5555_v3  ;;  %v429_v1 = vld [vmem:[%s7355_s2 + $0x1b0] sm:$0xff]  ;;  %v436_v7 = vld [vmem:[%s7355_s2 + $0x1e8] sm:$0xff]  ;;  %v434_v11 = vld [vmem:[%s7355_s2 + $0x1d8] sm:$0xff] }
  0x2c   :  { %306 = vmatprep.mubr.f32.mxu1 %v5555_v3  ;;  %4065 = vmatprep.subr.bf16.mxu0 %v5882_v2  ;;  %v29_v8 = vld [vmem:[%s7356_s0 + $0x30] sm:$0xff]  ;;  %v438_v12 = vld [vmem:[%s7355_s2 + $0x1f8] sm:$0xff]  ;;  %v6077_v14 = vpack.c.bf16 %v429_v1, %v425_v0  ;;  %v431_v15 = vld [vmem:[%s7355_s2 + $0x1c0] sm:$0xff]  ;;  %v6087_v18 = vpack.c.bf16 %v436_v7, %v432_v5 }
  0x2d   :  { %194 = vmatmul.mubr.f32.gmra.mrb[4].mxu0 %v25_v9  ;;  %4097 = vmatprep.subr.bf16.mxu1 %v5891_v6  ;;  %v435_v17 = vld [vmem:[%s7355_s2 + $0x1e0] sm:$0xff]  ;;  %v433_v20 = vld [vmem:[%s7355_s2 + $0x1d0] sm:$0xff]  ;;  %v30_v24 = vld [vmem:[%s7356_s0 + $0x38] sm:$0xff] }
  0x2e   :  { %307 = vmatmul.mubr.f32.gmra.mrb[4].mxu1 %v25_v9  ;;  %4067 = vmatpush1.bf16.msra.mxu0 %v5903_v10  ;;  %v6067_v9 = vpack.c.bf16 %v427_v61, %v423_v59  ;;  %v437_v21 = vld [vmem:[%s7355_s2 + $0x1f0] sm:$0xff]  ;;  %v6102_v25 = vpack.c.bf16 %v435_v17, %v431_v15  ;;  %v95_v33 = vld [vmem:[%s7357_s3] sm:$0xf]  ;;  %v107_v59 = vsub.s32 2, %v6153_v30 }
  0x2f   :  { %4099 = vmatpush1.bf16.msra.mxu1 %v5913_v13  ;;  %199 = vmatprep.mubr.f32.mxu0 %v5555_v3  ;;  %v6106_v27 = vpack.c.bf16 %v437_v21, %v433_v20  ;;  %v6166_v37 = vrot.slane %v95_v33, %v103_v34  ;;  %v6173_v57 = vrot.slane %v95_v33, %v111_v42 }
  0x30   :  { %312 = vmatprep.mubr.f32.mxu1 %v5555_v3  ;;  %4069 = vmatprep.subr.bf16.mxu0 %v5923_v16  ;;  %v6179_v0 = vrot.slane %v95_v33, %v107_v59 }
  0x31   :  { %200 = vmatmul.mubr.f32.gmra.mrb[6].mxu0 %v26_v22  ;;  %4101 = vmatprep.subr.bf16.mxu1 %v5932_v19 }
  0x32   :  { %313 = vmatmul.mubr.f32.gmra.mrb[6].mxu1 %v26_v22  ;;  %4071 = vmatpush1.bf16.msra.mxu0 %v5944_v23  ;;  %v6096_v22 = vpack.c.bf16 %v438_v12, %v434_v11 }
  0x33   :  { %4103 = vmatpush1.bf16.msra.mxu1 %v5954_v26  ;;  %205 = vmatprep.mubr.f32.mxu0 %v5555_v3 }
  0x34   :  { %318 = vmatprep.mubr.f32.mxu1 %v5555_v3  ;;  %4073 = vmatprep.subr.bf16.mxu0 %v5964_v29 }
  0x35   :  { %206 = vmatmul.mubr.f32.gmra.mrb[8].mxu0 %v27_v35  ;;  %4105 = vmatprep.subr.bf16.mxu1 %v5973_v32 }
  0x36   :  { %319 = vmatmul.mubr.f32.gmra.mrb[8].mxu1 %v27_v35  ;;  %4075 = vmatpush1.bf16.msra.mxu0 %v5985_v36  ;;  %v6162_v35 = vrot.slane %v95_v33, %v99_v31 }
  0x37   :  { %4107 = vmatpush1.bf16.msra.mxu1 %v5995_v40  ;;  %211 = vmatprep.mubr.f32.mxu0 %v5555_v3 }
  0x38   :  { %324 = vmatprep.mubr.f32.mxu1 %v5555_v3  ;;  %4077 = vmatprep.subr.bf16.mxu0 %v6005_v44 }
  0x39   :  { %212 = vmatmul.mubr.f32.gmra.mrb[10].mxu0 %v28_v52  ;;  %4109 = vmatprep.subr.bf16.mxu1 %v6014_v48 }
  0x3a   :  { %325 = vmatmul.mubr.f32.gmra.mrb[10].mxu1 %v28_v52  ;;  %4079 = vmatpush1.bf16.msra.mxu0 %v6026_v54 }
  0x3b   :  { %4111 = vmatpush1.bf16.msra.mxu1 %v6036_v58  ;;  %217 = vmatprep.mubr.f32.mxu0 %v5555_v3 }
  0x3c   :  { %330 = vmatprep.mubr.f32.mxu1 %v5555_v3  ;;  %4081 = vmatprep.subr.bf16.mxu0 %v6046_v62 }
  0x3d   :  { %218 = vmatmul.mubr.f32.gmra.mrb[12].mxu0 %v29_v8  ;;  %4113 = vmatprep.subr.bf16.mxu1 %v6055_v4 }
  0x3e   :  { %331 = vmatmul.mubr.f32.gmra.mrb[12].mxu1 %v29_v8  ;;  %4083 = vmatpush1.bf16.msra.mxu0 %v6067_v9 }
  0x3f   :  { %4115 = vmatpush1.bf16.msra.mxu1 %v6077_v14  ;;  %223 = vmatprep.mubr.f32.mxu0 %v5555_v3 }
  0x40   :  { %336 = vmatprep.mubr.f32.mxu1 %v5555_v3  ;;  %4085 = vmatprep.subr.bf16.mxu0 %v6087_v18 }
  0x41   :  { %224 = vmatmul.mubr.f32.gmra.mrb[14].mxu0 %v30_v24  ;;  %4117 = vmatprep.subr.bf16.mxu1 %v6096_v22 }
  0x42   :  { %337 = vmatmul.mubr.f32.gmra.mrb[14].mxu1 %v30_v24  ;;  %4087 = vmatpush1.bf16.msra.mxu0 %v6102_v25 }
  0x43   :  { %4119 = vmatpush1.bf16.msra.mxu1 %v6106_v27  ;;  %507 = vmatprep.mubr.f32.mxu0 %v5555_v3 }
  0x44   :  { %578 = vmatprep.mubr.f32.mxu1 %v5555_v3  ;;  %4121 = vmatprep.subr.bf16.mxu0 %v5799_v38 }
  0x45   :  { %508 = vmatmul.mubr.f32.vlgmr.msra.gmra.mrb[0].mxu0 %v5555_v3  ;;  %4153 = vmatprep.subr.bf16.mxu1 %v5807_v41 }
  0x46   :  { %579 = vmatmul.mubr.f32.vlgmr.msra.gmra.mrb[0].mxu1 %v5555_v3  ;;  %4123 = vmatpush1.bf16.msra.mxu0 %v5824_v47 }
  0x47   :  { %4155 = vmatpush1.bf16.msra.mxu1 %v5833_v50  ;;  %4125 = vmatprep.subr.bf16.mxu0 %v5842_v53 }
  0x48   :  { %4157 = vmatprep.subr.bf16.mxu1 %v5850_v56  ;;  %683 = vmatprep.mubr.f32.mxu0 %v5555_v3 }
  0x49   :  { %754 = vmatprep.mubr.f32.mxu1 %v5555_v3 }
  0x4a   :  { %4127 = vmatpush1.bf16.msra.mxu0 %v5862_v60 }
  0x4b   :  { %4159 = vmatpush1.bf16.msra.mxu1 %v5872_v63  ;;  %4129 = vmatprep.subr.bf16.mxu0 %v5882_v2 }
  0x4c   :  { %4161 = vmatprep.subr.bf16.mxu1 %v5891_v6 }
  0x4e   :  { %4131 = vmatpush1.bf16.msra.mxu0 %v5903_v10 }
  0x4f   :  { %4163 = vmatpush1.bf16.msra.mxu1 %v5913_v13  ;;  %4133 = vmatprep.subr.bf16.mxu0 %v5923_v16 }
  0x50   :  { %4165 = vmatprep.subr.bf16.mxu1 %v5932_v19 }
  0x52   :  { %4135 = vmatpush1.bf16.msra.mxu0 %v5944_v23 }
  0x53   :  { %4167 = vmatpush1.bf16.msra.mxu1 %v5954_v26  ;;  %4137 = vmatprep.subr.bf16.mxu0 %v5964_v29 }
  0x54   :  { %4169 = vmatprep.subr.bf16.mxu1 %v5973_v32 }
  0x56   :  { %4139 = vmatpush1.bf16.msra.mxu0 %v5985_v36 }
  0x57   :  { %4171 = vmatpush1.bf16.msra.mxu1 %v5995_v40  ;;  %4141 = vmatprep.subr.bf16.mxu0 %v6005_v44 }
  0x58   :  { %4173 = vmatprep.subr.bf16.mxu1 %v6014_v48 }
  0x5a   :  { %4143 = vmatpush1.bf16.msra.mxu0 %v6026_v54 }
  0x5b   :  { %4175 = vmatpush1.bf16.msra.mxu1 %v6036_v58  ;;  %4145 = vmatprep.subr.bf16.mxu0 %v6046_v62 }
  0x5c   :  { %4177 = vmatprep.subr.bf16.mxu1 %v6055_v4 }
  0x5e   :  { %4147 = vmatpush1.bf16.msra.mxu0 %v6067_v9 }
  0x5f   :  { %4179 = vmatpush1.bf16.msra.mxu1 %v6077_v14  ;;  %4149 = vmatprep.subr.bf16.mxu0 %v6087_v18 }
  0x60   :  { %4181 = vmatprep.subr.bf16.mxu1 %v6096_v22 }
  0x62   :  { %4151 = vmatpush1.bf16.msra.mxu0 %v6102_v25 }
  0x63   :  { %4183 = vmatpush1.bf16.msra.mxu1 %v6106_v27  ;;  %4185 = vmatprep.subr.bf16.mxu0 %v5799_v38 }
  0x64   :  { %4217 = vmatprep.subr.bf16.mxu1 %v5807_v41 }
 0x118   :  { %v509_v39 = vpop.f32.mrb[0].mxu0 }
 0x119   :  { %v5168_v43 = vadd.f32 %v509_v39, %v6162_v35  ;;  %v580_v45 = vpop.f32.mrb[0].mxu1  ;;  %v511_v46 = vpop.f32.mrb[1].mxu0 }
 0x11a   :  { %v5169_v49 = vadd.f32 %v511_v46, %v6166_v37  ;;  %v582_v51 = vpop.f32.mrb[1].mxu1  ;;  %v5184_v5 = vadd.f32 %v580_v45, %v6179_v0 }
 0x11b   :  { %v3762_v52 = vmul.f32 -1.442695, %v5168_v43  ;;  %v5185_v61 = vadd.f32 %v582_v51, %v6173_v57 }
 0x11c   :  { %v3763_v55 = vmul.f32 -1.442695, %v5169_v49 }
 0x11d   :  { %5299 = vpow2.f32 %v3762_v52  ;;  %v3764_v1 = vmul.f32 -1.442695, %v5185_v61 }
 0x11e   :  { %5301 = vpow2.f32 %v3763_v55 }
 0x11f   :  { %5303 = vpow2.f32 %v3764_v1 }
 0x120   :  { %5305 = vtanh.f32 %v5184_v5 }
 0x127   :  { %v5300_v7 = vpop.eup %5299 }
 0x128   :  { %v5302_v8 = vpop.eup %5301  ;;  %v592_v11 = vadd.f32 1.0, %v5300_v7 }
 0x129   :  { %v598_v12 = vadd.f32 1.0, %v5302_v8  ;;  %v5304_v15 = vpop.eup %5303 }
 0x12a   :  { %5307 = vrcp.f32 %v592_v11  ;;  %v5306_v17 = vpop.eup %5305  ;;  %v605_v28 = vadd.f32 1.0, %v5304_v15 }
 0x12b   :  { %5309 = vrcp.f32 %v598_v12 }
 0x12c   :  { %5311 = vrcp.f32 %v605_v28 }
 0x134   :  { %v5308_v20 = vpop.eup %5307 }
 0x135   :  { %v5310_v21 = vpop.eup %5309  ;;  %v609_v24 = vmul.f32 %v5308_v20, %v5306_v17 }
 0x136   :  { %v608_v39 = vmul.f32 0.0, %v5310_v21  ;;  %v5312_v43 = vpop.eup %5311 }
 0x138   :  { %v6182_v33 = vadd.f32 %v609_v24, %v608_v39 }
 0x13a   :  { %5313 = vtanh.f32 %v6182_v33 }
 0x144   :  { %v5314_v45 = vpop.eup %5313 }
 0x145   :  { %v6185_v46 = vmul.f32 %v5314_v45, %v5312_v43 }
 0x147   :  { %684 = vmatmul.mubr.f32.vlgmr.msra.gmra.mrb[2].mxu0 %v6185_v46  ;;  %755 = vmatmul.mubr.f32.vlgmr.msra.gmra.mrb[2].mxu1 %v6185_v46 }
 0x148   :  { %4187 = vmatpush1.bf16.msra.mxu0 %v5824_v47  ;;  %4219 = vmatpush1.bf16.msra.mxu1 %v5833_v50 }
 0x149   :  { %4189 = vmatprep.subr.bf16.mxu0 %v5842_v53  ;;  %4221 = vmatprep.subr.bf16.mxu1 %v5850_v56 }
 0x14a   :  { %860 = vmatprep.mubr.f32.mxu0 %v5555_v3  ;;  %931 = vmatprep.mubr.f32.mxu1 %v5555_v3 }
 0x14c   :  { %4191 = vmatpush1.bf16.msra.mxu0 %v5862_v60  ;;  %4223 = vmatpush1.bf16.msra.mxu1 %v5872_v63 }
 0x14d   :  { %4193 = vmatprep.subr.bf16.mxu0 %v5882_v2  ;;  %4225 = vmatprep.subr.bf16.mxu1 %v5891_v6 }
 0x150   :  { %4195 = vmatpush1.bf16.msra.mxu0 %v5903_v10  ;;  %4227 = vmatpush1.bf16.msra.mxu1 %v5913_v13 }
 0x151   :  { %4197 = vmatprep.subr.bf16.mxu0 %v5923_v16  ;;  %4229 = vmatprep.subr.bf16.mxu1 %v5932_v19 }
 0x154   :  { %4199 = vmatpush1.bf16.msra.mxu0 %v5944_v23  ;;  %4231 = vmatpush1.bf16.msra.mxu1 %v5954_v26 }
 0x155   :  { %4201 = vmatprep.subr.bf16.mxu0 %v5964_v29  ;;  %4233 = vmatprep.subr.bf16.mxu1 %v5973_v32 }
 0x158   :  { %4203 = vmatpush1.bf16.msra.mxu0 %v5985_v36  ;;  %4235 = vmatpush1.bf16.msra.mxu1 %v5995_v40 }
 0x159   :  { %4205 = vmatprep.subr.bf16.mxu0 %v6005_v44  ;;  %4237 = vmatprep.subr.bf16.mxu1 %v6014_v48 }
 0x15c   :  { %4207 = vmatpush1.bf16.msra.mxu0 %v6026_v54  ;;  %4239 = vmatpush1.bf16.msra.mxu1 %v6036_v58 }
 0x15d   :  { %4209 = vmatprep.subr.bf16.mxu0 %v6046_v62  ;;  %4241 = vmatprep.subr.bf16.mxu1 %v6055_v4 }
 0x160   :  { %4211 = vmatpush1.bf16.msra.mxu0 %v6067_v9  ;;  %4243 = vmatpush1.bf16.msra.mxu1 %v6077_v14 }
 0x161   :  { %4213 = vmatprep.subr.bf16.mxu0 %v6087_v18  ;;  %4245 = vmatprep.subr.bf16.mxu1 %v6096_v22 }
 0x164   :  { %4215 = vmatpush1.bf16.msra.mxu0 %v6102_v25  ;;  %4247 = vmatpush1.bf16.msra.mxu1 %v6106_v27 }
 0x165   :  { %4249 = vmatprep.subr.bf16.mxu0 %v5799_v38  ;;  %4281 = vmatprep.subr.bf16.mxu1 %v5807_v41 }
 0x21a   :  { %v685_v49 = vpop.f32.mrb[2].mxu0  ;;  %v756_v51 = vpop.f32.mrb[2].mxu1 }
 0x21b   :  { %v5170_v52 = vadd.f32 %v685_v49, %v6162_v35  ;;  %v687_v55 = vpop.f32.mrb[3].mxu0  ;;  %v758_v61 = vpop.f32.mrb[3].mxu1  ;;  %v5186_v12 = vadd.f32 %v756_v51, %v6179_v0 }
 0x21c   :  { %v5171_v1 = vadd.f32 %v687_v55, %v6166_v37  ;;  %v5187_v8 = vadd.f32 %v758_v61, %v6173_v57 }
 0x21d   :  { %v3765_v5 = vmul.f32 -1.442695, %v5170_v52 }
 0x21e   :  { %v3766_v7 = vmul.f32 -1.442695, %v5171_v1  ;;  %v3767_v11 = vmul.f32 -1.442695, %v5187_v8 }
 0x21f   :  { %5315 = vpow2.f32 %v3765_v5 }
 0x220   :  { %5317 = vpow2.f32 %v3766_v7 }
 0x221   :  { %5319 = vpow2.f32 %v3767_v11 }
 0x222   :  { %5321 = vtanh.f32 %v5186_v12 }
 0x229   :  { %v5316_v15 = vpop.eup %5315 }
 0x22a   :  { %v5318_v17 = vpop.eup %5317  ;;  %v768_v20 = vadd.f32 1.0, %v5316_v15 }
 0x22b   :  { %v774_v21 = vadd.f32 1.0, %v5318_v17  ;;  %v5320_v24 = vpop.eup %5319 }
 0x22c   :  { %5323 = vrcp.f32 %v768_v20  ;;  %v5322_v28 = vpop.eup %5321  ;;  %v781_v49 = vadd.f32 1.0, %v5320_v24 }
 0x22d   :  { %5325 = vrcp.f32 %v774_v21 }
 0x22e   :  { %5327 = vrcp.f32 %v781_v49 }
 0x236   :  { %v5324_v39 = vpop.eup %5323 }
 0x237   :  { %v5326_v43 = vpop.eup %5325  ;;  %v785_v45 = vmul.f32 %v5324_v39, %v5322_v28 }
 0x238   :  { %v784_v52 = vmul.f32 %v5326_v43, %v6182_v33  ;;  %v5328_v51 = vpop.eup %5327 }
 0x23a   :  { %v6228_v55 = vadd.f32 %v785_v45, %v784_v52 }
 0x23c   :  { %5329 = vtanh.f32 %v6228_v55 }
 0x246   :  { %v5330_v61 = vpop.eup %5329 }
 0x247   :  { %v6231_v1 = vmul.f32 %v5330_v61, %v5328_v51 }
 0x249   :  { %861 = vmatmul.mubr.f32.vlgmr.msra.gmra.mrb[4].mxu0 %v6231_v1  ;;  %932 = vmatmul.mubr.f32.vlgmr.msra.gmra.mrb[4].mxu1 %v6231_v1 }
 0x24a   :  { %4251 = vmatpush1.bf16.msra.mxu0 %v5824_v47  ;;  %4283 = vmatpush1.bf16.msra.mxu1 %v5833_v50 }
 0x24b   :  { %4253 = vmatprep.subr.bf16.mxu0 %v5842_v53  ;;  %4285 = vmatprep.subr.bf16.mxu1 %v5850_v56 }
 0x24c   :  { %1037 = vmatprep.mubr.f32.mxu0 %v5555_v3  ;;  %1108 = vmatprep.mubr.f32.mxu1 %v5555_v3 }
 0x24e   :  { %4255 = vmatpush1.bf16.msra.mxu0 %v5862_v60  ;;  %4287 = vmatpush1.bf16.msra.mxu1 %v5872_v63 }
 0x24f   :  { %4257 = vmatprep.subr.bf16.mxu0 %v5882_v2  ;;  %4289 = vmatprep.subr.bf16.mxu1 %v5891_v6 }
 0x252   :  { %4259 = vmatpush1.bf16.msra.mxu0 %v5903_v10  ;;  %4291 = vmatpush1.bf16.msra.mxu1 %v5913_v13 }
 0x253   :  { %4261 = vmatprep.subr.bf16.mxu0 %v5923_v16  ;;  %4293 = vmatprep.subr.bf16.mxu1 %v5932_v19 }
 0x256   :  { %4263 = vmatpush1.bf16.msra.mxu0 %v5944_v23  ;;  %4295 = vmatpush1.bf16.msra.mxu1 %v5954_v26 }
 0x257   :  { %4265 = vmatprep.subr.bf16.mxu0 %v5964_v29  ;;  %4297 = vmatprep.subr.bf16.mxu1 %v5973_v32 }
 0x25a   :  { %4267 = vmatpush1.bf16.msra.mxu0 %v5985_v36  ;;  %4299 = vmatpush1.bf16.msra.mxu1 %v5995_v40 }
 0x25b   :  { %4269 = vmatprep.subr.bf16.mxu0 %v6005_v44  ;;  %4301 = vmatprep.subr.bf16.mxu1 %v6014_v48 }
 0x25e   :  { %4271 = vmatpush1.bf16.msra.mxu0 %v6026_v54  ;;  %4303 = vmatpush1.bf16.msra.mxu1 %v6036_v58 }
 0x25f   :  { %4273 = vmatprep.subr.bf16.mxu0 %v6046_v62  ;;  %4305 = vmatprep.subr.bf16.mxu1 %v6055_v4 }
 0x262   :  { %4275 = vmatpush1.bf16.msra.mxu0 %v6067_v9  ;;  %4307 = vmatpush1.bf16.msra.mxu1 %v6077_v14 }
 0x263   :  { %4277 = vmatprep.subr.bf16.mxu0 %v6087_v18  ;;  %4309 = vmatprep.subr.bf16.mxu1 %v6096_v22 }
 0x266   :  { %4279 = vmatpush1.bf16.msra.mxu0 %v6102_v25  ;;  %4311 = vmatpush1.bf16.msra.mxu1 %v6106_v27 }
 0x267   :  { %4313 = vmatprep.subr.bf16.mxu0 %v5799_v38  ;;  %4345 = vmatprep.subr.bf16.mxu1 %v5807_v41 }
 0x31c   :  { %v862_v33 = vpop.f32.mrb[4].mxu0  ;;  %v933_v5 = vpop.f32.mrb[4].mxu1 }
 0x31d   :  { %v5172_v7 = vadd.f32 %v862_v33, %v6162_v35  ;;  %v864_v8 = vpop.f32.mrb[5].mxu0  ;;  %v935_v11 = vpop.f32.mrb[5].mxu1  ;;  %v5188_v24 = vadd.f32 %v933_v5, %v6179_v0 }
 0x31e   :  { %v5173_v12 = vadd.f32 %v864_v8, %v6166_v37  ;;  %v5189_v20 = vadd.f32 %v935_v11, %v6173_v57 }
 0x31f   :  { %v3768_v15 = vmul.f32 -1.442695, %v5172_v7 }
 0x320   :  { %v3769_v17 = vmul.f32 -1.442695, %v5173_v12  ;;  %v3770_v21 = vmul.f32 -1.442695, %v5189_v20 }
 0x321   :  { %5331 = vpow2.f32 %v3768_v15 }
 0x322   :  { %5333 = vpow2.f32 %v3769_v17 }
 0x323   :  { %5335 = vpow2.f32 %v3770_v21 }
 0x324   :  { %5337 = vtanh.f32 %v5188_v24 }
 0x32b   :  { %v5332_v28 = vpop.eup %5331 }
 0x32c   :  { %v5334_v39 = vpop.eup %5333  ;;  %v945_v43 = vadd.f32 1.0, %v5332_v28 }
 0x32d   :  { %v951_v45 = vadd.f32 1.0, %v5334_v39  ;;  %v5336_v49 = vpop.eup %5335 }
 0x32e   :  { %5339 = vrcp.f32 %v945_v43  ;;  %v5338_v52 = vpop.eup %5337  ;;  %v958_v7 = vadd.f32 1.0, %v5336_v49 }
 0x32f   :  { %5341 = vrcp.f32 %v951_v45 }
 0x330   :  { %5343 = vrcp.f32 %v958_v7 }
 0x338   :  { %v5340_v51 = vpop.eup %5339 }
 0x339   :  { %v5342_v61 = vpop.eup %5341  ;;  %v962_v33 = vmul.f32 %v5340_v51, %v5338_v52 }
 0x33a   :  { %v961_v8 = vmul.f32 %v5342_v61, %v6228_v55  ;;  %v5344_v5 = vpop.eup %5343 }
 0x33c   :  { %v6274_v11 = vadd.f32 %v962_v33, %v961_v8 }
 0x33e   :  { %5345 = vtanh.f32 %v6274_v11 }
 0x348   :  { %v5346_v12 = vpop.eup %5345 }
 0x349   :  { %v6277_v15 = vmul.f32 %v5346_v12, %v5344_v5 }
 0x34b   :  { %1038 = vmatmul.mubr.f32.vlgmr.msra.gmra.mrb[6].mxu0 %v6277_v15  ;;  %1109 = vmatmul.mubr.f32.vlgmr.msra.gmra.mrb[6].mxu1 %v6277_v15 }
 0x34c   :  { %4315 = vmatpush1.bf16.msra.mxu0 %v5824_v47  ;;  %4347 = vmatpush1.bf16.msra.mxu1 %v5833_v50 }
 0x34d   :  { %4317 = vmatprep.subr.bf16.mxu0 %v5842_v53  ;;  %4349 = vmatprep.subr.bf16.mxu1 %v5850_v56 }
 0x34e   :  { %1214 = vmatprep.mubr.f32.mxu0 %v5555_v3  ;;  %1285 = vmatprep.mubr.f32.mxu1 %v5555_v3 }
 0x350   :  { %4319 = vmatpush1.bf16.msra.mxu0 %v5862_v60  ;;  %4351 = vmatpush1.bf16.msra.mxu1 %v5872_v63 }
 0x351   :  { %4321 = vmatprep.subr.bf16.mxu0 %v5882_v2  ;;  %4353 = vmatprep.subr.bf16.mxu1 %v5891_v6 }
 0x354   :  { %4323 = vmatpush1.bf16.msra.mxu0 %v5903_v10  ;;  %4355 = vmatpush1.bf16.msra.mxu1 %v5913_v13 }
 0x355   :  { %4325 = vmatprep.subr.bf16.mxu0 %v5923_v16  ;;  %4357 = vmatprep.subr.bf16.mxu1 %v5932_v19 }
 0x358   :  { %4327 = vmatpush1.bf16.msra.mxu0 %v5944_v23  ;;  %4359 = vmatpush1.bf16.msra.mxu1 %v5954_v26 }
 0x359   :  { %4329 = vmatprep.subr.bf16.mxu0 %v5964_v29  ;;  %4361 = vmatprep.subr.bf16.mxu1 %v5973_v32 }
 0x35c   :  { %4331 = vmatpush1.bf16.msra.mxu0 %v5985_v36  ;;  %4363 = vmatpush1.bf16.msra.mxu1 %v5995_v40 }
 0x35d   :  { %4333 = vmatprep.subr.bf16.mxu0 %v6005_v44  ;;  %4365 = vmatprep.subr.bf16.mxu1 %v6014_v48 }
 0x360   :  { %4335 = vmatpush1.bf16.msra.mxu0 %v6026_v54  ;;  %4367 = vmatpush1.bf16.msra.mxu1 %v6036_v58 }
 0x361   :  { %4337 = vmatprep.subr.bf16.mxu0 %v6046_v62  ;;  %4369 = vmatprep.subr.bf16.mxu1 %v6055_v4 }
 0x364   :  { %4339 = vmatpush1.bf16.msra.mxu0 %v6067_v9  ;;  %4371 = vmatpush1.bf16.msra.mxu1 %v6077_v14 }
 0x365   :  { %4341 = vmatprep.subr.bf16.mxu0 %v6087_v18  ;;  %4373 = vmatprep.subr.bf16.mxu1 %v6096_v22 }
 0x368   :  { %4343 = vmatpush1.bf16.msra.mxu0 %v6102_v25  ;;  %4375 = vmatpush1.bf16.msra.mxu1 %v6106_v27 }
 0x369   :  { %4377 = vmatprep.subr.bf16.mxu0 %v5799_v38  ;;  %4409 = vmatprep.subr.bf16.mxu1 %v5807_v41 }
 0x41e   :  { %v1039_v55 = vpop.f32.mrb[6].mxu0  ;;  %v1110_v17 = vpop.f32.mrb[6].mxu1 }
 0x41f   :  { %v5174_v20 = vadd.f32 %v1039_v55, %v6162_v35  ;;  %v1041_v21 = vpop.f32.mrb[7].mxu0  ;;  %v1112_v24 = vpop.f32.mrb[7].mxu1  ;;  %v5190_v52 = vadd.f32 %v1110_v17, %v6179_v0 }
 0x420   :  { %v5175_v28 = vadd.f32 %v1041_v21, %v6166_v37  ;;  %v5191_v45 = vadd.f32 %v1112_v24, %v6173_v57 }
 0x421   :  { %v3771_v39 = vmul.f32 -1.442695, %v5174_v20 }
 0x422   :  { %v3772_v43 = vmul.f32 -1.442695, %v5175_v28  ;;  %v3773_v49 = vmul.f32 -1.442695, %v5191_v45 }
 0x423   :  { %5347 = vpow2.f32 %v3771_v39 }
 0x424   :  { %5349 = vpow2.f32 %v3772_v43 }
 0x425   :  { %5351 = vpow2.f32 %v3773_v49 }
 0x426   :  { %5353 = vtanh.f32 %v5190_v52 }
 0x42d   :  { %v5348_v51 = vpop.eup %5347 }
 0x42e   :  { %v5350_v61 = vpop.eup %5349  ;;  %v1122_v33 = vadd.f32 1.0, %v5348_v51 }
 0x42f   :  { %v1128_v7 = vadd.f32 1.0, %v5350_v61  ;;  %v5352_v8 = vpop.eup %5351 }
 0x430   :  { %5355 = vrcp.f32 %v1122_v33  ;;  %v5354_v5 = vpop.eup %5353  ;;  %v1135_v21 = vadd.f32 1.0, %v5352_v8 }
 0x431   :  { %5357 = vrcp.f32 %v1128_v7 }
 0x432   :  { %5359 = vrcp.f32 %v1135_v21 }
 0x43a   :  { %v5356_v12 = vpop.eup %5355 }
 0x43b   :  { %v5358_v55 = vpop.eup %5357  ;;  %v1139_v20 = vmul.f32 %v5356_v12, %v5354_v5 }
 0x43c   :  { %v1138_v28 = vmul.f32 %v5358_v55, %v6274_v11  ;;  %v5360_v17 = vpop.eup %5359 }
 0x43e   :  { %v6320_v24 = vadd.f32 %v1139_v20, %v1138_v28 }
 0x440   :  { %5361 = vtanh.f32 %v6320_v24 }
 0x44a   :  { %v5362_v39 = vpop.eup %5361 }
 0x44b   :  { %v6323_v43 = vmul.f32 %v5362_v39, %v5360_v17 }
 0x44d   :  { %1215 = vmatmul.mubr.f32.vlgmr.msra.gmra.mrb[8].mxu0 %v6323_v43  ;;  %1286 = vmatmul.mubr.f32.vlgmr.msra.gmra.mrb[8].mxu1 %v6323_v43 }
 0x44e   :  { %4379 = vmatpush1.bf16.msra.mxu0 %v5824_v47  ;;  %4411 = vmatpush1.bf16.msra.mxu1 %v5833_v50 }
 0x44f   :  { %4381 = vmatprep.subr.bf16.mxu0 %v5842_v53  ;;  %4413 = vmatprep.subr.bf16.mxu1 %v5850_v56 }
 0x450   :  { %1391 = vmatprep.mubr.f32.mxu0 %v5555_v3  ;;  %1462 = vmatprep.mubr.f32.mxu1 %v5555_v3 }
 0x452   :  { %4383 = vmatpush1.bf16.msra.mxu0 %v5862_v60  ;;  %4415 = vmatpush1.bf16.msra.mxu1 %v5872_v63 }
 0x453   :  { %4385 = vmatprep.subr.bf16.mxu0 %v5882_v2  ;;  %4417 = vmatprep.subr.bf16.mxu1 %v5891_v6 }
 0x456   :  { %4387 = vmatpush1.bf16.msra.mxu0 %v5903_v10  ;;  %4419 = vmatpush1.bf16.msra.mxu1 %v5913_v13 }
 0x457   :  { %4389 = vmatprep.subr.bf16.mxu0 %v5923_v16  ;;  %4421 = vmatprep.subr.bf16.mxu1 %v5932_v19 }
 0x45a   :  { %4391 = vmatpush1.bf16.msra.mxu0 %v5944_v23  ;;  %4423 = vmatpush1.bf16.msra.mxu1 %v5954_v26 }
 0x45b   :  { %4393 = vmatprep.subr.bf16.mxu0 %v5964_v29  ;;  %4425 = vmatprep.subr.bf16.mxu1 %v5973_v32 }
 0x45e   :  { %4395 = vmatpush1.bf16.msra.mxu0 %v5985_v36  ;;  %4427 = vmatpush1.bf16.msra.mxu1 %v5995_v40 }
 0x45f   :  { %4397 = vmatprep.subr.bf16.mxu0 %v6005_v44  ;;  %4429 = vmatprep.subr.bf16.mxu1 %v6014_v48 }
 0x462   :  { %4399 = vmatpush1.bf16.msra.mxu0 %v6026_v54  ;;  %4431 = vmatpush1.bf16.msra.mxu1 %v6036_v58 }
 0x463   :  { %4401 = vmatprep.subr.bf16.mxu0 %v6046_v62  ;;  %4433 = vmatprep.subr.bf16.mxu1 %v6055_v4 }
 0x466   :  { %4403 = vmatpush1.bf16.msra.mxu0 %v6067_v9  ;;  %4435 = vmatpush1.bf16.msra.mxu1 %v6077_v14 }
 0x467   :  { %4405 = vmatprep.subr.bf16.mxu0 %v6087_v18  ;;  %4437 = vmatprep.subr.bf16.mxu1 %v6096_v22 }
 0x46a   :  { %4407 = vmatpush1.bf16.msra.mxu0 %v6102_v25  ;;  %4439 = vmatpush1.bf16.msra.mxu1 %v6106_v27 }
 0x46b   :  { %4441 = vmatprep.subr.bf16.mxu0 %v5799_v38  ;;  %4473 = vmatprep.subr.bf16.mxu1 %v5807_v41 }
 0x520   :  { %v1216_v11 = vpop.f32.mrb[8].mxu0  ;;  %v1287_v45 = vpop.f32.mrb[8].mxu1 }
 0x521   :  { %v5176_v49 = vadd.f32 %v1216_v11, %v6162_v35  ;;  %v1218_v52 = vpop.f32.mrb[9].mxu0  ;;  %v1289_v51 = vpop.f32.mrb[9].mxu1  ;;  %v5192_v12 = vadd.f32 %v1287_v45, %v6179_v0 }
 0x522   :  { %v5177_v61 = vadd.f32 %v1218_v52, %v6166_v37  ;;  %v5193_v8 = vadd.f32 %v1289_v51, %v6173_v57 }
 0x523   :  { %v3774_v33 = vmul.f32 -1.442695, %v5176_v49 }
 0x524   :  { %v3775_v7 = vmul.f32 -1.442695, %v5177_v61  ;;  %v3776_v5 = vmul.f32 -1.442695, %v5193_v8 }
 0x525   :  { %5363 = vpow2.f32 %v3774_v33 }
 0x526   :  { %5365 = vpow2.f32 %v3775_v7 }
 0x527   :  { %5367 = vpow2.f32 %v3776_v5 }
 0x528   :  { %5369 = vtanh.f32 %v5192_v12 }
 0x52f   :  { %v5364_v55 = vpop.eup %5363 }
 0x530   :  { %v5366_v20 = vpop.eup %5365  ;;  %v1299_v21 = vadd.f32 1.0, %v5364_v55 }
 0x531   :  { %v1305_v28 = vadd.f32 1.0, %v5366_v20  ;;  %v5368_v17 = vpop.eup %5367 }
 0x532   :  { %5371 = vrcp.f32 %v1299_v21  ;;  %v5370_v39 = vpop.eup %5369  ;;  %v1312_v61 = vadd.f32 1.0, %v5368_v17 }
 0x533   :  { %5373 = vrcp.f32 %v1305_v28 }
 0x534   :  { %5375 = vrcp.f32 %v1312_v61 }
 0x53c   :  { %v5372_v11 = vpop.eup %5371 }
 0x53d   :  { %v5374_v49 = vpop.eup %5373  ;;  %v1316_v52 = vmul.f32 %v5372_v11, %v5370_v39 }
 0x53e   :  { %v1315_v33 = vmul.f32 %v5374_v49, %v6320_v24  ;;  %v5376_v45 = vpop.eup %5375 }
 0x540   :  { %v6366_v51 = vadd.f32 %v1316_v52, %v1315_v33 }
 0x542   :  { %5377 = vtanh.f32 %v6366_v51 }
 0x54c   :  { %v5378_v7 = vpop.eup %5377 }
 0x54d   :  { %v6369_v8 = vmul.f32 %v5378_v7, %v5376_v45 }
 0x54f   :  { %1392 = vmatmul.mubr.f32.vlgmr.msra.gmra.mrb[10].mxu0 %v6369_v8  ;;  %1463 = vmatmul.mubr.f32.vlgmr.msra.gmra.mrb[10].mxu1 %v6369_v8 }
 0x550   :  { %4443 = vmatpush1.bf16.msra.mxu0 %v5824_v47  ;;  %4475 = vmatpush1.bf16.msra.mxu1 %v5833_v50 }
 0x551   :  { %4445 = vmatprep.subr.bf16.mxu0 %v5842_v53  ;;  %4477 = vmatprep.subr.bf16.mxu1 %v5850_v56 }
 0x552   :  { %1568 = vmatprep.mubr.f32.mxu0 %v5555_v3  ;;  %1639 = vmatprep.mubr.f32.mxu1 %v5555_v3 }
 0x554   :  { %4447 = vmatpush1.bf16.msra.mxu0 %v5862_v60  ;;  %4479 = vmatpush1.bf16.msra.mxu1 %v5872_v63 }
 0x555   :  { %4449 = vmatprep.subr.bf16.mxu0 %v5882_v2  ;;  %4481 = vmatprep.subr.bf16.mxu1 %v5891_v6 }
 0x558   :  { %4451 = vmatpush1.bf16.msra.mxu0 %v5903_v10  ;;  %4483 = vmatpush1.bf16.msra.mxu1 %v5913_v13 }
 0x559   :  { %4453 = vmatprep.subr.bf16.mxu0 %v5923_v16  ;;  %4485 = vmatprep.subr.bf16.mxu1 %v5932_v19 }
 0x55c   :  { %4455 = vmatpush1.bf16.msra.mxu0 %v5944_v23  ;;  %4487 = vmatpush1.bf16.msra.mxu1 %v5954_v26 }
 0x55d   :  { %4457 = vmatprep.subr.bf16.mxu0 %v5964_v29  ;;  %4489 = vmatprep.subr.bf16.mxu1 %v5973_v32 }
 0x560   :  { %4459 = vmatpush1.bf16.msra.mxu0 %v5985_v36  ;;  %4491 = vmatpush1.bf16.msra.mxu1 %v5995_v40 }
 0x561   :  { %4461 = vmatprep.subr.bf16.mxu0 %v6005_v44  ;;  %4493 = vmatprep.subr.bf16.mxu1 %v6014_v48 }
 0x564   :  { %4463 = vmatpush1.bf16.msra.mxu0 %v6026_v54  ;;  %4495 = vmatpush1.bf16.msra.mxu1 %v6036_v58 }
 0x565   :  { %4465 = vmatprep.subr.bf16.mxu0 %v6046_v62  ;;  %4497 = vmatprep.subr.bf16.mxu1 %v6055_v4 }
 0x568   :  { %4467 = vmatpush1.bf16.msra.mxu0 %v6067_v9  ;;  %4499 = vmatpush1.bf16.msra.mxu1 %v6077_v14 }
 0x569   :  { %4469 = vmatprep.subr.bf16.mxu0 %v6087_v18  ;;  %4501 = vmatprep.subr.bf16.mxu1 %v6096_v22 }
 0x56c   :  { %4471 = vmatpush1.bf16.msra.mxu0 %v6102_v25  ;;  %4503 = vmatpush1.bf16.msra.mxu1 %v6106_v27 }
 0x56d   :  { %4505 = vmatprep.subr.bf16.mxu0 %v5799_v38  ;;  %4537 = vmatprep.subr.bf16.mxu1 %v5807_v41 }
 0x622   :  { %v1393_v24 = vpop.f32.mrb[10].mxu0  ;;  %v1464_v5 = vpop.f32.mrb[10].mxu1 }
 0x623   :  { %v5178_v12 = vadd.f32 %v1393_v24, %v6162_v35  ;;  %v1395_v55 = vpop.f32.mrb[11].mxu0  ;;  %v1466_v20 = vpop.f32.mrb[11].mxu1  ;;  %v5194_v49 = vadd.f32 %v1464_v5, %v6179_v0 }
 0x624   :  { %v5179_v21 = vadd.f32 %v1395_v55, %v6166_v37  ;;  %v5195_v39 = vadd.f32 %v1466_v20, %v6173_v57 }
 0x625   :  { %v3777_v28 = vmul.f32 -1.442695, %v5178_v12 }
 0x626   :  { %v3778_v17 = vmul.f32 -1.442695, %v5179_v21  ;;  %v3779_v11 = vmul.f32 -1.442695, %v5195_v39  ;;  %v3788_v39 = vld [vmem:[%s7354_s1 + $0x210] sm:$0xff] }
 0x627   :  { %5379 = vpow2.f32 %v3777_v28 }
 0x628   :  { %5381 = vpow2.f32 %v3778_v17 }
 0x629   :  { %5383 = vpow2.f32 %v3779_v11  ;;  %v3792_v11 = vld [vmem:[%s7354_s1 + $0x230] sm:$0xff] }
 0x62a   :  { %5385 = vtanh.f32 %v5194_v49  ;;  %v3795_v49 = vld [vmem:[%s7354_s1 + $0x248] sm:$0xff] }
 0x631   :  { %v5380_v38 = vpop.eup %5379 }
 0x632   :  { %v5382_v52 = vpop.eup %5381  ;;  %v1476_v41 = vadd.f32 1.0, %v5380_v38  ;;  %v3799_v38 = vld [vmem:[%s7354_s1 + $0x268] sm:$0xff] }
 0x633   :  { %v1482_v61 = vadd.f32 1.0, %v5382_v52  ;;  %v5384_v33 = vpop.eup %5383  ;;  %v3797_v52 = vld [vmem:[%s7354_s1 + $0x258] sm:$0xff] }
 0x634   :  { %5387 = vrcp.f32 %v1476_v41  ;;  %v5386_v45 = vpop.eup %5385  ;;  %v1489_v55 = vadd.f32 1.0, %v5384_v33  ;;  %v3801_v41 = vld [vmem:[%s7354_s1 + $0x278] sm:$0xff] }
 0x635   :  { %5389 = vrcp.f32 %v1482_v61 }
 0x636   :  { %5391 = vrcp.f32 %v1489_v55 }
 0x63e   :  { %v5388_v7 = vpop.eup %5387 }
 0x63f   :  { %v5390_v24 = vpop.eup %5389  ;;  %v1493_v12 = vmul.f32 %v5388_v7, %v5386_v45  ;;  %v4602_v7 = vpack.c.bf16 %v3792_v11, %v3788_v39  ;;  %v3818_v39 = vld [vmem:[%s7354_s1 + $0x300] sm:$0xff] }
 0x640   :  { %v1492_v21 = vmul.f32 %v5390_v24, %v6366_v51  ;;  %v5392_v5 = vpop.eup %5391  ;;  %v3790_v51 = vld [vmem:[%s7354_s1 + $0x220] sm:$0xff] }
 0x641   :  { %v3794_v24 = vld [vmem:[%s7354_s1 + $0x240] sm:$0xff] }
 0x642   :  { %v6412_v20 = vadd.f32 %v1493_v12, %v1492_v21  ;;  %v3798_v12 = vld [vmem:[%s7354_s1 + $0x260] sm:$0xff]  ;;  %v4572_v21 = vpack.c.bf16 %v3799_v38, %v3795_v49 }
 0x643   :  { %v3822_v11 = vld [vmem:[%s7354_s1 + $0x320] sm:$0xff] }
 0x644   :  { %5393 = vtanh.f32 %v6412_v20 }
 0x64e   :  { %v5394_v28 = vpop.eup %5393 }
 0x64f   :  { %v6415_v17 = vmul.f32 %v5394_v28, %v5392_v5  ;;  %v3796_v5 = vld [vmem:[%s7354_s1 + $0x250] sm:$0xff] }
 0x650   :  { %v3800_v28 = vld [vmem:[%s7354_s1 + $0x270] sm:$0xff] }
 0x651   :  { %1569 = vmatmul.mubr.f32.vlgmr.msra.gmra.mrb[12].mxu0 %v6415_v17  ;;  %1640 = vmatmul.mubr.f32.vlgmr.msra.gmra.mrb[12].mxu1 %v6415_v17 }
 0x652   :  { %4507 = vmatpush1.bf16.msra.mxu0 %v5824_v47  ;;  %4539 = vmatpush1.bf16.msra.mxu1 %v5833_v50  ;;  %v3787_v47 = vld [vmem:[%s7354_s1 + $0x208] sm:$0xff] }
 0x653   :  { %4509 = vmatprep.subr.bf16.mxu0 %v5842_v53  ;;  %4541 = vmatprep.subr.bf16.mxu1 %v5850_v56  ;;  %v3791_v50 = vld [vmem:[%s7354_s1 + $0x228] sm:$0xff]  ;;  %v3789_v53 = vld [vmem:[%s7354_s1 + $0x218] sm:$0xff] }
 0x654   :  { %1745 = vmatprep.mubr.f32.mxu0 %v5555_v3  ;;  %1816 = vmatprep.mubr.f32.mxu1 %v5555_v3  ;;  %v4568_v56 = vpack.c.bf16 %v3791_v50, %v3787_v47  ;;  %v3803_v47 = vld [vmem:[%s7354_s1 + $0x288] sm:$0xff] }
 0x655   :  { %v3807_v50 = vld [vmem:[%s7354_s1 + $0x2a8] sm:$0xff] }
 0x656   :  { %4511 = vmatpush1.bf16.msra.mxu0 %v5862_v60  ;;  %4543 = vmatpush1.bf16.msra.mxu1 %v5872_v63  ;;  %v3793_v60 = vld [vmem:[%s7354_s1 + $0x238] sm:$0xff] }
 0x657   :  { %4513 = vmatprep.subr.bf16.mxu0 %v5882_v2  ;;  %4545 = vmatprep.subr.bf16.mxu1 %v5891_v6  ;;  %v4600_v63 = vpack.c.bf16 %v3793_v60, %v3789_v53  ;;  %v3805_v53 = vld [vmem:[%s7354_s1 + $0x298] sm:$0xff]  ;;  %v4574_v60 = vpack.c.bf16 %v3798_v12, %v3794_v24  ;;  %v4586_v24 = vpack.c.bf16 %v3822_v11, %v3818_v39  ;;  %v3853_v39 = vld [vmem:[%s7355_s2 + $0x210] sm:$0xff] }
 0x658   :  { %v3857_v11 = vld [vmem:[%s7355_s2 + $0x230] sm:$0xff] }
 0x65a   :  { %4515 = vmatpush1.bf16.msra.mxu0 %v5903_v10  ;;  %4547 = vmatpush1.bf16.msra.mxu1 %v5913_v13 }
 0x65b   :  { %4517 = vmatprep.subr.bf16.mxu0 %v5923_v16  ;;  %4549 = vmatprep.subr.bf16.mxu1 %v5932_v19 }
 0x65e   :  { %4519 = vmatpush1.bf16.msra.mxu0 %v5944_v23  ;;  %4551 = vmatpush1.bf16.msra.mxu1 %v5954_v26 }
 0x65f   :  { %4521 = vmatprep.subr.bf16.mxu0 %v5964_v29  ;;  %4553 = vmatprep.subr.bf16.mxu1 %v5973_v32 }
 0x662   :  { %4523 = vmatpush1.bf16.msra.mxu0 %v5985_v36  ;;  %4555 = vmatpush1.bf16.msra.mxu1 %v5995_v40 }
 0x663   :  { %4525 = vmatprep.subr.bf16.mxu0 %v6005_v44  ;;  %4557 = vmatprep.subr.bf16.mxu1 %v6014_v48 }
 0x666   :  { %4527 = vmatpush1.bf16.msra.mxu0 %v6026_v54  ;;  %4559 = vmatpush1.bf16.msra.mxu1 %v6036_v58 }
 0x667   :  { %4529 = vmatprep.subr.bf16.mxu0 %v6046_v62  ;;  %4561 = vmatprep.subr.bf16.mxu1 %v6055_v4 }
 0x66a   :  { %4531 = vmatpush1.bf16.msra.mxu0 %v6067_v9  ;;  %4563 = vmatpush1.bf16.msra.mxu1 %v6077_v14 }
 0x66b   :  { %4533 = vmatprep.subr.bf16.mxu0 %v6087_v18  ;;  %4565 = vmatprep.subr.bf16.mxu1 %v6096_v22 }
 0x66e   :  { %4535 = vmatpush1.bf16.msra.mxu0 %v6102_v25  ;;  %4567 = vmatpush1.bf16.msra.mxu1 %v6106_v27  ;;  %v3786_v27 = vld [vmem:[%s7354_s1 + $0x200] sm:$0xff] }
 0x66f   :  { %4569 = vmatprep.subr.bf16.mxu0 %v4568_v56  ;;  %4601 = vmatprep.subr.bf16.mxu1 %v4600_v63  ;;  %v4570_v45 = vpack.c.bf16 %v3790_v51, %v3786_v27  ;;  %v3809_v56 = vld [vmem:[%s7354_s1 + $0x2b8] sm:$0xff]  ;;  %v4606_v63 = vpack.c.bf16 %v3800_v28, %v3796_v5 }
 0x724   :  { %v1570_v2 = vpop.f32.mrb[12].mxu0  ;;  %v1641_v6 = vpop.f32.mrb[12].mxu1 }
 0x725   :  { %v5180_v10 = vadd.f32 %v1570_v2, %v6162_v35  ;;  %v1572_v13 = vpop.f32.mrb[13].mxu0  ;;  %v1643_v16 = vpop.f32.mrb[13].mxu1  ;;  %v5196_v36 = vadd.f32 %v1641_v6, %v6179_v0  ;;  %v3802_v2 = vld [vmem:[%s7354_s1 + $0x280] sm:$0xff] }
 0x726   :  { %v5181_v19 = vadd.f32 %v1572_v13, %v6166_v37  ;;  %v5197_v29 = vadd.f32 %v1643_v16, %v6173_v57  ;;  %v3806_v6 = vld [vmem:[%s7354_s1 + $0x2a0] sm:$0xff]  ;;  %v4608_v13 = vpack.c.bf16 %v3809_v56, %v3805_v53  ;;  %v3804_v16 = vld [vmem:[%s7354_s1 + $0x290] sm:$0xff]  ;;  %v3835_v53 = vld [vmem:[%s7354_s1 + $0x388] sm:$0xff] }
 0x727   :  { %v3780_v23 = vmul.f32 -1.442695, %v5180_v10  ;;  %v4576_v10 = vpack.c.bf16 %v3807_v50, %v3803_v47  ;;  %v3828_v47 = vld [vmem:[%s7354_s1 + $0x350] sm:$0xff]  ;;  %v3839_v56 = vld [vmem:[%s7354_s1 + $0x3a8] sm:$0xff] }
 0x728   :  { %v3781_v26 = vmul.f32 -1.442695, %v5181_v19  ;;  %v3782_v32 = vmul.f32 -1.442695, %v5197_v29  ;;  %v3808_v19 = vld [vmem:[%s7354_s1 + $0x2b0] sm:$0xff]  ;;  %v3813_v29 = vld [vmem:[%s7354_s1 + $0x2d8] sm:$0xff] }
 0x729   :  { %5395 = vpow2.f32 %v3780_v23  ;;  %v3811_v23 = vld [vmem:[%s7354_s1 + $0x2c8] sm:$0xff]  ;;  %v3832_v50 = vld [vmem:[%s7354_s1 + $0x370] sm:$0xff] }
 0x72a   :  { %5397 = vpow2.f32 %v3781_v26  ;;  %v3815_v26 = vld [vmem:[%s7354_s1 + $0x2e8] sm:$0xff] }
 0x72b   :  { %5399 = vpow2.f32 %v3782_v32  ;;  %v3817_v32 = vld [vmem:[%s7354_s1 + $0x2f8] sm:$0xff] }
 0x72c   :  { %5401 = vtanh.f32 %v5196_v36  ;;  %v4578_v36 = vpack.c.bf16 %v3806_v6, %v3802_v2  ;;  %v4622_v6 = vpack.c.bf16 %v3832_v50, %v3828_v47  ;;  %v3872_v47 = vld [vmem:[%s7355_s2 + $0x2a8] sm:$0xff]  ;;  %v3870_v50 = vld [vmem:[%s7355_s2 + $0x298] sm:$0xff] }
 0x733   :  { %v5396_v40 = vpop.eup %5395 }
 0x734   :  { %v5398_v44 = vpop.eup %5397  ;;  %v1653_v48 = vadd.f32 1.0, %v5396_v40  ;;  %v4610_v40 = vpack.c.bf16 %v3808_v19, %v3804_v16  ;;  %v4592_v16 = vpack.c.bf16 %v3839_v56, %v3835_v53  ;;  %v3874_v56 = vld [vmem:[%s7355_s2 + $0x2b8] sm:$0xff] }
 0x735   :  { %v1659_v54 = vadd.f32 1.0, %v5398_v44  ;;  %v5400_v58 = vpop.eup %5399  ;;  %v3810_v44 = vld [vmem:[%s7354_s1 + $0x2c0] sm:$0xff] }
 0x736   :  { %5403 = vrcp.f32 %v1653_v48  ;;  %v5402_v62 = vpop.eup %5401  ;;  %v1666_v18 = vadd.f32 1.0, %v5400_v58  ;;  %v3814_v48 = vld [vmem:[%s7354_s1 + $0x2e0] sm:$0xff]  ;;  %v4612_v58 = vpack.c.bf16 %v3817_v32, %v3813_v29  ;;  %v3843_v29 = vld [vmem:[%s7354_s1 + $0x3c8] sm:$0xff] }
 0x737   :  { %5405 = vrcp.f32 %v1659_v54  ;;  %v4580_v54 = vpack.c.bf16 %v3815_v26, %v3811_v23  ;;  %v4582_v27 = vpack.c.bf16 %v3814_v48, %v3810_v44  ;;  %v3836_v23 = vld [vmem:[%s7354_s1 + $0x390] sm:$0xff]  ;;  %v3847_v32 = vld [vmem:[%s7354_s1 + $0x3e8] sm:$0xff] }
 0x738   :  { %5407 = vrcp.f32 %v1666_v18  ;;  %v3821_v18 = vld [vmem:[%s7354_s1 + $0x318] sm:$0xff]  ;;  %v3840_v26 = vld [vmem:[%s7354_s1 + $0x3b0] sm:$0xff] }
 0x739   :  { %v4626_v48 = vpack.c.bf16 %v3840_v26, %v3836_v23  ;;  %v3880_v23 = vld [vmem:[%s7355_s2 + $0x2e8] sm:$0xff]  ;;  %v3878_v26 = vld [vmem:[%s7355_s2 + $0x2d8] sm:$0xff] }
 0x740   :  { %v5404_v4 = vpop.eup %5403 }
 0x741   :  { %v5406_v9 = vpop.eup %5405  ;;  %v1670_v14 = vmul.f32 %v5404_v4, %v5402_v62  ;;  %v3812_v62 = vld [vmem:[%s7354_s1 + $0x2d0] sm:$0xff] }
 0x742   :  { %v1669_v22 = vmul.f32 %v5406_v9, %v6412_v20  ;;  %v5408_v61 = vpop.eup %5407  ;;  %v4604_v20 = vpack.c.bf16 %v3801_v41, %v3797_v52  ;;  %v3816_v4 = vld [vmem:[%s7354_s1 + $0x2f0] sm:$0xff]  ;;  %v3819_v9 = vld [vmem:[%s7354_s1 + $0x308] sm:$0xff] }
 0x743   :  { %v4614_v51 = vpack.c.bf16 %v3816_v4, %v3812_v62  ;;  %v3820_v52 = vld [vmem:[%s7354_s1 + $0x310] sm:$0xff]  ;;  %v3846_v4 = vld [vmem:[%s7354_s1 + $0x3e0] sm:$0xff] }
 0x744   :  { %v6468_v25 = vadd.f32 %v1670_v14, %v1669_v22  ;;  %v3823_v14 = vld [vmem:[%s7354_s1 + $0x328] sm:$0xff]  ;;  %v3825_v22 = vld [vmem:[%s7354_s1 + $0x338] sm:$0xff]  ;;  %v3824_v41 = vld [vmem:[%s7354_s1 + $0x330] sm:$0xff] }
 0x745   :  { %v4584_v49 = vpack.c.bf16 %v3823_v14, %v3819_v9  ;;  %v4616_v38 = vpack.c.bf16 %v3825_v22, %v3821_v18  ;;  %v4618_v12 = vpack.c.bf16 %v3824_v41, %v3820_v52  ;;  %v3844_v9 = vld [vmem:[%s7354_s1 + $0x3d0] sm:$0xff]  ;;  %v3864_v52 = vld [vmem:[%s7355_s2 + $0x268] sm:$0xff]  ;;  %v3862_v41 = vld [vmem:[%s7355_s2 + $0x258] sm:$0xff] }
 0x746   :  { %5409 = vtanh.f32 %v6468_v25  ;;  %v3848_v14 = vld [vmem:[%s7354_s1 + $0x3f0] sm:$0xff] }
 0x747   :  { %v4630_v22 = vpack.c.bf16 %v3848_v14, %v3844_v9  ;;  %v3888_v9 = vld [vmem:[%s7355_s2 + $0x328] sm:$0xff]  ;;  %v3886_v14 = vld [vmem:[%s7355_s2 + $0x318] sm:$0xff] }
 0x750   :  { %v5410_v33 = vpop.eup %5409 }
 0x751   :  { %v6501_v55 = vmul.f32 %v5410_v33, %v5408_v61  ;;  %v3827_v61 = vld [vmem:[%s7354_s1 + $0x348] sm:$0xff] }
 0x752   :  { %v3831_v33 = vld [vmem:[%s7354_s1 + $0x368] sm:$0xff] }
 0x753   :  { %1746 = vmatmul.mubr.f32.vlgmr.msra.gmra.mrb[14].mxu0 %v6501_v55  ;;  %1817 = vmatmul.mubr.f32.vlgmr.msra.gmra.mrb[14].mxu1 %v6501_v55  ;;  %v4588_v5 = vpack.c.bf16 %v3831_v33, %v3827_v61  ;;  %v3866_v33 = vld [vmem:[%s7355_s2 + $0x278] sm:$0xff] }
 0x754   :  { %4571 = vmatpush1.bf16.msra.mxu0 %v4570_v45  ;;  %4603 = vmatpush1.bf16.msra.mxu1 %v4602_v7  ;;  %v3829_v45 = vld [vmem:[%s7354_s1 + $0x358] sm:$0xff] }
 0x755   :  { %4573 = vmatprep.subr.bf16.mxu0 %v4572_v21  ;;  %4605 = vmatprep.subr.bf16.mxu1 %v4604_v20  ;;  %v3833_v7 = vld [vmem:[%s7354_s1 + $0x378] sm:$0xff]  ;;  %v3826_v21 = vld [vmem:[%s7354_s1 + $0x340] sm:$0xff] }
 0x756   :  { %2013 = vmatprep.mubr.f32.mxu0 %v5555_v3  ;;  %2126 = vmatprep.mubr.f32.mxu1 %v5555_v3  ;;  %v3830_v20 = vld [vmem:[%s7354_s1 + $0x360] sm:$0xff]  ;;  %v4620_v28 = vpack.c.bf16 %v3833_v7, %v3829_v45 }
 0x757   :  { %v4590_v2 = vpack.c.bf16 %v3830_v20, %v3826_v21  ;;  %v3859_v45 = vld [vmem:[%s7355_s2 + $0x240] sm:$0xff]  ;;  %v3861_v21 = vld [vmem:[%s7355_s2 + $0x250] sm:$0xff] }
 0x758   :  { %4575 = vmatpush1.bf16.msra.mxu0 %v4574_v60  ;;  %4607 = vmatpush1.bf16.msra.mxu1 %v4606_v63  ;;  %v3837_v60 = vld [vmem:[%s7354_s1 + $0x398] sm:$0xff]  ;;  %v3863_v7 = vld [vmem:[%s7355_s2 + $0x260] sm:$0xff]  ;;  %v3865_v20 = vld [vmem:[%s7355_s2 + $0x270] sm:$0xff] }
 0x759   :  { %4577 = vmatprep.subr.bf16.mxu0 %v4576_v10  ;;  %4609 = vmatprep.subr.bf16.mxu1 %v4608_v13  ;;  %v3841_v63 = vld [vmem:[%s7354_s1 + $0x3b8] sm:$0xff]  ;;  %v3834_v10 = vld [vmem:[%s7354_s1 + $0x380] sm:$0xff] }
 0x75a   :  { %v3838_v13 = vld [vmem:[%s7354_s1 + $0x3a0] sm:$0xff]  ;;  %v4624_v19 = vpack.c.bf16 %v3841_v63, %v3837_v60 }
 0x75b   :  { %v4594_v44 = vpack.c.bf16 %v3838_v13, %v3834_v10  ;;  %v3867_v60 = vld [vmem:[%s7355_s2 + $0x280] sm:$0xff]  ;;  %v3869_v10 = vld [vmem:[%s7355_s2 + $0x290] sm:$0xff] }
 0x75c   :  { %4579 = vmatpush1.bf16.msra.mxu0 %v4578_v36  ;;  %4611 = vmatpush1.bf16.msra.mxu1 %v4610_v40  ;;  %v3845_v36 = vld [vmem:[%s7354_s1 + $0x3d8] sm:$0xff]  ;;  %v3871_v63 = vld [vmem:[%s7355_s2 + $0x2a0] sm:$0xff]  ;;  %v3873_v13 = vld [vmem:[%s7355_s2 + $0x2b0] sm:$0xff] }
 0x75d   :  { %4581 = vmatprep.subr.bf16.mxu0 %v4580_v54  ;;  %4613 = vmatprep.subr.bf16.mxu1 %v4612_v58  ;;  %v3849_v40 = vld [vmem:[%s7354_s1 + $0x3f8] sm:$0xff]  ;;  %v3842_v54 = vld [vmem:[%s7354_s1 + $0x3c0] sm:$0xff]  ;;  %v4596_v58 = vpack.c.bf16 %v3847_v32, %v3843_v29 }
 0x75e   :  { %v4628_v62 = vpack.c.bf16 %v3849_v40, %v3845_v36  ;;  %v4598_v18 = vpack.c.bf16 %v3846_v4, %v3842_v54  ;;  %v3882_v32 = vld [vmem:[%s7355_s2 + $0x2f8] sm:$0xff]  ;;  %v3875_v36 = vld [vmem:[%s7355_s2 + $0x2c0] sm:$0xff]  ;;  %v3877_v54 = vld [vmem:[%s7355_s2 + $0x2d0] sm:$0xff] }
 0x75f   :  { %v3879_v40 = vld [vmem:[%s7355_s2 + $0x2e0] sm:$0xff] }
 0x760   :  { %4583 = vmatpush1.bf16.msra.mxu0 %v4582_v27  ;;  %4615 = vmatpush1.bf16.msra.mxu1 %v4614_v51 }
 0x761   :  { %4585 = vmatprep.subr.bf16.mxu0 %v4584_v49  ;;  %4617 = vmatprep.subr.bf16.mxu1 %v4616_v38  ;;  %v6716_v49 = vpack.c.bf16 %v3857_v11, %v3853_v39  ;;  %v3860_v38 = vld [vmem:[%s7355_s2 + $0x248] sm:$0xff] }
 0x762   :  { %v6730_v61 = vpack.c.bf16 %v3864_v52, %v3860_v38  ;;  %v3892_v39 = vld [vmem:[%s7355_s2 + $0x348] sm:$0xff] }
 0x763   :  { %v3896_v11 = vld [vmem:[%s7355_s2 + $0x368] sm:$0xff] }
 0x764   :  { %4587 = vmatpush1.bf16.msra.mxu0 %v4586_v24  ;;  %4619 = vmatpush1.bf16.msra.mxu1 %v4618_v12  ;;  %v6741_v24 = vpack.c.bf16 %v3866_v33, %v3862_v41  ;;  %v6743_v12 = vpack.c.bf16 %v3863_v7, %v3859_v45  ;;  %v6869_v52 = vpack.c.bf16 %v3896_v11, %v3892_v39  ;;  %v3894_v41 = vld [vmem:[%s7355_s2 + $0x358] sm:$0xff]  ;;  %v3891_v45 = vld [vmem:[%s7355_s2 + $0x340] sm:$0xff]  ;;  %v3909_v39 = vld [vmem:[%s7355_s2 + $0x3d0] sm:$0xff] }
 0x765   :  { %4589 = vmatprep.subr.bf16.mxu0 %v4588_v5  ;;  %4621 = vmatprep.subr.bf16.mxu1 %v4620_v28  ;;  %v6752_v5 = vpack.c.bf16 %v3865_v20, %v3861_v21  ;;  %v3868_v28 = vld [vmem:[%s7355_s2 + $0x288] sm:$0xff]  ;;  %v3898_v33 = vld [vmem:[%s7355_s2 + $0x378] sm:$0xff]  ;;  %v3895_v21 = vld [vmem:[%s7355_s2 + $0x360] sm:$0xff] }
 0x766   :  { %v6766_v53 = vpack.c.bf16 %v3872_v47, %v3868_v28  ;;  %v6880_v7 = vpack.c.bf16 %v3898_v33, %v3894_v41  ;;  %v3893_v20 = vld [vmem:[%s7355_s2 + $0x350] sm:$0xff]  ;;  %v6892_v47 = vpack.c.bf16 %v3895_v21, %v3891_v45 }
 0x767   :  { %v3897_v28 = vld [vmem:[%s7355_s2 + $0x370] sm:$0xff] }
 0x768   :  { %4591 = vmatpush1.bf16.msra.mxu0 %v4590_v2  ;;  %4623 = vmatpush1.bf16.msra.mxu1 %v4622_v6  ;;  %v6777_v2 = vpack.c.bf16 %v3874_v56, %v3870_v50  ;;  %v6779_v6 = vpack.c.bf16 %v3871_v63, %v3867_v60  ;;  %v3900_v50 = vld [vmem:[%s7355_s2 + $0x388] sm:$0xff]  ;;  %v3902_v60 = vld [vmem:[%s7355_s2 + $0x398] sm:$0xff]  ;;  %v6905_v63 = vpack.c.bf16 %v3897_v28, %v3893_v20  ;;  %v3913_v11 = vld [vmem:[%s7355_s2 + $0x3f0] sm:$0xff] }
 0x769   :  { %4593 = vmatprep.subr.bf16.mxu0 %v4592_v16  ;;  %4625 = vmatprep.subr.bf16.mxu1 %v4624_v19  ;;  %v6788_v16 = vpack.c.bf16 %v3873_v13, %v3869_v10  ;;  %v3876_v19 = vld [vmem:[%s7355_s2 + $0x2c8] sm:$0xff]  ;;  %v3906_v13 = vld [vmem:[%s7355_s2 + $0x3b8] sm:$0xff]  ;;  %v6968_v41 = vpack.c.bf16 %v3913_v11, %v3909_v39 }
 0x76a   :  { %v6802_v29 = vpack.c.bf16 %v3880_v23, %v3876_v19  ;;  %v3904_v56 = vld [vmem:[%s7355_s2 + $0x3a8] sm:$0xff]  ;;  %v3899_v19 = vld [vmem:[%s7355_s2 + $0x380] sm:$0xff] }
 0x76b   :  { %v6907_v10 = vpack.c.bf16 %v3904_v56, %v3900_v50  ;;  %v3903_v23 = vld [vmem:[%s7355_s2 + $0x3a0] sm:$0xff] }
 0x76c   :  { %4595 = vmatpush1.bf16.msra.mxu0 %v4594_v44  ;;  %4627 = vmatpush1.bf16.msra.mxu1 %v4626_v48  ;;  %v6813_v44 = vpack.c.bf16 %v3882_v32, %v3878_v26  ;;  %v6815_v48 = vpack.c.bf16 %v3879_v40, %v3875_v36  ;;  %v6919_v26 = vpack.c.bf16 %v3906_v13, %v3902_v60  ;;  %v3901_v32 = vld [vmem:[%s7355_s2 + $0x390] sm:$0xff] }
 0x76d   :  { %4597 = vmatprep.subr.bf16.mxu0 %v4596_v58  ;;  %4629 = vmatprep.subr.bf16.mxu1 %v4628_v62  ;;  %v3881_v58 = vld [vmem:[%s7355_s2 + $0x2f0] sm:$0xff]  ;;  %v3884_v62 = vld [vmem:[%s7355_s2 + $0x308] sm:$0xff]  ;;  %v6928_v40 = vpack.c.bf16 %v3903_v23, %v3899_v19 }
 0x76e   :  { %v6827_v4 = vpack.c.bf16 %v3881_v58, %v3877_v54  ;;  %v3905_v36 = vld [vmem:[%s7355_s2 + $0x3b0] sm:$0xff]  ;;  %v3908_v58 = vld [vmem:[%s7355_s2 + $0x3c8] sm:$0xff] }
 0x76f   :  { %v6932_v54 = vpack.c.bf16 %v3905_v36, %v3901_v32 }
 0x770   :  { %4599 = vmatpush1.bf16.msra.mxu0 %v4598_v18  ;;  %4631 = vmatpush1.bf16.msra.mxu1 %v4630_v22  ;;  %v3890_v18 = vld [vmem:[%s7355_s2 + $0x338] sm:$0xff]  ;;  %v6840_v22 = vpack.c.bf16 %v3888_v9, %v3884_v62  ;;  %v3912_v62 = vld [vmem:[%s7355_s2 + $0x3e8] sm:$0xff] }
 0x771   :  { %v3910_v9 = vld [vmem:[%s7355_s2 + $0x3d8] sm:$0xff] }
 0x773   :  { %2014 = vmatmul.mubr.f32.vlgmr.msra.gmra.mrb[16].mxu0 %v6185_v46  ;;  %2127 = vmatmul.mubr.f32.vlgmr.msra.gmra.mrb[16].mxu1 %v6185_v46  ;;  %v3852_v46 = vld [vmem:[%s7355_s2 + $0x208] sm:$0xff] }
 0x774   :  { %2019 = vmatprep.mubr.f32.mxu0 %v5555_v3  ;;  %2132 = vmatprep.mubr.f32.mxu1 %v5555_v3 }
 0x777   :  { %2020 = vmatmul.mubr.f32.gmra.mrb[18].mxu0 %v6231_v1  ;;  %2133 = vmatmul.mubr.f32.gmra.mrb[18].mxu1 %v6231_v1  ;;  %v3856_v1 = vld [vmem:[%s7355_s2 + $0x228] sm:$0xff] }
 0x778   :  { %2025 = vmatprep.mubr.f32.mxu0 %v5555_v3  ;;  %2138 = vmatprep.mubr.f32.mxu1 %v5555_v3 }
 0x77b   :  { %2026 = vmatmul.mubr.f32.gmra.mrb[20].mxu0 %v6277_v15  ;;  %2139 = vmatmul.mubr.f32.gmra.mrb[20].mxu1 %v6277_v15  ;;  %v3854_v15 = vld [vmem:[%s7355_s2 + $0x218] sm:$0xff] }
 0x77c   :  { %2031 = vmatprep.mubr.f32.mxu0 %v5555_v3  ;;  %2144 = vmatprep.mubr.f32.mxu1 %v5555_v3 }
 0x77f   :  { %2032 = vmatmul.mubr.f32.gmra.mrb[22].mxu0 %v6323_v43  ;;  %2145 = vmatmul.mubr.f32.gmra.mrb[22].mxu1 %v6323_v43  ;;  %v6694_v43 = vpack.c.bf16 %v3856_v1, %v3852_v46  ;;  %v6842_v46 = vpack.c.bf16 %v3890_v18, %v3886_v14  ;;  %v3883_v1 = vld [vmem:[%s7355_s2 + $0x300] sm:$0xff]  ;;  %v6946_v14 = vpack.c.bf16 %v3912_v62, %v3908_v58  ;;  %v3914_v18 = vld [vmem:[%s7355_s2 + $0x3f8] sm:$0xff] }
 0x780   :  { %2037 = vmatprep.mubr.f32.mxu0 %v5555_v3  ;;  %2150 = vmatprep.mubr.f32.mxu1 %v5555_v3 }
 0x781   :  { %4633 = vmatprep.subr.bf16.mxu0 %v6694_v43 }
 0x783   :  { %2038 = vmatmul.mubr.f32.gmra.mrb[24].mxu0 %v6369_v8  ;;  %2151 = vmatmul.mubr.f32.gmra.mrb[24].mxu1 %v6369_v8  ;;  %v3858_v8 = vld [vmem:[%s7355_s2 + $0x238] sm:$0xff] }
 0x784   :  { %2043 = vmatprep.mubr.f32.mxu0 %v5555_v3  ;;  %2156 = vmatprep.mubr.f32.mxu1 %v5555_v3  ;;  %v6705_v27 = vpack.c.bf16 %v3858_v8, %v3854_v15  ;;  %v3887_v15 = vld [vmem:[%s7355_s2 + $0x320] sm:$0xff]  ;;  %v3885_v8 = vld [vmem:[%s7355_s2 + $0x310] sm:$0xff] }
 0x786   :  { %4665 = vmatprep.subr.bf16.mxu1 %v6705_v27 }
 0x787   :  { %2044 = vmatmul.mubr.f32.gmra.mrb[26].mxu0 %v6415_v17  ;;  %2157 = vmatmul.mubr.f32.gmra.mrb[26].mxu1 %v6415_v17  ;;  %v3851_v17 = vld [vmem:[%s7355_s2 + $0x200] sm:$0xff] }
 0x788   :  { %2049 = vmatprep.mubr.f32.mxu0 %v5555_v3  ;;  %2162 = vmatprep.mubr.f32.mxu1 %v5555_v3 }
 0x789   :  { %4667 = vmatpush1.bf16.msra.mxu1 %v6716_v49 }
 0x78a   :  { %4669 = vmatprep.subr.bf16.mxu1 %v6741_v24 }
 0x78b   :  { %2050 = vmatmul.mubr.f32.gmra.mrb[28].mxu0 %v6501_v55  ;;  %2163 = vmatmul.mubr.f32.gmra.mrb[28].mxu1 %v6501_v55  ;;  %v3855_v55 = vld [vmem:[%s7355_s2 + $0x220] sm:$0xff] }
 0x78c   :  { %2055 = vmatprep.mubr.f32.mxu0 %v5555_v3  ;;  %2168 = vmatprep.mubr.f32.mxu1 %v5555_v3  ;;  %v6707_v51 = vpack.c.bf16 %v3855_v55, %v3851_v17  ;;  %v6854_v17 = vpack.c.bf16 %v3887_v15, %v3883_v1  ;;  %v3889_v55 = vld [vmem:[%s7355_s2 + $0x330] sm:$0xff]  ;;  %v3907_v1 = vld [vmem:[%s7355_s2 + $0x3c0] sm:$0xff] }
 0x78d   :  { %4671 = vmatpush1.bf16.msra.mxu1 %v6752_v5  ;;  %v6867_v38 = vpack.c.bf16 %v3889_v55, %v3885_v8  ;;  %v3911_v15 = vld [vmem:[%s7355_s2 + $0x3e0] sm:$0xff]  ;;  %v6957_v8 = vpack.c.bf16 %v3914_v18, %v3910_v9 }
 0x78e   :  { %4635 = vmatpush1.bf16.msra.mxu0 %v6707_v51  ;;  %4673 = vmatprep.subr.bf16.mxu1 %v6777_v2  ;;  %v6959_v55 = vpack.c.bf16 %v3911_v15, %v3907_v1 }
 0x78f   :  { %4637 = vmatprep.subr.bf16.mxu0 %v6730_v61 }
 0x791   :  { %4675 = vmatpush1.bf16.msra.mxu1 %v6788_v16 }
 0x792   :  { %4639 = vmatpush1.bf16.msra.mxu0 %v6743_v12  ;;  %4677 = vmatprep.subr.bf16.mxu1 %v6813_v44 }
 0x793   :  { %4641 = vmatprep.subr.bf16.mxu0 %v6766_v53 }
 0x795   :  { %4679 = vmatpush1.bf16.msra.mxu1 %v6827_v4 }
 0x796   :  { %4643 = vmatpush1.bf16.msra.mxu0 %v6779_v6  ;;  %4681 = vmatprep.subr.bf16.mxu1 %v6842_v46 }
 0x797   :  { %4645 = vmatprep.subr.bf16.mxu0 %v6802_v29 }
 0x799   :  { %4683 = vmatpush1.bf16.msra.mxu1 %v6867_v38 }
 0x79a   :  { %4647 = vmatpush1.bf16.msra.mxu0 %v6815_v48  ;;  %4685 = vmatprep.subr.bf16.mxu1 %v6880_v7 }
 0x79b   :  { %4649 = vmatprep.subr.bf16.mxu0 %v6840_v22 }
 0x79d   :  { %4687 = vmatpush1.bf16.msra.mxu1 %v6905_v63 }
 0x79e   :  { %4651 = vmatpush1.bf16.msra.mxu0 %v6854_v17  ;;  %4689 = vmatprep.subr.bf16.mxu1 %v6919_v26 }
 0x79f   :  { %4653 = vmatprep.subr.bf16.mxu0 %v6869_v52 }
 0x7a1   :  { %4691 = vmatpush1.bf16.msra.mxu1 %v6932_v54 }
 0x7a2   :  { %4655 = vmatpush1.bf16.msra.mxu0 %v6892_v47  ;;  %4693 = vmatprep.subr.bf16.mxu1 %v6957_v8 }
 0x7a3   :  { %4657 = vmatprep.subr.bf16.mxu0 %v6907_v10 }
 0x7a5   :  { %4695 = vmatpush1.bf16.msra.mxu1 %v6968_v41 }
 0x7a6   :  { %4659 = vmatpush1.bf16.msra.mxu0 %v6928_v40  ;;  %4729 = vmatprep.subr.bf16.mxu1 %v6705_v27 }
 0x7a7   :  { %4661 = vmatprep.subr.bf16.mxu0 %v6946_v14 }
 0x7aa   :  { %4663 = vmatpush1.bf16.msra.mxu0 %v6959_v55 }
 0x7ab   :  { %4697 = vmatprep.subr.bf16.mxu0 %v6694_v43 }
 0x826   :  { %v1747_v33 = vpop.f32.mrb[14].mxu0  ;;  %v1818_v45 = vpop.f32.mrb[14].mxu1 }
 0x827   :  { %v5182_v21 = vadd.f32 %v1747_v33, %v6162_v35  ;;  %v1749_v20 = vpop.f32.mrb[15].mxu0  ;;  %v1820_v28 = vpop.f32.mrb[15].mxu1  ;;  %v5198_v23 = vadd.f32 %v1818_v45, %v6179_v0 }
 0x828   :  { %v5183_v50 = vadd.f32 %v1749_v20, %v6166_v37  ;;  %v5199_v13 = vadd.f32 %v1820_v28, %v6173_v57 }
 0x829   :  { %v3783_v56 = vmul.f32 -1.442695, %v5182_v21 }
 0x82a   :  { %v3784_v60 = vmul.f32 -1.442695, %v5183_v50  ;;  %v3785_v19 = vmul.f32 -1.442695, %v5199_v13 }
 0x82b   :  { %5411 = vpow2.f32 %v3783_v56 }
 0x82c   :  { %5413 = vpow2.f32 %v3784_v60 }
 0x82d   :  { %5415 = vpow2.f32 %v3785_v19 }
 0x82e   :  { %5417 = vtanh.f32 %v5198_v23 }
 0x835   :  { %v5412_v32 = vpop.eup %5411 }
 0x836   :  { %v5414_v36 = vpop.eup %5413  ;;  %v1830_v58 = vadd.f32 1.0, %v5412_v32 }
 0x837   :  { %v1836_v62 = vadd.f32 1.0, %v5414_v36  ;;  %v5416_v35 = vpop.eup %5415 }
 0x838   :  { %5419 = vrcp.f32 %v1830_v58  ;;  %v5418_v9 = vpop.eup %5417  ;;  %v1843_v15 = vadd.f32 1.0, %v5416_v35 }
 0x839   :  { %5421 = vrcp.f32 %v1836_v62 }
 0x83a   :  { %5423 = vrcp.f32 %v1843_v15 }
 0x842   :  { %v5420_v37 = vpop.eup %5419 }
 0x843   :  { %v5422_v18 = vpop.eup %5421  ;;  %v1847_v1 = vmul.f32 %v5420_v37, %v5418_v9 }
 0x844   :  { %v1846_v39 = vmul.f32 %v5422_v18, %v6468_v25  ;;  %v5424_v0 = vpop.eup %5423  ;;  %v3850_v25 = vld [vmem:[%s7357_s3 + $0x4] sm:$0xf] }
 0x845   :  { %v7023_v45 = vrot.slane %v3850_v25, %v99_v31  ;;  %v7027_v21 = vrot.slane %v3850_v25, %v103_v34  ;;  %v7033_v32 = vrot.slane %v3850_v25, %v111_v42  ;;  %v7038_v34 = vrot.slane %v3850_v25, %v107_v59 }
 0x846   :  { %v1848_v57 = vadd.f32 %v1847_v1, %v1846_v39 }
 0x848   :  { %5425 = vtanh.f32 %v1848_v57 }
 0x852   :  { %v5426_v11 = vpop.eup %5425 }
 0x853   :  { %v1850_v33 = vmul.f32 %v5426_v11, %v5424_v0 }
 0x855   :  { %2056 = vmatmul.mubr.f32.gmra.mrb[30].mxu0 %v1850_v33  ;;  %2169 = vmatmul.mubr.f32.gmra.mrb[30].mxu1 %v1850_v33 }
 0x856   :  { %2340 = vmatprep.mubr.f32.mxu0 %v5555_v3  ;;  %2411 = vmatprep.mubr.f32.mxu1 %v5555_v3 }
 0x859   :  { %2341 = vmatmul.mubr.f32.vlgmr.msra.gmra.mrb[16].mxu0 %v5555_v3  ;;  %2412 = vmatmul.mubr.f32.vlgmr.msra.gmra.mrb[16].mxu1 %v5555_v3 }
 0x85a   :  { %4699 = vmatpush1.bf16.msra.mxu0 %v6707_v51  ;;  %4731 = vmatpush1.bf16.msra.mxu1 %v6716_v49 }
 0x85b   :  { %4701 = vmatprep.subr.bf16.mxu0 %v6730_v61  ;;  %4733 = vmatprep.subr.bf16.mxu1 %v6741_v24 }
 0x85c   :  { %2514 = vmatprep.mubr.f32.mxu0 %v5555_v3  ;;  %2585 = vmatprep.mubr.f32.mxu1 %v5555_v3 }
 0x85e   :  { %4703 = vmatpush1.bf16.msra.mxu0 %v6743_v12  ;;  %4735 = vmatpush1.bf16.msra.mxu1 %v6752_v5 }
 0x85f   :  { %4705 = vmatprep.subr.bf16.mxu0 %v6766_v53  ;;  %4737 = vmatprep.subr.bf16.mxu1 %v6777_v2 }
 0x862   :  { %4707 = vmatpush1.bf16.msra.mxu0 %v6779_v6  ;;  %4739 = vmatpush1.bf16.msra.mxu1 %v6788_v16 }
 0x863   :  { %4709 = vmatprep.subr.bf16.mxu0 %v6802_v29  ;;  %4741 = vmatprep.subr.bf16.mxu1 %v6813_v44 }
 0x866   :  { %4711 = vmatpush1.bf16.msra.mxu0 %v6815_v48  ;;  %4743 = vmatpush1.bf16.msra.mxu1 %v6827_v4 }
 0x867   :  { %4713 = vmatprep.subr.bf16.mxu0 %v6840_v22  ;;  %4745 = vmatprep.subr.bf16.mxu1 %v6842_v46 }
 0x86a   :  { %4715 = vmatpush1.bf16.msra.mxu0 %v6854_v17  ;;  %4747 = vmatpush1.bf16.msra.mxu1 %v6867_v38 }
 0x86b   :  { %4717 = vmatprep.subr.bf16.mxu0 %v6869_v52  ;;  %4749 = vmatprep.subr.bf16.mxu1 %v6880_v7 }
 0x86e   :  { %4719 = vmatpush1.bf16.msra.mxu0 %v6892_v47  ;;  %4751 = vmatpush1.bf16.msra.mxu1 %v6905_v63 }
 0x86f   :  { %4721 = vmatprep.subr.bf16.mxu0 %v6907_v10  ;;  %4753 = vmatprep.subr.bf16.mxu1 %v6919_v26 }
 0x872   :  { %4723 = vmatpush1.bf16.msra.mxu0 %v6928_v40  ;;  %4755 = vmatpush1.bf16.msra.mxu1 %v6932_v54 }
 0x873   :  { %4725 = vmatprep.subr.bf16.mxu0 %v6946_v14  ;;  %4757 = vmatprep.subr.bf16.mxu1 %v6957_v8 }
 0x876   :  { %4727 = vmatpush1.bf16.msra.mxu0 %v6959_v55  ;;  %4759 = vmatpush1.bf16.msra.mxu1 %v6968_v41 }
 0x877   :  { %4761 = vmatprep.subr.bf16.mxu0 %v6694_v43  ;;  %4793 = vmatprep.subr.bf16.mxu1 %v6705_v27 }
 0x92c   :  { %v2342_v20 = vpop.f32.mrb[16].mxu0  ;;  %v2413_v28 = vpop.f32.mrb[16].mxu1 }
 0x92d   :  { %v5200_v50 = vadd.f32 %v2342_v20, %v7023_v45  ;;  %v2344_v56 = vpop.f32.mrb[17].mxu0  ;;  %v2415_v60 = vpop.f32.mrb[17].mxu1  ;;  %v5216_v58 = vadd.f32 %v2413_v28, %v7038_v34 }
 0x92e   :  { %v5201_v13 = vadd.f32 %v2344_v56, %v7027_v21  ;;  %v5217_v31 = vadd.f32 %v2415_v60, %v7033_v32 }
 0x92f   :  { %v3915_v19 = vmul.f32 -1.442695, %v5200_v50 }
 0x930   :  { %v3916_v23 = vmul.f32 -1.442695, %v5201_v13  ;;  %v3917_v36 = vmul.f32 -1.442695, %v5217_v31 }
 0x931   :  { %5427 = vpow2.f32 %v3915_v19 }
 0x932   :  { %5429 = vpow2.f32 %v3916_v23 }
 0x933   :  { %5431 = vpow2.f32 %v3917_v36 }
 0x934   :  { %5433 = vtanh.f32 %v5216_v58 }
 0x93b   :  { %v5428_v62 = vpop.eup %5427 }
 0x93c   :  { %v5430_v35 = vpop.eup %5429  ;;  %v2425_v9 = vadd.f32 1.0, %v5428_v62 }
 0x93d   :  { %v2431_v37 = vadd.f32 1.0, %v5430_v35  ;;  %v5432_v42 = vpop.eup %5431 }
 0x93e   :  { %5435 = vrcp.f32 %v2425_v9  ;;  %v5434_v18 = vpop.eup %5433  ;;  %v2438_v57 = vadd.f32 1.0, %v5432_v42 }
 0x93f   :  { %5437 = vrcp.f32 %v2431_v37 }
 0x940   :  { %5439 = vrcp.f32 %v2438_v57 }
 0x948   :  { %v5436_v1 = vpop.eup %5435 }
 0x949   :  { %v5438_v15 = vpop.eup %5437  ;;  %v2442_v39 = vmul.f32 %v5436_v1, %v5434_v18 }
 0x94a   :  { %v2441_v30 = vmul.f32 0.0, %v5438_v15  ;;  %v5440_v0 = vpop.eup %5439 }
 0x94c   :  { %v7041_v59 = vadd.f32 %v2442_v39, %v2441_v30 }
 0x94e   :  { %5441 = vtanh.f32 %v7041_v59 }
 0x958   :  { %v5442_v11 = vpop.eup %5441 }
 0x959   :  { %v2445_v33 = vmul.f32 %v5442_v11, %v5440_v0 }
 0x95b   :  { %2515 = vmatmul.mubr.f32.vlgmr.msra.gmra.mrb[18].mxu0 %v2445_v33  ;;  %2586 = vmatmul.mubr.f32.vlgmr.msra.gmra.mrb[18].mxu1 %v2445_v33 }
 0x95c   :  { %4763 = vmatpush1.bf16.msra.mxu0 %v6707_v51  ;;  %4795 = vmatpush1.bf16.msra.mxu1 %v6716_v49 }
 0x95d   :  { %4765 = vmatprep.subr.bf16.mxu0 %v6730_v61  ;;  %4797 = vmatprep.subr.bf16.mxu1 %v6741_v24 }
 0x95e   :  { %2688 = vmatprep.mubr.f32.mxu0 %v5555_v3  ;;  %2759 = vmatprep.mubr.f32.mxu1 %v5555_v3 }
 0x960   :  { %4767 = vmatpush1.bf16.msra.mxu0 %v6743_v12  ;;  %4799 = vmatpush1.bf16.msra.mxu1 %v6752_v5 }
 0x961   :  { %4769 = vmatprep.subr.bf16.mxu0 %v6766_v53  ;;  %4801 = vmatprep.subr.bf16.mxu1 %v6777_v2 }
 0x964   :  { %4771 = vmatpush1.bf16.msra.mxu0 %v6779_v6  ;;  %4803 = vmatpush1.bf16.msra.mxu1 %v6788_v16 }
 0x965   :  { %4773 = vmatprep.subr.bf16.mxu0 %v6802_v29  ;;  %4805 = vmatprep.subr.bf16.mxu1 %v6813_v44 }
 0x968   :  { %4775 = vmatpush1.bf16.msra.mxu0 %v6815_v48  ;;  %4807 = vmatpush1.bf16.msra.mxu1 %v6827_v4 }
 0x969   :  { %4777 = vmatprep.subr.bf16.mxu0 %v6840_v22  ;;  %4809 = vmatprep.subr.bf16.mxu1 %v6842_v46 }
 0x96c   :  { %4779 = vmatpush1.bf16.msra.mxu0 %v6854_v17  ;;  %4811 = vmatpush1.bf16.msra.mxu1 %v6867_v38 }
 0x96d   :  { %4781 = vmatprep.subr.bf16.mxu0 %v6869_v52  ;;  %4813 = vmatprep.subr.bf16.mxu1 %v6880_v7 }
 0x970   :  { %4783 = vmatpush1.bf16.msra.mxu0 %v6892_v47  ;;  %4815 = vmatpush1.bf16.msra.mxu1 %v6905_v63 }
 0x971   :  { %4785 = vmatprep.subr.bf16.mxu0 %v6907_v10  ;;  %4817 = vmatprep.subr.bf16.mxu1 %v6919_v26 }
 0x974   :  { %4787 = vmatpush1.bf16.msra.mxu0 %v6928_v40  ;;  %4819 = vmatpush1.bf16.msra.mxu1 %v6932_v54 }
 0x975   :  { %4789 = vmatprep.subr.bf16.mxu0 %v6946_v14  ;;  %4821 = vmatprep.subr.bf16.mxu1 %v6957_v8 }
 0x978   :  { %4791 = vmatpush1.bf16.msra.mxu0 %v6959_v55  ;;  %4823 = vmatpush1.bf16.msra.mxu1 %v6968_v41 }
 0x979   :  { %4825 = vmatprep.subr.bf16.mxu0 %v6694_v43  ;;  %4857 = vmatprep.subr.bf16.mxu1 %v6705_v27 }
 0xa2e   :  { %v2516_v25 = vpop.f32.mrb[18].mxu0  ;;  %v2587_v20 = vpop.f32.mrb[18].mxu1 }
 0xa2f   :  { %v5202_v28 = vadd.f32 %v2516_v25, %v7023_v45  ;;  %v2518_v50 = vpop.f32.mrb[19].mxu0  ;;  %v2589_v56 = vpop.f32.mrb[19].mxu1  ;;  %v5218_v36 = vadd.f32 %v2587_v20, %v7038_v34 }
 0xa30   :  { %v5203_v60 = vadd.f32 %v2518_v50, %v7027_v21  ;;  %v5219_v23 = vadd.f32 %v2589_v56, %v7033_v32 }
 0xa31   :  { %v3918_v13 = vmul.f32 -1.442695, %v5202_v28 }
 0xa32   :  { %v3919_v19 = vmul.f32 -1.442695, %v5203_v60  ;;  %v3920_v31 = vmul.f32 -1.442695, %v5219_v23 }
 0xa33   :  { %5443 = vpow2.f32 %v3918_v13 }
 0xa34   :  { %5445 = vpow2.f32 %v3919_v19 }
 0xa35   :  { %5447 = vpow2.f32 %v3920_v31 }
 0xa36   :  { %5449 = vtanh.f32 %v5218_v36 }
 0xa3d   :  { %v5444_v58 = vpop.eup %5443 }
 0xa3e   :  { %v5446_v62 = vpop.eup %5445  ;;  %v2599_v35 = vadd.f32 1.0, %v5444_v58 }
 0xa3f   :  { %v2605_v9 = vadd.f32 1.0, %v5446_v62  ;;  %v5448_v37 = vpop.eup %5447 }
 0xa40   :  { %5451 = vrcp.f32 %v2599_v35  ;;  %v5450_v42 = vpop.eup %5449  ;;  %v2612_v39 = vadd.f32 1.0, %v5448_v37 }
 0xa41   :  { %5453 = vrcp.f32 %v2605_v9 }
 0xa42   :  { %5455 = vrcp.f32 %v2612_v39 }
 0xa4a   :  { %v5452_v18 = vpop.eup %5451 }
 0xa4b   :  { %v5454_v1 = vpop.eup %5453  ;;  %v2616_v15 = vmul.f32 %v5452_v18, %v5450_v42 }
 0xa4c   :  { %v2615_v57 = vmul.f32 %v5454_v1, %v7041_v59  ;;  %v5456_v0 = vpop.eup %5455 }
 0xa4e   :  { %v7083_v30 = vadd.f32 %v2616_v15, %v2615_v57 }
 0xa50   :  { %5457 = vtanh.f32 %v7083_v30 }
 0xa5a   :  { %v5458_v11 = vpop.eup %5457 }
 0xa5b   :  { %v2619_v33 = vmul.f32 %v5458_v11, %v5456_v0 }
 0xa5d   :  { %2689 = vmatmul.mubr.f32.vlgmr.msra.gmra.mrb[20].mxu0 %v2619_v33  ;;  %2760 = vmatmul.mubr.f32.vlgmr.msra.gmra.mrb[20].mxu1 %v2619_v33 }
 0xa5e   :  { %4827 = vmatpush1.bf16.msra.mxu0 %v6707_v51  ;;  %4859 = vmatpush1.bf16.msra.mxu1 %v6716_v49 }
 0xa5f   :  { %4829 = vmatprep.subr.bf16.mxu0 %v6730_v61  ;;  %4861 = vmatprep.subr.bf16.mxu1 %v6741_v24 }
 0xa60   :  { %2862 = vmatprep.mubr.f32.mxu0 %v5555_v3  ;;  %2933 = vmatprep.mubr.f32.mxu1 %v5555_v3 }
 0xa62   :  { %4831 = vmatpush1.bf16.msra.mxu0 %v6743_v12  ;;  %4863 = vmatpush1.bf16.msra.mxu1 %v6752_v5 }
 0xa63   :  { %4833 = vmatprep.subr.bf16.mxu0 %v6766_v53  ;;  %4865 = vmatprep.subr.bf16.mxu1 %v6777_v2 }
 0xa66   :  { %4835 = vmatpush1.bf16.msra.mxu0 %v6779_v6  ;;  %4867 = vmatpush1.bf16.msra.mxu1 %v6788_v16 }
 0xa67   :  { %4837 = vmatprep.subr.bf16.mxu0 %v6802_v29  ;;  %4869 = vmatprep.subr.bf16.mxu1 %v6813_v44 }
 0xa6a   :  { %4839 = vmatpush1.bf16.msra.mxu0 %v6815_v48  ;;  %4871 = vmatpush1.bf16.msra.mxu1 %v6827_v4 }
 0xa6b   :  { %4841 = vmatprep.subr.bf16.mxu0 %v6840_v22  ;;  %4873 = vmatprep.subr.bf16.mxu1 %v6842_v46 }
 0xa6e   :  { %4843 = vmatpush1.bf16.msra.mxu0 %v6854_v17  ;;  %4875 = vmatpush1.bf16.msra.mxu1 %v6867_v38 }
 0xa6f   :  { %4845 = vmatprep.subr.bf16.mxu0 %v6869_v52  ;;  %4877 = vmatprep.subr.bf16.mxu1 %v6880_v7 }
 0xa72   :  { %4847 = vmatpush1.bf16.msra.mxu0 %v6892_v47  ;;  %4879 = vmatpush1.bf16.msra.mxu1 %v6905_v63 }
 0xa73   :  { %4849 = vmatprep.subr.bf16.mxu0 %v6907_v10  ;;  %4881 = vmatprep.subr.bf16.mxu1 %v6919_v26 }
 0xa76   :  { %4851 = vmatpush1.bf16.msra.mxu0 %v6928_v40  ;;  %4883 = vmatpush1.bf16.msra.mxu1 %v6932_v54 }
 0xa77   :  { %4853 = vmatprep.subr.bf16.mxu0 %v6946_v14  ;;  %4885 = vmatprep.subr.bf16.mxu1 %v6957_v8 }
 0xa7a   :  { %4855 = vmatpush1.bf16.msra.mxu0 %v6959_v55  ;;  %4887 = vmatpush1.bf16.msra.mxu1 %v6968_v41 }
 0xa7b   :  { %4889 = vmatprep.subr.bf16.mxu0 %v6694_v43  ;;  %4921 = vmatprep.subr.bf16.mxu1 %v6705_v27 }
 0xb30   :  { %v2690_v59 = vpop.f32.mrb[20].mxu0  ;;  %v2761_v25 = vpop.f32.mrb[20].mxu1 }
 0xb31   :  { %v5204_v20 = vadd.f32 %v2690_v59, %v7023_v45  ;;  %v2692_v28 = vpop.f32.mrb[21].mxu0  ;;  %v2763_v50 = vpop.f32.mrb[21].mxu1  ;;  %v5220_v31 = vadd.f32 %v2761_v25, %v7038_v34 }
 0xb32   :  { %v5205_v56 = vadd.f32 %v2692_v28, %v7027_v21  ;;  %v5221_v19 = vadd.f32 %v2763_v50, %v7033_v32 }
 0xb33   :  { %v3921_v60 = vmul.f32 -1.442695, %v5204_v20 }
 0xb34   :  { %v3922_v13 = vmul.f32 -1.442695, %v5205_v56  ;;  %v3923_v23 = vmul.f32 -1.442695, %v5221_v19 }
 0xb35   :  { %5459 = vpow2.f32 %v3921_v60 }
 0xb36   :  { %5461 = vpow2.f32 %v3922_v13 }
 0xb37   :  { %5463 = vpow2.f32 %v3923_v23 }
 0xb38   :  { %5465 = vtanh.f32 %v5220_v31 }
 0xb3f   :  { %v5460_v36 = vpop.eup %5459 }
 0xb40   :  { %v5462_v58 = vpop.eup %5461  ;;  %v2773_v62 = vadd.f32 1.0, %v5460_v36 }
 0xb41   :  { %v2779_v35 = vadd.f32 1.0, %v5462_v58  ;;  %v5464_v9 = vpop.eup %5463 }
 0xb42   :  { %5467 = vrcp.f32 %v2773_v62  ;;  %v5466_v37 = vpop.eup %5465  ;;  %v2786_v15 = vadd.f32 1.0, %v5464_v9 }
 0xb43   :  { %5469 = vrcp.f32 %v2779_v35 }
 0xb44   :  { %5471 = vrcp.f32 %v2786_v15 }
 0xb4c   :  { %v5468_v42 = vpop.eup %5467 }
 0xb4d   :  { %v5470_v18 = vpop.eup %5469  ;;  %v2790_v1 = vmul.f32 %v5468_v42, %v5466_v37 }
 0xb4e   :  { %v2789_v39 = vmul.f32 %v5470_v18, %v7083_v30  ;;  %v5472_v0 = vpop.eup %5471 }
 0xb50   :  { %v7125_v57 = vadd.f32 %v2790_v1, %v2789_v39 }
 0xb52   :  { %5473 = vtanh.f32 %v7125_v57 }
 0xb5c   :  { %v5474_v11 = vpop.eup %5473 }
 0xb5d   :  { %v2793_v33 = vmul.f32 %v5474_v11, %v5472_v0 }
 0xb5f   :  { %2863 = vmatmul.mubr.f32.vlgmr.msra.gmra.mrb[22].mxu0 %v2793_v33  ;;  %2934 = vmatmul.mubr.f32.vlgmr.msra.gmra.mrb[22].mxu1 %v2793_v33 }
 0xb60   :  { %4891 = vmatpush1.bf16.msra.mxu0 %v6707_v51  ;;  %4923 = vmatpush1.bf16.msra.mxu1 %v6716_v49 }
 0xb61   :  { %4893 = vmatprep.subr.bf16.mxu0 %v6730_v61  ;;  %4925 = vmatprep.subr.bf16.mxu1 %v6741_v24 }
 0xb62   :  { %3036 = vmatprep.mubr.f32.mxu0 %v5555_v3  ;;  %3107 = vmatprep.mubr.f32.mxu1 %v5555_v3 }
 0xb64   :  { %4895 = vmatpush1.bf16.msra.mxu0 %v6743_v12  ;;  %4927 = vmatpush1.bf16.msra.mxu1 %v6752_v5 }
 0xb65   :  { %4897 = vmatprep.subr.bf16.mxu0 %v6766_v53  ;;  %4929 = vmatprep.subr.bf16.mxu1 %v6777_v2 }
 0xb68   :  { %4899 = vmatpush1.bf16.msra.mxu0 %v6779_v6  ;;  %4931 = vmatpush1.bf16.msra.mxu1 %v6788_v16 }
 0xb69   :  { %4901 = vmatprep.subr.bf16.mxu0 %v6802_v29  ;;  %4933 = vmatprep.subr.bf16.mxu1 %v6813_v44 }
 0xb6c   :  { %4903 = vmatpush1.bf16.msra.mxu0 %v6815_v48  ;;  %4935 = vmatpush1.bf16.msra.mxu1 %v6827_v4 }
 0xb6d   :  { %4905 = vmatprep.subr.bf16.mxu0 %v6840_v22  ;;  %4937 = vmatprep.subr.bf16.mxu1 %v6842_v46 }
 0xb70   :  { %4907 = vmatpush1.bf16.msra.mxu0 %v6854_v17  ;;  %4939 = vmatpush1.bf16.msra.mxu1 %v6867_v38 }
 0xb71   :  { %4909 = vmatprep.subr.bf16.mxu0 %v6869_v52  ;;  %4941 = vmatprep.subr.bf16.mxu1 %v6880_v7 }
 0xb74   :  { %4911 = vmatpush1.bf16.msra.mxu0 %v6892_v47  ;;  %4943 = vmatpush1.bf16.msra.mxu1 %v6905_v63 }
 0xb75   :  { %4913 = vmatprep.subr.bf16.mxu0 %v6907_v10  ;;  %4945 = vmatprep.subr.bf16.mxu1 %v6919_v26 }
 0xb78   :  { %4915 = vmatpush1.bf16.msra.mxu0 %v6928_v40  ;;  %4947 = vmatpush1.bf16.msra.mxu1 %v6932_v54 }
 0xb79   :  { %4917 = vmatprep.subr.bf16.mxu0 %v6946_v14  ;;  %4949 = vmatprep.subr.bf16.mxu1 %v6957_v8 }
 0xb7c   :  { %4919 = vmatpush1.bf16.msra.mxu0 %v6959_v55  ;;  %4951 = vmatpush1.bf16.msra.mxu1 %v6968_v41 }
 0xb7d   :  { %4953 = vmatprep.subr.bf16.mxu0 %v6694_v43  ;;  %4985 = vmatprep.subr.bf16.mxu1 %v6705_v27 }
 0xc32   :  { %v2864_v30 = vpop.f32.mrb[22].mxu0  ;;  %v2935_v59 = vpop.f32.mrb[22].mxu1 }
 0xc33   :  { %v5206_v25 = vadd.f32 %v2864_v30, %v7023_v45  ;;  %v2866_v20 = vpop.f32.mrb[23].mxu0  ;;  %v2937_v28 = vpop.f32.mrb[23].mxu1  ;;  %v5222_v23 = vadd.f32 %v2935_v59, %v7038_v34 }
 0xc34   :  { %v5207_v50 = vadd.f32 %v2866_v20, %v7027_v21  ;;  %v5223_v13 = vadd.f32 %v2937_v28, %v7033_v32 }
 0xc35   :  { %v3924_v56 = vmul.f32 -1.442695, %v5206_v25 }
 0xc36   :  { %v3925_v60 = vmul.f32 -1.442695, %v5207_v50  ;;  %v3926_v19 = vmul.f32 -1.442695, %v5223_v13 }
 0xc37   :  { %5475 = vpow2.f32 %v3924_v56 }
 0xc38   :  { %5477 = vpow2.f32 %v3925_v60 }
 0xc39   :  { %5479 = vpow2.f32 %v3926_v19 }
 0xc3a   :  { %5481 = vtanh.f32 %v5222_v23 }
 0xc41   :  { %v5476_v31 = vpop.eup %5475 }
 0xc42   :  { %v5478_v36 = vpop.eup %5477  ;;  %v2947_v58 = vadd.f32 1.0, %v5476_v31 }
 0xc43   :  { %v2953_v62 = vadd.f32 1.0, %v5478_v36  ;;  %v5480_v35 = vpop.eup %5479 }
 0xc44   :  { %5483 = vrcp.f32 %v2947_v58  ;;  %v5482_v9 = vpop.eup %5481  ;;  %v2960_v1 = vadd.f32 1.0, %v5480_v35 }
 0xc45   :  { %5485 = vrcp.f32 %v2953_v62 }
 0xc46   :  { %5487 = vrcp.f32 %v2960_v1 }
 0xc4e   :  { %v5484_v37 = vpop.eup %5483 }
 0xc4f   :  { %v5486_v42 = vpop.eup %5485  ;;  %v2964_v18 = vmul.f32 %v5484_v37, %v5482_v9 }
 0xc50   :  { %v2963_v15 = vmul.f32 %v5486_v42, %v7125_v57  ;;  %v5488_v0 = vpop.eup %5487 }
 0xc52   :  { %v7167_v39 = vadd.f32 %v2964_v18, %v2963_v15 }
 0xc54   :  { %5489 = vtanh.f32 %v7167_v39 }
 0xc5e   :  { %v5490_v11 = vpop.eup %5489 }
 0xc5f   :  { %v2967_v33 = vmul.f32 %v5490_v11, %v5488_v0 }
 0xc61   :  { %3037 = vmatmul.mubr.f32.vlgmr.msra.gmra.mrb[24].mxu0 %v2967_v33  ;;  %3108 = vmatmul.mubr.f32.vlgmr.msra.gmra.mrb[24].mxu1 %v2967_v33 }
 0xc62   :  { %4955 = vmatpush1.bf16.msra.mxu0 %v6707_v51  ;;  %4987 = vmatpush1.bf16.msra.mxu1 %v6716_v49 }
 0xc63   :  { %4957 = vmatprep.subr.bf16.mxu0 %v6730_v61  ;;  %4989 = vmatprep.subr.bf16.mxu1 %v6741_v24 }
 0xc64   :  { %3210 = vmatprep.mubr.f32.mxu0 %v5555_v3  ;;  %3281 = vmatprep.mubr.f32.mxu1 %v5555_v3 }
 0xc66   :  { %4959 = vmatpush1.bf16.msra.mxu0 %v6743_v12  ;;  %4991 = vmatpush1.bf16.msra.mxu1 %v6752_v5 }
 0xc67   :  { %4961 = vmatprep.subr.bf16.mxu0 %v6766_v53  ;;  %4993 = vmatprep.subr.bf16.mxu1 %v6777_v2 }
 0xc6a   :  { %4963 = vmatpush1.bf16.msra.mxu0 %v6779_v6  ;;  %4995 = vmatpush1.bf16.msra.mxu1 %v6788_v16 }
 0xc6b   :  { %4965 = vmatprep.subr.bf16.mxu0 %v6802_v29  ;;  %4997 = vmatprep.subr.bf16.mxu1 %v6813_v44 }
 0xc6e   :  { %4967 = vmatpush1.bf16.msra.mxu0 %v6815_v48  ;;  %4999 = vmatpush1.bf16.msra.mxu1 %v6827_v4 }
 0xc6f   :  { %4969 = vmatprep.subr.bf16.mxu0 %v6840_v22  ;;  %5001 = vmatprep.subr.bf16.mxu1 %v6842_v46 }
 0xc72   :  { %4971 = vmatpush1.bf16.msra.mxu0 %v6854_v17  ;;  %5003 = vmatpush1.bf16.msra.mxu1 %v6867_v38 }
 0xc73   :  { %4973 = vmatprep.subr.bf16.mxu0 %v6869_v52  ;;  %5005 = vmatprep.subr.bf16.mxu1 %v6880_v7 }
 0xc76   :  { %4975 = vmatpush1.bf16.msra.mxu0 %v6892_v47  ;;  %5007 = vmatpush1.bf16.msra.mxu1 %v6905_v63 }
 0xc77   :  { %4977 = vmatprep.subr.bf16.mxu0 %v6907_v10  ;;  %5009 = vmatprep.subr.bf16.mxu1 %v6919_v26 }
 0xc7a   :  { %4979 = vmatpush1.bf16.msra.mxu0 %v6928_v40  ;;  %5011 = vmatpush1.bf16.msra.mxu1 %v6932_v54 }
 0xc7b   :  { %4981 = vmatprep.subr.bf16.mxu0 %v6946_v14  ;;  %5013 = vmatprep.subr.bf16.mxu1 %v6957_v8 }
 0xc7e   :  { %4983 = vmatpush1.bf16.msra.mxu0 %v6959_v55  ;;  %5015 = vmatpush1.bf16.msra.mxu1 %v6968_v41 }
 0xc7f   :  { %5017 = vmatprep.subr.bf16.mxu0 %v6694_v43  ;;  %5049 = vmatprep.subr.bf16.mxu1 %v6705_v27 }
 0xd34   :  { %v3038_v57 = vpop.f32.mrb[24].mxu0  ;;  %v3109_v30 = vpop.f32.mrb[24].mxu1 }
 0xd35   :  { %v5208_v59 = vadd.f32 %v3038_v57, %v7023_v45  ;;  %v3040_v25 = vpop.f32.mrb[25].mxu0  ;;  %v3111_v20 = vpop.f32.mrb[25].mxu1  ;;  %v5224_v19 = vadd.f32 %v3109_v30, %v7038_v34 }
 0xd36   :  { %v5209_v28 = vadd.f32 %v3040_v25, %v7027_v21  ;;  %v5225_v60 = vadd.f32 %v3111_v20, %v7033_v32 }
 0xd37   :  { %v3927_v50 = vmul.f32 -1.442695, %v5208_v59 }
 0xd38   :  { %v3928_v56 = vmul.f32 -1.442695, %v5209_v28  ;;  %v3929_v13 = vmul.f32 -1.442695, %v5225_v60 }
 0xd39   :  { %5491 = vpow2.f32 %v3927_v50 }
 0xd3a   :  { %5493 = vpow2.f32 %v3928_v56 }
 0xd3b   :  { %5495 = vpow2.f32 %v3929_v13 }
 0xd3c   :  { %5497 = vtanh.f32 %v5224_v19 }
 0xd43   :  { %v5492_v23 = vpop.eup %5491 }
 0xd44   :  { %v5494_v31 = vpop.eup %5493  ;;  %v3121_v36 = vadd.f32 1.0, %v5492_v23 }
 0xd45   :  { %v3127_v58 = vadd.f32 1.0, %v5494_v31  ;;  %v5496_v62 = vpop.eup %5495 }
 0xd46   :  { %5499 = vrcp.f32 %v3121_v36  ;;  %v5498_v35 = vpop.eup %5497  ;;  %v3134_v18 = vadd.f32 1.0, %v5496_v62 }
 0xd47   :  { %5501 = vrcp.f32 %v3127_v58 }
 0xd48   :  { %5503 = vrcp.f32 %v3134_v18 }
 0xd50   :  { %v5500_v9 = vpop.eup %5499 }
 0xd51   :  { %v5502_v37 = vpop.eup %5501  ;;  %v3138_v42 = vmul.f32 %v5500_v9, %v5498_v35 }
 0xd52   :  { %v3137_v1 = vmul.f32 %v5502_v37, %v7167_v39  ;;  %v5504_v0 = vpop.eup %5503 }
 0xd54   :  { %v7209_v15 = vadd.f32 %v3138_v42, %v3137_v1 }
 0xd56   :  { %5505 = vtanh.f32 %v7209_v15 }
 0xd60   :  { %v5506_v11 = vpop.eup %5505 }
 0xd61   :  { %v3141_v33 = vmul.f32 %v5506_v11, %v5504_v0  ;;  %v3667_v11 = vld [vmem:[%s7358_s4 + $0x18] sm:$0xff] }
 0xd63   :  { %3211 = vmatmul.mubr.f32.vlgmr.msra.gmra.mrb[26].mxu0 %v3141_v33  ;;  %3282 = vmatmul.mubr.f32.vlgmr.msra.gmra.mrb[26].mxu1 %v3141_v33 }
 0xd64   :  { %5019 = vmatpush1.bf16.msra.mxu0 %v6707_v51  ;;  %5051 = vmatpush1.bf16.msra.mxu1 %v6716_v49 }
 0xd65   :  { %5021 = vmatprep.subr.bf16.mxu0 %v6730_v61  ;;  %5053 = vmatprep.subr.bf16.mxu1 %v6741_v24 }
 0xd66   :  { %3384 = vmatprep.mubr.f32.mxu0 %v5555_v3  ;;  %3455 = vmatprep.mubr.f32.mxu1 %v5555_v3 }
 0xd68   :  { %5023 = vmatpush1.bf16.msra.mxu0 %v6743_v12  ;;  %5055 = vmatpush1.bf16.msra.mxu1 %v6752_v5 }
 0xd69   :  { %5025 = vmatprep.subr.bf16.mxu0 %v6766_v53  ;;  %5057 = vmatprep.subr.bf16.mxu1 %v6777_v2 }
 0xd6c   :  { %5027 = vmatpush1.bf16.msra.mxu0 %v6779_v6  ;;  %5059 = vmatpush1.bf16.msra.mxu1 %v6788_v16 }
 0xd6d   :  { %5029 = vmatprep.subr.bf16.mxu0 %v6802_v29  ;;  %5061 = vmatprep.subr.bf16.mxu1 %v6813_v44 }
 0xd70   :  { %5031 = vmatpush1.bf16.msra.mxu0 %v6815_v48  ;;  %5063 = vmatpush1.bf16.msra.mxu1 %v6827_v4 }
 0xd71   :  { %5033 = vmatprep.subr.bf16.mxu0 %v6840_v22  ;;  %5065 = vmatprep.subr.bf16.mxu1 %v6842_v46 }
 0xd74   :  { %5035 = vmatpush1.bf16.msra.mxu0 %v6854_v17  ;;  %5067 = vmatpush1.bf16.msra.mxu1 %v6867_v38 }
 0xd75   :  { %5037 = vmatprep.subr.bf16.mxu0 %v6869_v52  ;;  %5069 = vmatprep.subr.bf16.mxu1 %v6880_v7 }
 0xd78   :  { %5039 = vmatpush1.bf16.msra.mxu0 %v6892_v47  ;;  %5071 = vmatpush1.bf16.msra.mxu1 %v6905_v63 }
 0xd79   :  { %5041 = vmatprep.subr.bf16.mxu0 %v6907_v10  ;;  %5073 = vmatprep.subr.bf16.mxu1 %v6919_v26 }
 0xd7c   :  { %5043 = vmatpush1.bf16.msra.mxu0 %v6928_v40  ;;  %5075 = vmatpush1.bf16.msra.mxu1 %v6932_v54 }
 0xd7d   :  { %5045 = vmatprep.subr.bf16.mxu0 %v6946_v14  ;;  %5077 = vmatprep.subr.bf16.mxu1 %v6957_v8 }
 0xd80   :  { %5047 = vmatpush1.bf16.msra.mxu0 %v6959_v55  ;;  %5079 = vmatpush1.bf16.msra.mxu1 %v6968_v41 }
 0xd81   :  { %5081 = vmatprep.subr.bf16.mxu0 %v6694_v43  ;;  %5113 = vmatprep.subr.bf16.mxu1 %v6705_v27 }
 0xe36   :  { %v3212_v39 = vpop.f32.mrb[26].mxu0  ;;  %v3283_v57 = vpop.f32.mrb[26].mxu1 }
 0xe37   :  { %v5210_v30 = vadd.f32 %v3212_v39, %v7023_v45  ;;  %v3214_v59 = vpop.f32.mrb[27].mxu0  ;;  %v3285_v25 = vpop.f32.mrb[27].mxu1  ;;  %v5226_v13 = vadd.f32 %v3283_v57, %v7038_v34  ;;  %v3668_v39 = vld [vmem:[%s7358_s4 + $0x20] sm:$0xff]  ;;  %v3669_v57 = vld [vmem:[%s7358_s4 + $0x28] sm:$0xff] }
 0xe38   :  { %v5211_v20 = vadd.f32 %v3214_v59, %v7027_v21  ;;  %v5227_v56 = vadd.f32 %v3285_v25, %v7033_v32  ;;  %v3670_v59 = vld [vmem:[%s7358_s4 + $0x30] sm:$0xff]  ;;  %v3671_v25 = vld [vmem:[%s7358_s4 + $0x38] sm:$0xff] }
 0xe39   :  { %v3930_v28 = vmul.f32 -1.442695, %v5210_v30  ;;  %v5151_v30 = vpack.c.bf16 %v3669_v57, %v3668_v39 }
 0xe3a   :  { %v3931_v50 = vmul.f32 -1.442695, %v5211_v20  ;;  %v3932_v60 = vmul.f32 -1.442695, %v5227_v56  ;;  %v5154_v20 = vpack.c.bf16 %v3671_v25, %v3670_v59 }
 0xe3b   :  { %5507 = vpow2.f32 %v3930_v28  ;;  %v3672_v28 = vld [vmem:[%s7358_s4 + $0x40] sm:$0xff] }
 0xe3c   :  { %5509 = vpow2.f32 %v3931_v50  ;;  %v3673_v50 = vld [vmem:[%s7358_s4 + $0x48] sm:$0xff] }
 0xe3d   :  { %5511 = vpow2.f32 %v3932_v60  ;;  %v5157_v56 = vpack.c.bf16 %v3673_v50, %v3672_v28  ;;  %v3674_v60 = vld [vmem:[%s7358_s4 + $0x50] sm:$0xff] }
 0xe3e   :  { %5513 = vtanh.f32 %v5226_v13  ;;  %v3675_v13 = vld [vmem:[%s7358_s4 + $0x58] sm:$0xff] }
 0xe45   :  { %v5508_v43 = vpop.eup %5507 }
 0xe46   :  { %v5510_v19 = vpop.eup %5509  ;;  %v3295_v27 = vadd.f32 1.0, %v5508_v43  ;;  %v3676_v43 = vld [vmem:[%s7358_s4 + $0x60] sm:$0xff] }
 0xe47   :  { %v3301_v23 = vadd.f32 1.0, %v5510_v19  ;;  %v5512_v31 = vpop.eup %5511  ;;  %v5160_v19 = vpack.c.bf16 %v3675_v13, %v3674_v60 }
 0xe48   :  { %5515 = vrcp.f32 %v3295_v27  ;;  %v5514_v36 = vpop.eup %5513  ;;  %v3308_v9 = vadd.f32 1.0, %v5512_v31  ;;  %v3677_v27 = vld [vmem:[%s7358_s4 + $0x68] sm:$0xff]  ;;  %v3678_v31 = vld [vmem:[%s7358_s4 + $0x70] sm:$0xff] }
 0xe49   :  { %5517 = vrcp.f32 %v3301_v23  ;;  %v5163_v23 = vpack.c.bf16 %v3677_v27, %v3676_v43 }
 0xe4a   :  { %5519 = vrcp.f32 %v3308_v9 }
 0xe52   :  { %v5516_v58 = vpop.eup %5515 }
 0xe53   :  { %v5518_v62 = vpop.eup %5517  ;;  %v3312_v35 = vmul.f32 %v5516_v58, %v5514_v36  ;;  %v3679_v36 = vld [vmem:[%s7358_s4 + $0x78] sm:$0xff] }
 0xe54   :  { %v3311_v37 = vmul.f32 %v5518_v62, %v7209_v15  ;;  %v5520_v18 = vpop.eup %5519  ;;  %v3666_v15 = vld [vmem:[%s7358_s4 + $0x10] sm:$0xff]  ;;  %v5166_v58 = vpack.c.bf16 %v3679_v36, %v3678_v31 }
 0xe55   :  { %v5148_v33 = vpack.c.bf16 %v3667_v11, %v3666_v15 }
 0xe56   :  { %v7251_v42 = vadd.f32 %v3312_v35, %v3311_v37 }
 0xe58   :  { %5521 = vtanh.f32 %v7251_v42 }
 0xe62   :  { %v5522_v1 = vpop.eup %5521 }
 0xe63   :  { %v3315_v0 = vmul.f32 %v5522_v1, %v5520_v18 }
 0xe65   :  { %3385 = vmatmul.mubr.f32.vlgmr.msra.gmra.mrb[28].mxu0 %v3315_v0  ;;  %3456 = vmatmul.mubr.f32.vlgmr.msra.gmra.mrb[28].mxu1 %v3315_v0 }
 0xe66   :  { %5083 = vmatpush1.bf16.msra.mxu0 %v6707_v51  ;;  %5115 = vmatpush1.bf16.msra.mxu1 %v6716_v49 }
 0xe67   :  { %5085 = vmatprep.subr.bf16.mxu0 %v6730_v61  ;;  %5117 = vmatprep.subr.bf16.mxu1 %v6741_v24 }
 0xe68   :  { %3558 = vmatprep.mubr.f32.mxu0 %v5555_v3  ;;  %3629 = vmatprep.mubr.f32.mxu1 %v5555_v3 }
 0xe6a   :  { %5087 = vmatpush1.bf16.msra.mxu0 %v6743_v12  ;;  %5119 = vmatpush1.bf16.msra.mxu1 %v6752_v5 }
 0xe6b   :  { %5089 = vmatprep.subr.bf16.mxu0 %v6766_v53  ;;  %5121 = vmatprep.subr.bf16.mxu1 %v6777_v2 }
 0xe6e   :  { %5091 = vmatpush1.bf16.msra.mxu0 %v6779_v6  ;;  %5123 = vmatpush1.bf16.msra.mxu1 %v6788_v16 }
 0xe6f   :  { %5093 = vmatprep.subr.bf16.mxu0 %v6802_v29  ;;  %5125 = vmatprep.subr.bf16.mxu1 %v6813_v44 }
 0xe72   :  { %5095 = vmatpush1.bf16.msra.mxu0 %v6815_v48  ;;  %5127 = vmatpush1.bf16.msra.mxu1 %v6827_v4 }
 0xe73   :  { %5097 = vmatprep.subr.bf16.mxu0 %v6840_v22  ;;  %5129 = vmatprep.subr.bf16.mxu1 %v6842_v46 }
 0xe76   :  { %5099 = vmatpush1.bf16.msra.mxu0 %v6854_v17  ;;  %5131 = vmatpush1.bf16.msra.mxu1 %v6867_v38 }
 0xe77   :  { %5101 = vmatprep.subr.bf16.mxu0 %v6869_v52  ;;  %5133 = vmatprep.subr.bf16.mxu1 %v6880_v7 }
 0xe7a   :  { %5103 = vmatpush1.bf16.msra.mxu0 %v6892_v47  ;;  %5135 = vmatpush1.bf16.msra.mxu1 %v6905_v63 }
 0xe7b   :  { %5105 = vmatprep.subr.bf16.mxu0 %v6907_v10  ;;  %5137 = vmatprep.subr.bf16.mxu1 %v6919_v26 }
 0xe7e   :  { %5107 = vmatpush1.bf16.msra.mxu0 %v6928_v40  ;;  %5139 = vmatpush1.bf16.msra.mxu1 %v6932_v54 }
 0xe7f   :  { %5109 = vmatprep.subr.bf16.mxu0 %v6946_v14  ;;  %5141 = vmatprep.subr.bf16.mxu1 %v6957_v8  ;;  %v3664_v14 = vld [vmem:[%s7358_s4] sm:$0xff]  ;;  %v3665_v8 = vld [vmem:[%s7358_s4 + $0x8] sm:$0xff] }
 0xe82   :  { %5111 = vmatpush1.bf16.msra.mxu0 %v6959_v55  ;;  %5143 = vmatpush1.bf16.msra.mxu1 %v6968_v41  ;;  %v5145_v55 = vpack.c.bf16 %v3665_v8, %v3664_v14  ;;  %v5556_v41 = vmov 0.0|0.0  }
 0xe83   :  { %5144 = vmatprep.subr.bf16.mxu0 %v5556_v41 }
 0xf38   :  { %v3386_v51 = vpop.f32.mrb[28].mxu0  ;;  %v3457_v49 = vpop.f32.mrb[28].mxu1 }
 0xf39   :  { %v5212_v61 = vadd.f32 %v3386_v51, %v7023_v45  ;;  %v3388_v24 = vpop.f32.mrb[29].mxu0  ;;  %v3459_v12 = vpop.f32.mrb[29].mxu1  ;;  %v5228_v29 = vadd.f32 %v3457_v49, %v7038_v34 }
 0xf3a   :  { %v5213_v5 = vadd.f32 %v3388_v24, %v7027_v21  ;;  %v5229_v6 = vadd.f32 %v3459_v12, %v7033_v32 }
 0xf3b   :  { %v3933_v53 = vmul.f32 -1.442695, %v5212_v61 }
 0xf3c   :  { %v3934_v2 = vmul.f32 -1.442695, %v5213_v5  ;;  %v3935_v16 = vmul.f32 -1.442695, %v5229_v6 }
 0xf3d   :  { %5523 = vpow2.f32 %v3933_v53 }
 0xf3e   :  { %5525 = vpow2.f32 %v3934_v2 }
 0xf3f   :  { %5527 = vpow2.f32 %v3935_v16 }
 0xf40   :  { %5529 = vtanh.f32 %v5228_v29 }
 0xf47   :  { %v5524_v44 = vpop.eup %5523 }
 0xf48   :  { %v5526_v48 = vpop.eup %5525  ;;  %v3469_v4 = vadd.f32 1.0, %v5524_v44 }
 0xf49   :  { %v3475_v22 = vadd.f32 1.0, %v5526_v48  ;;  %v5528_v46 = vpop.eup %5527 }
 0xf4a   :  { %5531 = vrcp.f32 %v3469_v4  ;;  %v5530_v17 = vpop.eup %5529  ;;  %v3482_v47 = vadd.f32 1.0, %v5528_v46  ;;  %v3939_v4 = vld [vmem:[%s7359_s5] ss:$0 sm:$0xff] }
 0xf4b   :  { %5533 = vrcp.f32 %v3475_v22 }
 0xf4c   :  { %5535 = vrcp.f32 %v3482_v47 }
 0xf54   :  { %v5532_v38 = vpop.eup %5531 }
 0xf55   :  { %v5534_v52 = vpop.eup %5533  ;;  %v3486_v7 = vmul.f32 %v5532_v38, %v5530_v17 }
 0xf56   :  { %v3485_v63 = vmul.f32 %v5534_v52, %v7251_v42  ;;  %v5536_v26 = vpop.eup %5535 }
 0xf58   :  { %v7291_v10 = vadd.f32 %v3486_v7, %v3485_v63 }
 0xf5a   :  { %5537 = vtanh.f32 %v7291_v10 }
 0xf64   :  { %v5538_v40 = vpop.eup %5537 }
 0xf65   :  { %v3489_v54 = vmul.f32 %v5538_v40, %v5536_v26 }
 0xf67   :  { %3559 = vmatmul.mubr.f32.vlgmr.msra.gmra.mrb[30].mxu0 %v3489_v54  ;;  %3630 = vmatmul.mubr.f32.vlgmr.msra.gmra.mrb[30].mxu1 %v3489_v54 }
 0xf68   :  { %5146 = vmatpush3.bf16.msra.mxu0 %v5145_v55  ;;  %3989 = vmatprep.mubr.msk.f32.mxu0 %vm5557_vm0, %v5555_v3 }
 0xf69   :  { %5147 = vmatprep.subr.bf16.mxu0 %v5556_v41 }
 0xf6c   :  { %5149 = vmatpush3.bf16.msra.mxu0 %v5148_v33 }
 0xf6d   :  { %5150 = vmatprep.subr.bf16.mxu0 %v5556_v41 }
 0xf70   :  { %5152 = vmatpush3.bf16.msra.mxu0 %v5151_v30 }
 0xf71   :  { %5153 = vmatprep.subr.bf16.mxu0 %v5556_v41 }
 0xf74   :  { %5155 = vmatpush3.bf16.msra.mxu0 %v5154_v20 }
 0xf75   :  { %5156 = vmatprep.subr.bf16.mxu0 %v5556_v41 }
 0xf78   :  { %5158 = vmatpush3.bf16.msra.mxu0 %v5157_v56 }
 0xf79   :  { %5159 = vmatprep.subr.bf16.mxu0 %v5556_v41 }
 0xf7c   :  { %5161 = vmatpush3.bf16.msra.mxu0 %v5160_v19 }
 0xf7d   :  { %5162 = vmatprep.subr.bf16.mxu0 %v5556_v41 }
 0xf80   :  { %5164 = vmatpush3.bf16.msra.mxu0 %v5163_v23 }
 0xf81   :  { %5165 = vmatprep.subr.bf16.mxu0 %v5556_v41 }
 0xf84   :  { %5167 = vmatpush3.bf16.msra.mxu0 %v5166_v58 }
0x103a   :  { %v3560_v62 = vpop.f32.mrb[30].mxu0  ;;  %v3631_v35 = vpop.f32.mrb[30].mxu1 }
0x103b   :  { %v5214_v9 = vadd.f32 %v3560_v62, %v7023_v45  ;;  %v3562_v3 = vpop.f32.mrb[31].mxu0  ;;  %v3633_v37 = vpop.f32.mrb[31].mxu1  ;;  %v5230_v49 = vadd.f32 %v3631_v35, %v7038_v34 }
0x103c   :  { %v5215_v42 = vadd.f32 %v3562_v3, %v7027_v21  ;;  %v5231_v0 = vadd.f32 %v3633_v37, %v7033_v32 }
0x103d   :  { %v3936_v18 = vmul.f32 -1.442695, %v5214_v9 }
0x103e   :  { %v3937_v1 = vmul.f32 -1.442695, %v5215_v42  ;;  %v3938_v51 = vmul.f32 -1.442695, %v5231_v0 }
0x103f   :  { %5539 = vpow2.f32 %v3936_v18 }
0x1040   :  { %5541 = vpow2.f32 %v3937_v1 }
0x1041   :  { %5543 = vpow2.f32 %v3938_v51 }
0x1042   :  { %5545 = vtanh.f32 %v5230_v49 }
0x1049   :  { %v5540_v61 = vpop.eup %5539 }
0x104a   :  { %v5542_v24 = vpop.eup %5541  ;;  %v3643_v12 = vadd.f32 1.0, %v5540_v61 }
0x104b   :  { %v3649_v5 = vadd.f32 1.0, %v5542_v24  ;;  %v5544_v45 = vpop.eup %5543 }
0x104c   :  { %5547 = vrcp.f32 %v3643_v12  ;;  %v5546_v53 = vpop.eup %5545  ;;  %v3656_v16 = vadd.f32 1.0, %v5544_v45 }
0x104d   :  { %5549 = vrcp.f32 %v3649_v5 }
0x104e   :  { %5551 = vrcp.f32 %v3656_v16 }
0x1056   :  { %v5548_v21 = vpop.eup %5547 }
0x1057   :  { %v5550_v2 = vpop.eup %5549  ;;  %v3660_v6 = vmul.f32 %v5548_v21, %v5546_v53 }
0x1058   :  { %v3659_v29 = vmul.f32 %v5550_v2, %v7291_v10  ;;  %v5552_v34 = vpop.eup %5551 }
0x105a   :  { %v3661_v32 = vadd.f32 %v3660_v6, %v3659_v29 }
0x105c   :  { %5553 = vtanh.f32 %v3661_v32 }
0x1066   :  { %v5554_v44 = vpop.eup %5553 }
0x1067   :  { %v3663_v48 = vmul.f32 %v5554_v44, %v5552_v34 }
0x1069   :  { %3990 = vmatmul.mubr.f32.vlgmr.msra.gmra.mrb[32].mxu0 %v3663_v48 }
0x113c   :  { %v3753_v22 = vpop.f32.mrb[32].mxu0 }
0x113d   :  { %v3754_v46 = vadd.f32 %v3939_v4, %v3753_v22  ;;  %v3991_v17 = vpop.f32.mrb[33].mxu0 }
0x113f   :  { %3757 = vst [vmem:[%s7360_s6] sm:$0xff] %v3754_v46 }

</bundles_post_ra>
